<compile_context>
chip_gen: v7x
topology: tpu7x:2x2x1
jax: 0.10.0
libtpu: 0.0.40
codegen_flags: <defaults>
</compile_context>

<pallas_src>
import functools
import time

import numpy as np
import jax
import jax.numpy as jnp
from jax import lax
from jax.experimental import pallas as pl
from jax.experimental.pallas import tpu as pltpu

NPAD = 128          # padded node count (lane-aligned)
HIDDEN = 32         # hidden_unit_message_dim


def _full_spec(shape):
    nd = len(shape)
    return pl.BlockSpec(shape, lambda i, _nd=nd: (0,) * _nd)


def _bpgnn_kernel(n_step, inv_n,
                  j_ref, bias_c_ref, bias_r_ref, nmask_r_ref,
                  wg_ref, a1_ref, a2_ref,
                  w1_ref, b1_ref, w2_ref, b2_ref, w3_ref, b3_ref,
                  r0_ref, r1_ref, cij_ref, ci_ref, dom_ref,
                  p00_ref, p01_ref, p10_ref, p11_ref):
    J = j_ref[...]                    # [N, N]
    bias = bias_c_ref[...]            # [N, 1]
    bias_row = bias_r_ref[...]        # [1, N]
    nmask_row = nmask_r_ref[...]      # [1, N]  (1.0 real node, 0.0 padding)

    edge = jnp.abs(J) > 0.0                               # adjacency (bool)
    mask = jnp.where(edge, 1.0, 0.0)                      # adjacency (float)
    deg = jnp.sum(mask, axis=1, keepdims=True)            # [N,1]
    jsum = jnp.sum(J, axis=1, keepdims=True)              # [N,1]

    def logaddexp(a, b):
        m = jnp.maximum(a, b)
        return m + jnp.log(1.0 + jnp.exp(-jnp.abs(a - b)))

    # ---------------- GraphAttentionLayer: estimate_Cij ----------------
    # feat = [-bias, bias, deg, jsum] built implicitly (no concat needed).
    wg = wg_ref[...]                                      # [4, H]
    Wh = ((-bias) * wg[0:1, :] + bias * wg[1:2, :]
          + deg * wg[2:3, :] + jsum * wg[3:4, :])         # [N, H] == feat @ W
    s1 = jnp.sum(Wh * a1_ref[...], axis=1, keepdims=True)     # Wh @ a[:H]   [N,1]
    # s2 as a lane-dense row on the idle MXU (replaces broadcast + 128x128 transpose).
    s2_row = lax.dot_general(a2_ref[...], Wh, (((1,), (1,)), ((), ())),
                             preferred_element_type=jnp.float32)   # [1, N]
    e = s1 + s2_row                                            # e[i,j] = s1[i]+s2[j]
    e = jnp.where(e > 0.0, e, 0.2 * e)                         # LeakyReLU(0.2)
    # NOTE: exp with no max-subtraction, matching the torch GAT exactly.
    att = jnp.where(edge, jnp.exp(e), 0.0)
    cij = 0.5 * (att + att.T)                                  # symmetrized Cij

    # ---------------- MLP: estimate_Ci ----------------
    w1 = w1_ref[...]
    l1 = ((-bias) * w1[0:1, :] + bias * w1[1:2, :]
          + deg * w1[2:3, :] + jsum * w1[3:4, :] + b1_ref[...])
    l1 = jnp.maximum(l1, 0.0)
    l2 = jnp.dot(l1, w2_ref[...], preferred_element_type=jnp.float32) + b2_ref[...]
    l2 = jnp.maximum(l2, 0.0)
    ci_row = lax.dot_general(w3_ref[...], l2, (((1,), (1,)), ((), ())),
                             preferred_element_type=jnp.float32) + b3_ref[...]  # [1,N]

    # ---------------- scaling factors (all lane-dense rows) ----------------
    # cij is exactly symmetric, so its column sums (exact VPU axis-0 reduce) equal
    # the reference's row sums.
    dom_row = ci_row + jnp.sum(cij, axis=0, keepdims=True)     # [1, N]
    # sign(0)*thres == 0 exactly as in torch (no extra clamp, matching the reference).
    sgn = jnp.where(dom_row > 0.0, 1.0, jnp.where(dom_row < 0.0, -1.0, 0.0))
    dom_row = sgn * jnp.where(jnp.abs(dom_row) > 0.1, jnp.abs(dom_row), 0.1)
    dom_row = jnp.where(nmask_row > 0.0, dom_row, 1.0)         # keep padding finite

    inv_dom_row = 1.0 / dom_row                 # hoisted out of the BP loop   [1,N]
    bx1 = bias_row * inv_dom_row                # bias_scale                   [1,N]
    bx0 = -bx1

    cij_safe = jnp.where(cij != 0.0, cij, 1.0)  # only edge entries ever used
    jsc = J / cij_safe                          # J_scale = J / Cij
    njsc = -jsc                                 # hoisted negation (loop-resident)

    # ---------------- BP initialization ----------------
    msg0 = jnp.zeros((NPAD, NPAD), jnp.float32)  # edge_messages[s, i, j] (log-domain)
    msg1 = jnp.zeros((NPAD, NPAD), jnp.float32)
    g0 = bx0                                     # pre-normalization log-beliefs [1,N]
    g1 = bx1
    lnz = logaddexp(g0, g1)
    h0 = g0 - lnz                                # hidden_states (log marginals) [1,N]
    h1 = g1 - lnz

    # ---------------- BP message-passing loop (log-domain, early exit) ----------
    def cond(carry):
        step, done = carry[0], carry[1]
        return jnp.logical_and(step < n_step, done == 0)

    def body(carry):
        step, done, msg0, msg1, g0, g1, h0, h1 = carry
        # Fold the sender-side log-belief into the (required) message transpose:
        # T0[i,j] = msg0[j,i] - g0[i]
        T0 = (msg0 - g0).T
        T1 = (msg1 - g1).T
        M0 = jnp.maximum(jsc - T0, njsc - T1)    # max over sender state s, target t=0
        M1 = jnp.maximum(njsc - T0, jsc - T1)    # target t=1
        L = jnp.maximum(M0, M1) + jnp.log(1.0 + jnp.exp(-jnp.abs(M0 - M1)))
        # Off-edge entries: cij==0, so messages stay exactly 0 (no edge gating needed).
        m0_new = cij * (M0 - L)
        m1_new = cij * (M1 - L)

        # node_messages[j, t] = sum_i msg_t[i,j]: exact f32 column sums (VPU/XLU).
        nm0 = jnp.sum(m0_new, axis=0, keepdims=True)
        nm1 = jnp.sum(m1_new, axis=0, keepdims=True)
        g0n = bx0 + nm0 * inv_dom_row
        g1n = bx1 + nm1 * inv_dom_row
        lnz_n = logaddexp(g0n, g1n)
        h0n = g0n - lnz_n
        h1n = g1n - lnz_n

        # Convergence / NaN check every other step (and on the last step): skips the
        # vector->scalar reduce+sync that serializes the while loop on even steps.
        check = jnp.logical_or((step % 2) == 1, step == n_step - 1)

        def _diff():
            d = (h0n - h0) ** 2 + (h1n - h1) ** 2
            return jnp.sum(d * nmask_row) * inv_n      # mean over real nodes
        diff = lax.cond(check, _diff, lambda: jnp.float32(1.0))

        conv = diff < 1e-7
        bad = jnp.logical_not(diff < 1e38)             # NaN or Inf
        # PyTorch break semantics: messages stay committed; hidden reverts on NaN/Inf.
        h0_out = jnp.where(bad, h0, h0n)
        h1_out = jnp.where(bad, h1, h1n)
        done_n = jnp.logical_or(conv, bad).astype(jnp.int32)
        return (step + 1, done_n, m0_new, m1_new, g0n, g1n, h0_out, h1_out)

    carry0 = (jnp.array(0, jnp.int32), jnp.array(0, jnp.int32),
              msg0, msg1, g0, g1, h0, h1)
    carry = lax.while_loop(cond, body, carry0)
    _, _, msg0, msg1, _, _, h0, h1 = carry

    # ---------------- readout & dense pairwise marginals (log-domain fused) -----
    r0 = jnp.exp(h0)                              # [1,N]
    r1 = jnp.exp(h1)

    C0 = h0 - msg0                                # C0[i,j]  = h0[j] - msg0[i,j]
    C1 = h1 - msg1
    C0T = C0.T                                    # C0T[i,j] = h0[i] - msg0[j,i]
    C1T = C1.T
    P00 = jnp.exp(jsc + C0 + C0T)                 # (s,t) = (0,0)
    P01 = jnp.exp(C1 + C0T - jsc)                 # (0,1)
    P10 = jnp.exp(C0 + C1T - jsc)                 # (1,0)
    P11 = jnp.exp(jsc + C1 + C1T)                 # (1,1)
    S = P00 + P01 + P10 + P11
    invS = 1.0 / S                                # exact divide: keeps sum-to-1 < 1e-4

    r0_ref[...] = r0
    r1_ref[...] = r1
    cij_ref[...] = cij
    ci_ref[...] = ci_row
    dom_ref[...] = dom_row
    p00_ref[...] = P00 * invS
    p01_ref[...] = P01 * invS
    p10_ref[...] = P10 * invS
    p11_ref[...] = P11 * invS


def init_params(key, hidden=HIDDEN):
    # _initialization(): Linear weights ~ N(0, 0.1), biases = 0.
    # GAT W ~ N(0, 0.1), a ~ N(0, 0.1) (split into a1 = a[:H], a2 = a[H:]).
    ks = jax.random.split(key, 6)
    std = 0.1
    Wg = std * jax.random.normal(ks[0], (4, hidden), jnp.float32)
    a1 = std * jax.random.normal(ks[1], (1, hidden), jnp.float32)
    a2 = std * jax.random.normal(ks[2], (1, hidden), jnp.float32)
    W1 = std * jax.random.normal(ks[3], (4, hidden), jnp.float32)
    b1 = jnp.zeros((1, hidden), jnp.float32)
    W2 = std * jax.random.normal(ks[4], (hidden, hidden), jnp.float32)
    b2 = jnp.zeros((1, hidden), jnp.float32)
    w3 = std * jax.random.normal(ks[5], (1, hidden), jnp.float32)
    b3 = jnp.zeros((1, 1), jnp.float32)
    return (Wg, a1, a2, W1, b1, W2, b2, w3, b3)


@functools.lru_cache(maxsize=None)
def _build_call(n_step, n_real):
    in_shapes = [
        (NPAD, NPAD), (NPAD, 1), (1, NPAD), (1, NPAD),
        (4, HIDDEN), (1, HIDDEN), (1, HIDDEN),
        (4, HIDDEN), (1, HIDDEN), (HIDDEN, HIDDEN), (1, HIDDEN),
        (1, HIDDEN), (1, 1),
    ]
    in_specs = [_full_spec(s) for s in in_shapes]

    out_shape = (
        jax.ShapeDtypeStruct((1, NPAD), jnp.float32),      # readout state 0
        jax.ShapeDtypeStruct((1, NPAD), jnp.float32),      # readout state 1
        jax.ShapeDtypeStruct((NPAD, NPAD), jnp.float32),   # Cij matrix
        jax.ShapeDtypeStruct((1, NPAD), jnp.float32),      # Ci (lane-dense row)
        jax.ShapeDtypeStruct((1, NPAD), jnp.float32),      # dom_scaler (row)
        jax.ShapeDtypeStruct((NPAD, NPAD), jnp.float32),   # P00
        jax.ShapeDtypeStruct((NPAD, NPAD), jnp.float32),   # P01
        jax.ShapeDtypeStruct((NPAD, NPAD), jnp.float32),   # P10
        jax.ShapeDtypeStruct((NPAD, NPAD), jnp.float32),   # P11
    )
    out_specs = tuple(_full_spec(s.shape) for s in out_shape)

    kernel = functools.partial(_bpgnn_kernel, int(n_step), 1.0 / float(n_real))
    call = pl.pallas_call(
        kernel,
        grid=(1,),
        in_specs=in_specs,
        out_specs=out_specs,
        out_shape=out_shape,
        compiler_params=pltpu.CompilerParams(dimension_semantics=("arbitrary",)),
    )
    return jax.jit(call)


def bpgnn_forward(J, bias, N_step, MPNNtype, params):
    """Mirrors BPGNN.forward(J, bias, N_step, MPNNtype)."""
    del MPNNtype  # unused by the reference forward pass
    n = int(J.shape[0])
    assert n <= NPAD

    Jf = jnp.asarray(J, jnp.float32)
    bf = jnp.asarray(bias, jnp.float32)
    Jp = jnp.zeros((NPAD, NPAD), jnp.float32).at[:n, :n].set(Jf)
    b_col = jnp.zeros((NPAD, 1), jnp.float32).at[:n, 0].set(bf)
    b_row = jnp.zeros((1, NPAD), jnp.float32).at[0, :n].set(bf)
    m_row = jnp.zeros((1, NPAD), jnp.float32).at[0, :n].set(1.0)

    call = _build_call(int(N_step), n)
    in_arrays = (Jp, b_col, b_row, m_row) + tuple(params)

    # Warm-up (trace + compile), then time a warm run of the fused kernel.
    outs = call(*in_arrays)
    jax.block_until_ready(outs)
    start = time.time()
    outs = call(*in_arrays)
    outs = jax.block_until_ready(outs)
    # TODO(synk): torch times only the BP loop; here it is the whole fused kernel.
    computing_time = time.time() - start

    r0, r1, cij_full, ci_row, dom_row, p00, p01, p10, p11 = outs

    readout = jnp.stack([r0[0, :n], r1[0, :n]], axis=1)          # [n, 2]
    cij_mat = cij_full[:n, :n]
    Ci = ci_row[0, :n]
    dom_scaler = dom_row[0, :n].reshape(n, 1)

    # glue: gather upper-triangular edges (host-side nonzero on the concrete J)
    row_u, col_u = np.nonzero(np.triu(np.asarray(J)))
    readout_pairwise = jnp.stack(
        [p00[row_u, col_u], p01[row_u, col_u], p10[row_u, col_u], p11[row_u, col_u]],
        axis=1)                                                  # [E, 4]
    Cij_e = cij_mat[row_u, col_u]

    node_H = -jnp.sum(readout * jnp.log(readout + 1e-16), axis=1)
    edge_H = -jnp.sum(readout_pairwise * jnp.log(readout_pairwise + 1e-16), axis=1)
    node_entropy = jnp.dot(Ci, node_H)
    edge_entropy = jnp.dot(Cij_e, edge_H)
    entropy_ = node_entropy + edge_entropy

    return (readout, readout_pairwise, computing_time, entropy_,
            node_entropy, edge_entropy, Ci, Cij_e, dom_scaler)


if __name__ == "__main__":
    key = jax.random.PRNGKey(0)
    k_j, k_b, k_p = jax.random.split(key, 3)

    n_nodes = 16
    A = 0.3 * jax.random.normal(k_j, (n_nodes, n_nodes), jnp.float32)
    J = jnp.triu(A, k=1)
    J = J + J.T                                  # symmetric coupling, zero diagonal
    bias = 0.3 * jax.random.normal(k_b, (n_nodes,), jnp.float32)

    params = init_params(k_p, hidden=HIDDEN)

    out = bpgnn_forward(J, bias, N_step=10, MPNNtype="BPGNN", params=params)

    for x in out:
        if isinstance(x, jax.Array):
            x.block_until_ready()

    readout = np.asarray(out[0])
    readout_pairwise = np.asarray(out[1])
    assert np.all(np.isfinite(readout)) and np.all(np.isfinite(readout_pairwise))
    np.testing.assert_allclose(readout.sum(axis=1), 1.0, atol=1e-4)
    np.testing.assert_allclose(readout_pairwise.sum(axis=1), 1.0, atol=1e-4)
    assert np.isfinite(float(out[3]))            # entropy_

    print("KERNEL_OK")
</pallas_src>

<mosaic_0001>
module attributes {stable_mosaic.version = 11 : i64} {
  func.func @_bpgnn_kernel(%arg0: i32, %arg1: memref<128x128xf32, #tpu.memory_space<vmem>>, %arg2: memref<128x1xf32, #tpu.memory_space<vmem>>, %arg3: memref<1x128xf32, #tpu.memory_space<vmem>>, %arg4: memref<1x128xf32, #tpu.memory_space<vmem>>, %arg5: memref<4x32xf32, #tpu.memory_space<vmem>>, %arg6: memref<1x32xf32, #tpu.memory_space<vmem>>, %arg7: memref<1x32xf32, #tpu.memory_space<vmem>>, %arg8: memref<4x32xf32, #tpu.memory_space<vmem>>, %arg9: memref<1x32xf32, #tpu.memory_space<vmem>>, %arg10: memref<32x32xf32, #tpu.memory_space<vmem>>, %arg11: memref<1x32xf32, #tpu.memory_space<vmem>>, %arg12: memref<1x32xf32, #tpu.memory_space<vmem>>, %arg13: memref<1x1xf32, #tpu.memory_space<vmem>>, %arg14: memref<1x128xf32, #tpu.memory_space<vmem>>, %arg15: memref<1x128xf32, #tpu.memory_space<vmem>>, %arg16: memref<128x128xf32, #tpu.memory_space<vmem>>, %arg17: memref<1x128xf32, #tpu.memory_space<vmem>>, %arg18: memref<1x128xf32, #tpu.memory_space<vmem>>, %arg19: memref<128x128xf32, #tpu.memory_space<vmem>>, %arg20: memref<128x128xf32, #tpu.memory_space<vmem>>, %arg21: memref<128x128xf32, #tpu.memory_space<vmem>>, %arg22: memref<128x128xf32, #tpu.memory_space<vmem>>) attributes {dimension_semantics = [#tpu.dimension_semantics<arbitrary>], iteration_bounds = array<i64: 1>, scalar_prefetch = 0 : i64, scratch_operands = 0 : i64, tpu.core_type = #tpu.core_type<tc>, window_params = [{pipeline_mode = #tpu.pipeline_mode<synchronous>, transform_indices = @transform_0, window_bounds = array<i64: 128, 128>}, {pipeline_mode = #tpu.pipeline_mode<synchronous>, transform_indices = @transform_1, window_bounds = array<i64: 128, 1>}, {pipeline_mode = #tpu.pipeline_mode<synchronous>, transform_indices = @transform_2, window_bounds = array<i64: 1, 128>}, {pipeline_mode = #tpu.pipeline_mode<synchronous>, transform_indices = @transform_3, window_bounds = array<i64: 1, 128>}, {pipeline_mode = #tpu.pipeline_mode<synchronous>, transform_indices = @transform_4, window_bounds = array<i64: 4, 32>}, {pipeline_mode = #tpu.pipeline_mode<synchronous>, transform_indices = @transform_5, window_bounds = array<i64: 1, 32>}, {pipeline_mode = #tpu.pipeline_mode<synchronous>, transform_indices = @transform_6, window_bounds = array<i64: 1, 32>}, {pipeline_mode = #tpu.pipeline_mode<synchronous>, transform_indices = @transform_7, window_bounds = array<i64: 4, 32>}, {pipeline_mode = #tpu.pipeline_mode<synchronous>, transform_indices = @transform_8, window_bounds = array<i64: 1, 32>}, {pipeline_mode = #tpu.pipeline_mode<synchronous>, transform_indices = @transform_9, window_bounds = array<i64: 32, 32>}, {pipeline_mode = #tpu.pipeline_mode<synchronous>, transform_indices = @transform_10, window_bounds = array<i64: 1, 32>}, {pipeline_mode = #tpu.pipeline_mode<synchronous>, transform_indices = @transform_11, window_bounds = array<i64: 1, 32>}, {pipeline_mode = #tpu.pipeline_mode<synchronous>, transform_indices = @transform_12, window_bounds = array<i64: 1, 1>}, {pipeline_mode = #tpu.pipeline_mode<synchronous>, transform_indices = @transform_13, window_bounds = array<i64: 1, 128>}, {pipeline_mode = #tpu.pipeline_mode<synchronous>, transform_indices = @transform_14, window_bounds = array<i64: 1, 128>}, {pipeline_mode = #tpu.pipeline_mode<synchronous>, transform_indices = @transform_15, window_bounds = array<i64: 128, 128>}, {pipeline_mode = #tpu.pipeline_mode<synchronous>, transform_indices = @transform_16, window_bounds = array<i64: 1, 128>}, {pipeline_mode = #tpu.pipeline_mode<synchronous>, transform_indices = @transform_17, window_bounds = array<i64: 1, 128>}, {pipeline_mode = #tpu.pipeline_mode<synchronous>, transform_indices = @transform_18, window_bounds = array<i64: 128, 128>}, {pipeline_mode = #tpu.pipeline_mode<synchronous>, transform_indices = @transform_19, window_bounds = array<i64: 128, 128>}, {pipeline_mode = #tpu.pipeline_mode<synchronous>, transform_indices = @transform_20, window_bounds = array<i64: 128, 128>}, {pipeline_mode = #tpu.pipeline_mode<synchronous>, transform_indices = @transform_21, window_bounds = array<i64: 128, 128>}]} {
    %c0 = arith.constant 0 : index
    %c0_0 = arith.constant 0 : index
    %0 = vector.load %arg1[%c0, %c0_0] : memref<128x128xf32, #tpu.memory_space<vmem>>, vector<128x128xf32>
    %c0_1 = arith.constant 0 : index
    %c0_2 = arith.constant 0 : index
    %1 = vector.load %arg2[%c0_1, %c0_2] : memref<128x1xf32, #tpu.memory_space<vmem>>, vector<128x1xf32>
    %c0_3 = arith.constant 0 : index
    %c0_4 = arith.constant 0 : index
    %2 = vector.load %arg3[%c0_3, %c0_4] : memref<1x128xf32, #tpu.memory_space<vmem>>, vector<1x128xf32>
    %c0_5 = arith.constant 0 : index
    %c0_6 = arith.constant 0 : index
    %3 = vector.load %arg4[%c0_5, %c0_6] : memref<1x128xf32, #tpu.memory_space<vmem>>, vector<1x128xf32>
    %4 = math.absf %0 : vector<128x128xf32>
    %cst = arith.constant 0.000000e+00 : f32
    %5 = vector.broadcast %cst : f32 to vector<128x128xf32>
    %6 = arith.cmpf ogt, %4, %5 : vector<128x128xf32>
    %cst_7 = arith.constant 1.000000e+00 : f32
    %cst_8 = arith.constant 0.000000e+00 : f32
    %7 = vector.broadcast %cst_7 : f32 to vector<128x128xf32>
    %8 = vector.broadcast %cst_8 : f32 to vector<128x128xf32>
    %9 = arith.select %6, %7, %8 : vector<128x128xi1>, vector<128x128xf32>
    %cst_9 = arith.constant dense<0.000000e+00> : vector<128xf32>
    %10 = vector.multi_reduction <add>, %9, %cst_9 [1] : vector<128x128xf32> to vector<128xf32>
    %11 = vector.shape_cast %10 : vector<128xf32> to vector<128x1xf32>
    %cst_10 = arith.constant dense<0.000000e+00> : vector<128xf32>
    %12 = vector.multi_reduction <add>, %0, %cst_10 [1] : vector<128x128xf32> to vector<128xf32>
    %13 = vector.shape_cast %12 : vector<128xf32> to vector<128x1xf32>
    %c0_11 = arith.constant 0 : index
    %c0_12 = arith.constant 0 : index
    %14 = vector.load %arg5[%c0_11, %c0_12] : memref<4x32xf32, #tpu.memory_space<vmem>>, vector<4x32xf32>
    %cst_13 = arith.constant 0.000000e+00 : f32
    %15 = vector.broadcast %cst_13 : f32 to vector<128x1xf32>
    %16 = arith.subf %15, %1 : vector<128x1xf32>
    %17 = vector.extract_strided_slice %14 {offsets = [0, 0], sizes = [1, 32], strides = [1, 1]} : vector<4x32xf32> to vector<1x32xf32>
    %18 = vector.broadcast %16 : vector<128x1xf32> to vector<128x32xf32>
    %19 = vector.broadcast %17 : vector<1x32xf32> to vector<128x32xf32>
    %20 = arith.mulf %18, %19 : vector<128x32xf32>
    %21 = vector.extract_strided_slice %14 {offsets = [1, 0], sizes = [1, 32], strides = [1, 1]} : vector<4x32xf32> to vector<1x32xf32>
    %22 = vector.broadcast %1 : vector<128x1xf32> to vector<128x32xf32>
    %23 = vector.broadcast %21 : vector<1x32xf32> to vector<128x32xf32>
    %24 = arith.mulf %22, %23 : vector<128x32xf32>
    %25 = arith.addf %20, %24 : vector<128x32xf32>
    %26 = vector.extract_strided_slice %14 {offsets = [2, 0], sizes = [1, 32], strides = [1, 1]} : vector<4x32xf32> to vector<1x32xf32>
    %27 = vector.broadcast %11 : vector<128x1xf32> to vector<128x32xf32>
    %28 = vector.broadcast %26 : vector<1x32xf32> to vector<128x32xf32>
    %29 = arith.mulf %27, %28 : vector<128x32xf32>
    %30 = arith.addf %25, %29 : vector<128x32xf32>
    %31 = vector.extract_strided_slice %14 {offsets = [3, 0], sizes = [1, 32], strides = [1, 1]} : vector<4x32xf32> to vector<1x32xf32>
    %32 = vector.broadcast %13 : vector<128x1xf32> to vector<128x32xf32>
    %33 = vector.broadcast %31 : vector<1x32xf32> to vector<128x32xf32>
    %34 = arith.mulf %32, %33 : vector<128x32xf32>
    %35 = arith.addf %30, %34 : vector<128x32xf32>
    %c0_14 = arith.constant 0 : index
    %c0_15 = arith.constant 0 : index
    %36 = vector.load %arg6[%c0_14, %c0_15] : memref<1x32xf32, #tpu.memory_space<vmem>>, vector<1x32xf32>
    %37 = vector.broadcast %36 : vector<1x32xf32> to vector<128x32xf32>
    %38 = arith.mulf %35, %37 : vector<128x32xf32>
    %cst_16 = arith.constant dense<0.000000e+00> : vector<128xf32>
    %39 = vector.multi_reduction <add>, %38, %cst_16 [1] : vector<128x32xf32> to vector<128xf32>
    %40 = vector.shape_cast %39 : vector<128xf32> to vector<128x1xf32>
    %c0_17 = arith.constant 0 : index
    %c0_18 = arith.constant 0 : index
    %41 = vector.load %arg7[%c0_17, %c0_18] : memref<1x32xf32, #tpu.memory_space<vmem>>, vector<1x32xf32>
    %cst_19 = arith.constant dense<0.000000e+00> : vector<1x128xf32>
    %42 = tpu.matmul %41, %35, %cst_19 {dimension_numbers = #tpu.dot_dimension_numbers<[1], [1], [0], [0], [0, 0, 1, 0], [], []>} : vector<1x32xf32>, vector<128x32xf32>, vector<1x128xf32> -> vector<1x128xf32>
    %43 = vector.broadcast %40 : vector<128x1xf32> to vector<128x128xf32>
    %44 = vector.broadcast %42 : vector<1x128xf32> to vector<128x128xf32>
    %45 = arith.addf %43, %44 : vector<128x128xf32>
    %cst_20 = arith.constant 0.000000e+00 : f32
    %46 = vector.broadcast %cst_20 : f32 to vector<128x128xf32>
    %47 = arith.cmpf ogt, %45, %46 : vector<128x128xf32>
    %cst_21 = arith.constant 2.000000e-01 : f32
    %48 = vector.broadcast %cst_21 : f32 to vector<128x128xf32>
    %49 = arith.mulf %48, %45 : vector<128x128xf32>
    %50 = arith.select %47, %45, %49 : vector<128x128xi1>, vector<128x128xf32>
    %51 = math.exp %50 : vector<128x128xf32>
    %cst_22 = arith.constant 0.000000e+00 : f32
    %52 = vector.broadcast %cst_22 : f32 to vector<128x128xf32>
    %53 = arith.select %6, %51, %52 : vector<128x128xi1>, vector<128x128xf32>
    %54 = tpu.transpose %53, [1, 0] : vector<128x128xf32> -> vector<128x128xf32>
    %55 = arith.addf %53, %54 : vector<128x128xf32>
    %cst_23 = arith.constant 5.000000e-01 : f32
    %56 = vector.broadcast %cst_23 : f32 to vector<128x128xf32>
    %57 = arith.mulf %56, %55 : vector<128x128xf32>
    %c0_24 = arith.constant 0 : index
    %c0_25 = arith.constant 0 : index
    %58 = vector.load %arg8[%c0_24, %c0_25] : memref<4x32xf32, #tpu.memory_space<vmem>>, vector<4x32xf32>
    %cst_26 = arith.constant 0.000000e+00 : f32
    %59 = vector.broadcast %cst_26 : f32 to vector<128x1xf32>
    %60 = arith.subf %59, %1 : vector<128x1xf32>
    %61 = vector.extract_strided_slice %58 {offsets = [0, 0], sizes = [1, 32], strides = [1, 1]} : vector<4x32xf32> to vector<1x32xf32>
    %62 = vector.broadcast %60 : vector<128x1xf32> to vector<128x32xf32>
    %63 = vector.broadcast %61 : vector<1x32xf32> to vector<128x32xf32>
    %64 = arith.mulf %62, %63 : vector<128x32xf32>
    %65 = vector.extract_strided_slice %58 {offsets = [1, 0], sizes = [1, 32], strides = [1, 1]} : vector<4x32xf32> to vector<1x32xf32>
    %66 = vector.broadcast %1 : vector<128x1xf32> to vector<128x32xf32>
    %67 = vector.broadcast %65 : vector<1x32xf32> to vector<128x32xf32>
    %68 = arith.mulf %66, %67 : vector<128x32xf32>
    %69 = arith.addf %64, %68 : vector<128x32xf32>
    %70 = vector.extract_strided_slice %58 {offsets = [2, 0], sizes = [1, 32], strides = [1, 1]} : vector<4x32xf32> to vector<1x32xf32>
    %71 = vector.broadcast %11 : vector<128x1xf32> to vector<128x32xf32>
    %72 = vector.broadcast %70 : vector<1x32xf32> to vector<128x32xf32>
    %73 = arith.mulf %71, %72 : vector<128x32xf32>
    %74 = arith.addf %69, %73 : vector<128x32xf32>
    %75 = vector.extract_strided_slice %58 {offsets = [3, 0], sizes = [1, 32], strides = [1, 1]} : vector<4x32xf32> to vector<1x32xf32>
    %76 = vector.broadcast %13 : vector<128x1xf32> to vector<128x32xf32>
    %77 = vector.broadcast %75 : vector<1x32xf32> to vector<128x32xf32>
    %78 = arith.mulf %76, %77 : vector<128x32xf32>
    %79 = arith.addf %74, %78 : vector<128x32xf32>
    %c0_27 = arith.constant 0 : index
    %c0_28 = arith.constant 0 : index
    %80 = vector.load %arg9[%c0_27, %c0_28] : memref<1x32xf32, #tpu.memory_space<vmem>>, vector<1x32xf32>
    %81 = vector.broadcast %80 : vector<1x32xf32> to vector<128x32xf32>
    %82 = arith.addf %79, %81 : vector<128x32xf32>
    %cst_29 = arith.constant 0.000000e+00 : f32
    %83 = vector.broadcast %cst_29 : f32 to vector<128x32xf32>
    %84 = arith.maximumf %82, %83 : vector<128x32xf32>
    %c0_30 = arith.constant 0 : index
    %c0_31 = arith.constant 0 : index
    %85 = vector.load %arg10[%c0_30, %c0_31] : memref<32x32xf32, #tpu.memory_space<vmem>>, vector<32x32xf32>
    %cst_32 = arith.constant dense<0.000000e+00> : vector<128x32xf32>
    %86 = tpu.matmul %84, %85, %cst_32 {dimension_numbers = #tpu.dot_dimension_numbers<[1], [0], [0], [1], [0, 0, 1, 1], [], []>} : vector<128x32xf32>, vector<32x32xf32>, vector<128x32xf32> -> vector<128x32xf32>
    %c0_33 = arith.constant 0 : index
    %c0_34 = arith.constant 0 : index
    %87 = vector.load %arg11[%c0_33, %c0_34] : memref<1x32xf32, #tpu.memory_space<vmem>>, vector<1x32xf32>
    %88 = vector.broadcast %87 : vector<1x32xf32> to vector<128x32xf32>
    %89 = arith.addf %86, %88 : vector<128x32xf32>
    %cst_35 = arith.constant 0.000000e+00 : f32
    %90 = vector.broadcast %cst_35 : f32 to vector<128x32xf32>
    %91 = arith.maximumf %89, %90 : vector<128x32xf32>
    %c0_36 = arith.constant 0 : index
    %c0_37 = arith.constant 0 : index
    %92 = vector.load %arg12[%c0_36, %c0_37] : memref<1x32xf32, #tpu.memory_space<vmem>>, vector<1x32xf32>
    %cst_38 = arith.constant dense<0.000000e+00> : vector<1x128xf32>
    %93 = tpu.matmul %92, %91, %cst_38 {dimension_numbers = #tpu.dot_dimension_numbers<[1], [1], [0], [0], [0, 0, 1, 0], [], []>} : vector<1x32xf32>, vector<128x32xf32>, vector<1x128xf32> -> vector<1x128xf32>
    %c0_39 = arith.constant 0 : index
    %c0_40 = arith.constant 0 : index
    %94 = vector.load %arg13[%c0_39, %c0_40] : memref<1x1xf32, #tpu.memory_space<vmem>>, vector<1x1xf32>
    %95 = vector.broadcast %94 : vector<1x1xf32> to vector<1x128xf32>
    %96 = arith.addf %93, %95 : vector<1x128xf32>
    %cst_41 = arith.constant dense<0.000000e+00> : vector<128xf32>
    %97 = vector.multi_reduction <add>, %57, %cst_41 [0] : vector<128x128xf32> to vector<128xf32>
    %98 = vector.shape_cast %97 : vector<128xf32> to vector<1x128xf32>
    %99 = arith.addf %96, %98 : vector<1x128xf32>
    %cst_42 = arith.constant 0.000000e+00 : f32
    %100 = vector.broadcast %cst_42 : f32 to vector<1x128xf32>
    %101 = arith.cmpf ogt, %99, %100 : vector<1x128xf32>
    %cst_43 = arith.constant 0.000000e+00 : f32
    %102 = vector.broadcast %cst_43 : f32 to vector<1x128xf32>
    %103 = arith.cmpf olt, %99, %102 : vector<1x128xf32>
    %cst_44 = arith.constant -1.000000e+00 : f32
    %cst_45 = arith.constant 0.000000e+00 : f32
    %104 = vector.broadcast %cst_44 : f32 to vector<1x128xf32>
    %105 = vector.broadcast %cst_45 : f32 to vector<1x128xf32>
    %106 = arith.select %103, %104, %105 : vector<1x128xi1>, vector<1x128xf32>
    %cst_46 = arith.constant 1.000000e+00 : f32
    %107 = vector.broadcast %cst_46 : f32 to vector<1x128xf32>
    %108 = arith.select %101, %107, %106 : vector<1x128xi1>, vector<1x128xf32>
    %109 = math.absf %99 : vector<1x128xf32>
    %cst_47 = arith.constant 1.000000e-01 : f32
    %110 = vector.broadcast %cst_47 : f32 to vector<1x128xf32>
    %111 = arith.cmpf ogt, %109, %110 : vector<1x128xf32>
    %112 = math.absf %99 : vector<1x128xf32>
    %cst_48 = arith.constant 1.000000e-01 : f32
    %113 = vector.broadcast %cst_48 : f32 to vector<1x128xf32>
    %114 = arith.select %111, %112, %113 : vector<1x128xi1>, vector<1x128xf32>
    %115 = arith.mulf %108, %114 : vector<1x128xf32>
    %cst_49 = arith.constant 0.000000e+00 : f32
    %116 = vector.broadcast %cst_49 : f32 to vector<1x128xf32>
    %117 = arith.cmpf ogt, %3, %116 : vector<1x128xf32>
    %cst_50 = arith.constant 1.000000e+00 : f32
    %118 = vector.broadcast %cst_50 : f32 to vector<1x128xf32>
    %119 = arith.select %117, %115, %118 : vector<1x128xi1>, vector<1x128xf32>
    %cst_51 = arith.constant 1.000000e+00 : f32
    %120 = vector.broadcast %cst_51 : f32 to vector<1x128xf32>
    %121 = arith.divf %120, %119 : vector<1x128xf32>
    %122 = arith.mulf %2, %121 : vector<1x128xf32>
    %cst_52 = arith.constant 0.000000e+00 : f32
    %123 = vector.broadcast %cst_52 : f32 to vector<1x128xf32>
    %124 = arith.subf %123, %122 : vector<1x128xf32>
    %cst_53 = arith.constant 0.000000e+00 : f32
    %125 = vector.broadcast %cst_53 : f32 to vector<128x128xf32>
    %126 = arith.cmpf one, %57, %125 : vector<128x128xf32>
    %cst_54 = arith.constant 1.000000e+00 : f32
    %127 = vector.broadcast %cst_54 : f32 to vector<128x128xf32>
    %128 = arith.select %126, %57, %127 : vector<128x128xi1>, vector<128x128xf32>
    %129 = arith.divf %0, %128 : vector<128x128xf32>
    %cst_55 = arith.constant 0.000000e+00 : f32
    %130 = vector.broadcast %cst_55 : f32 to vector<128x128xf32>
    %131 = arith.subf %130, %129 : vector<128x128xf32>
    %cst_56 = arith.constant 0.000000e+00 : f32
    %132 = vector.broadcast %cst_56 : f32 to vector<128x128xf32>
    %cst_57 = arith.constant 0.000000e+00 : f32
    %133 = vector.broadcast %cst_57 : f32 to vector<128x128xf32>
    %134 = arith.maximumf %124, %122 : vector<1x128xf32>
    %135 = arith.subf %124, %122 : vector<1x128xf32>
    %136 = math.absf %135 : vector<1x128xf32>
    %cst_58 = arith.constant 0.000000e+00 : f32
    %137 = vector.broadcast %cst_58 : f32 to vector<1x128xf32>
    %138 = arith.subf %137, %136 : vector<1x128xf32>
    %139 = math.exp %138 : vector<1x128xf32>
    %cst_59 = arith.constant 1.000000e+00 : f32
    %140 = vector.broadcast %cst_59 : f32 to vector<1x128xf32>
    %141 = arith.addf %140, %139 : vector<1x128xf32>
    %142 = math.log %141 : vector<1x128xf32>
    %143 = arith.addf %134, %142 : vector<1x128xf32>
    %144 = arith.subf %124, %143 : vector<1x128xf32>
    %145 = arith.subf %122, %143 : vector<1x128xf32>
    %c0_i32 = arith.constant 0 : i32
    %c0_i32_60 = arith.constant 0 : i32
    %146:8 = scf.while (%arg23 = %c0_i32, %arg24 = %c0_i32_60, %arg25 = %132, %arg26 = %133, %arg27 = %124, %arg28 = %122, %arg29 = %144, %arg30 = %145) : (i32, i32, vector<128x128xf32>, vector<128x128xf32>, vector<1x128xf32>, vector<1x128xf32>, vector<1x128xf32>, vector<1x128xf32>) -> (i32, i32, vector<128x128xf32>, vector<128x128xf32>, vector<1x128xf32>, vector<1x128xf32>, vector<1x128xf32>, vector<1x128xf32>) {
      %c10_i32 = arith.constant 10 : i32
      %185 = arith.cmpi slt, %arg23, %c10_i32 : i32
      %c0_i32_80 = arith.constant 0 : i32
      %186 = arith.cmpi eq, %arg24, %c0_i32_80 : i32
      %187 = arith.andi %185, %186 : i1
      scf.condition(%187) %arg23, %arg24, %arg25, %arg26, %arg27, %arg28, %arg29, %arg30 : i32, i32, vector<128x128xf32>, vector<128x128xf32>, vector<1x128xf32>, vector<1x128xf32>, vector<1x128xf32>, vector<1x128xf32>
    } do {
    ^bb0(%arg23: i32, %arg24: i32, %arg25: vector<128x128xf32>, %arg26: vector<128x128xf32>, %arg27: vector<1x128xf32>, %arg28: vector<1x128xf32>, %arg29: vector<1x128xf32>, %arg30: vector<1x128xf32>):
      %185 = vector.broadcast %arg27 : vector<1x128xf32> to vector<128x128xf32>
      %186 = arith.subf %arg25, %185 : vector<128x128xf32>
      %187 = tpu.transpose %186, [1, 0] : vector<128x128xf32> -> vector<128x128xf32>
      %188 = vector.broadcast %arg28 : vector<1x128xf32> to vector<128x128xf32>
      %189 = arith.subf %arg26, %188 : vector<128x128xf32>
      %190 = tpu.transpose %189, [1, 0] : vector<128x128xf32> -> vector<128x128xf32>
      %191 = arith.subf %129, %187 : vector<128x128xf32>
      %192 = arith.subf %131, %190 : vector<128x128xf32>
      %193 = arith.maximumf %191, %192 : vector<128x128xf32>
      %194 = arith.subf %131, %187 : vector<128x128xf32>
      %195 = arith.subf %129, %190 : vector<128x128xf32>
      %196 = arith.maximumf %194, %195 : vector<128x128xf32>
      %197 = arith.maximumf %193, %196 : vector<128x128xf32>
      %198 = arith.subf %193, %196 : vector<128x128xf32>
      %199 = math.absf %198 : vector<128x128xf32>
      %cst_80 = arith.constant 0.000000e+00 : f32
      %200 = vector.broadcast %cst_80 : f32 to vector<128x128xf32>
      %201 = arith.subf %200, %199 : vector<128x128xf32>
      %202 = math.exp %201 : vector<128x128xf32>
      %cst_81 = arith.constant 1.000000e+00 : f32
      %203 = vector.broadcast %cst_81 : f32 to vector<128x128xf32>
      %204 = arith.addf %203, %202 : vector<128x128xf32>
      %205 = math.log %204 : vector<128x128xf32>
      %206 = arith.addf %197, %205 : vector<128x128xf32>
      %207 = arith.subf %193, %206 : vector<128x128xf32>
      %208 = arith.mulf %57, %207 : vector<128x128xf32>
      %209 = arith.subf %196, %206 : vector<128x128xf32>
      %210 = arith.mulf %57, %209 : vector<128x128xf32>
      %cst_82 = arith.constant dense<0.000000e+00> : vector<128xf32>
      %211 = vector.multi_reduction <add>, %208, %cst_82 [0] : vector<128x128xf32> to vector<128xf32>
      %212 = vector.shape_cast %211 : vector<128xf32> to vector<1x128xf32>
      %cst_83 = arith.constant dense<0.000000e+00> : vector<128xf32>
      %213 = vector.multi_reduction <add>, %210, %cst_83 [0] : vector<128x128xf32> to vector<128xf32>
      %214 = vector.shape_cast %213 : vector<128xf32> to vector<1x128xf32>
      %215 = arith.mulf %212, %121 : vector<1x128xf32>
      %216 = arith.addf %124, %215 : vector<1x128xf32>
      %217 = arith.mulf %214, %121 : vector<1x128xf32>
      %218 = arith.addf %122, %217 : vector<1x128xf32>
      %219 = arith.maximumf %216, %218 : vector<1x128xf32>
      %220 = arith.subf %216, %218 : vector<1x128xf32>
      %221 = math.absf %220 : vector<1x128xf32>
      %cst_84 = arith.constant 0.000000e+00 : f32
      %222 = vector.broadcast %cst_84 : f32 to vector<1x128xf32>
      %223 = arith.subf %222, %221 : vector<1x128xf32>
      %224 = math.exp %223 : vector<1x128xf32>
      %cst_85 = arith.constant 1.000000e+00 : f32
      %225 = vector.broadcast %cst_85 : f32 to vector<1x128xf32>
      %226 = arith.addf %225, %224 : vector<1x128xf32>
      %227 = math.log %226 : vector<1x128xf32>
      %228 = arith.addf %219, %227 : vector<1x128xf32>
      %229 = arith.subf %216, %228 : vector<1x128xf32>
      %230 = arith.subf %218, %228 : vector<1x128xf32>
      %c2_i32 = arith.constant 2 : i32
      %c0_i32_86 = arith.constant 0 : i32
      %231 = arith.cmpi eq, %c2_i32, %c0_i32_86 : i32
      %c1_i32 = arith.constant 1 : i32
      %232 = arith.select %231, %c1_i32, %c2_i32 : i32
      %233 = arith.remsi %arg23, %232 : i32
      %c0_i32_87 = arith.constant 0 : i32
      %234 = arith.cmpi ne, %233, %c0_i32_87 : i32
      %c0_i32_88 = arith.constant 0 : i32
      %235 = arith.cmpi slt, %233, %c0_i32_88 : i32
      %c0_i32_89 = arith.constant 0 : i32
      %236 = arith.cmpi slt, %232, %c0_i32_89 : i32
      %237 = arith.xori %235, %236 : i1
      %238 = arith.andi %237, %234 : i1
      %239 = arith.addi %233, %232 : i32
      %240 = arith.select %238, %239, %233 : i32
      %c1_i32_90 = arith.constant 1 : i32
      %241 = arith.cmpi eq, %240, %c1_i32_90 : i32
      %c9_i32 = arith.constant 9 : i32
      %242 = arith.cmpi eq, %arg23, %c9_i32 : i32
      %243 = arith.ori %241, %242 : i1
      %244 = arith.extui %243 : i1 to i32
      %c0_i32_91 = arith.constant 0 : i32
      %245 = arith.cmpi ne, %244, %c0_i32_91 : i32
      %246 = scf.if %245 -> (f32) {
        %255 = arith.subf %229, %arg29 : vector<1x128xf32>
        %256 = arith.mulf %255, %255 : vector<1x128xf32>
        %257 = arith.subf %230, %arg30 : vector<1x128xf32>
        %258 = arith.mulf %257, %257 : vector<1x128xf32>
        %259 = arith.addf %256, %258 : vector<1x128xf32>
        %260 = arith.mulf %259, %3 : vector<1x128xf32>
        %261 = vector.shape_cast %260 : vector<1x128xf32> to vector<1x1x128xf32>
        %cst_95 = arith.constant dense<0.000000e+00> : vector<1xf32>
        %262 = vector.multi_reduction <add>, %261, %cst_95 [1, 2] : vector<1x1x128xf32> to vector<1xf32>
        %263 = vector.shape_cast %262 : vector<1xf32> to vector<1x1x1xf32>
        %264 = vector.extract %263[0, 0, 0] : f32 from vector<1x1x1xf32>
        %cst_96 = arith.constant 6.250000e-02 : f32
        %265 = arith.mulf %264, %cst_96 : f32
        scf.yield %265 : f32
      } else {
        %cst_95 = arith.constant 1.000000e+00 : f32
        scf.yield %cst_95 : f32
      }
      %cst_92 = arith.constant 1.000000e-07 : f32
      %247 = arith.cmpf olt, %246, %cst_92 : f32
      %cst_93 = arith.constant 9.99999968E+37 : f32
      %248 = arith.cmpf olt, %246, %cst_93 : f32
      %true = arith.constant true
      %249 = arith.xori %248, %true : i1
      %250 = arith.select %249, %arg29, %229 : vector<1x128xf32>
      %251 = arith.select %249, %arg30, %230 : vector<1x128xf32>
      %252 = arith.ori %247, %249 : i1
      %253 = arith.extui %252 : i1 to i32
      %c1_i32_94 = arith.constant 1 : i32
      %254 = arith.addi %arg23, %c1_i32_94 : i32
      scf.yield %254, %253, %208, %210, %216, %218, %250, %251 : i32, i32, vector<128x128xf32>, vector<128x128xf32>, vector<1x128xf32>, vector<1x128xf32>, vector<1x128xf32>, vector<1x128xf32>
    }
    %147 = math.exp %146#6 : vector<1x128xf32>
    %148 = math.exp %146#7 : vector<1x128xf32>
    %149 = vector.broadcast %146#6 : vector<1x128xf32> to vector<128x128xf32>
    %150 = arith.subf %149, %146#2 : vector<128x128xf32>
    %151 = vector.broadcast %146#7 : vector<1x128xf32> to vector<128x128xf32>
    %152 = arith.subf %151, %146#3 : vector<128x128xf32>
    %153 = tpu.transpose %150, [1, 0] : vector<128x128xf32> -> vector<128x128xf32>
    %154 = tpu.transpose %152, [1, 0] : vector<128x128xf32> -> vector<128x128xf32>
    %155 = arith.addf %129, %150 : vector<128x128xf32>
    %156 = arith.addf %155, %153 : vector<128x128xf32>
    %157 = math.exp %156 : vector<128x128xf32>
    %158 = arith.addf %152, %153 : vector<128x128xf32>
    %159 = arith.subf %158, %129 : vector<128x128xf32>
    %160 = math.exp %159 : vector<128x128xf32>
    %161 = arith.addf %150, %154 : vector<128x128xf32>
    %162 = arith.subf %161, %129 : vector<128x128xf32>
    %163 = math.exp %162 : vector<128x128xf32>
    %164 = arith.addf %129, %152 : vector<128x128xf32>
    %165 = arith.addf %164, %154 : vector<128x128xf32>
    %166 = math.exp %165 : vector<128x128xf32>
    %167 = arith.addf %157, %160 : vector<128x128xf32>
    %168 = arith.addf %167, %163 : vector<128x128xf32>
    %169 = arith.addf %168, %166 : vector<128x128xf32>
    %cst_61 = arith.constant 1.000000e+00 : f32
    %170 = vector.broadcast %cst_61 : f32 to vector<128x128xf32>
    %171 = arith.divf %170, %169 : vector<128x128xf32>
    %c0_62 = arith.constant 0 : index
    %c0_63 = arith.constant 0 : index
    %172 = vector.load %arg14[%c0_62, %c0_63] : memref<1x128xf32, #tpu.memory_space<vmem>>, vector<1x128xf32>
    tpu.vector_store %arg14[%c0_62, %c0_63], %147 {strides = array<i32>} : memref<1x128xf32, #tpu.memory_space<vmem>>, vector<1x128xf32>,
    %c0_64 = arith.constant 0 : index
    %c0_65 = arith.constant 0 : index
    %173 = vector.load %arg15[%c0_64, %c0_65] : memref<1x128xf32, #tpu.memory_space<vmem>>, vector<1x128xf32>
    tpu.vector_store %arg15[%c0_64, %c0_65], %148 {strides = array<i32>} : memref<1x128xf32, #tpu.memory_space<vmem>>, vector<1x128xf32>,
    %c0_66 = arith.constant 0 : index
    %c0_67 = arith.constant 0 : index
    %174 = vector.load %arg16[%c0_66, %c0_67] : memref<128x128xf32, #tpu.memory_space<vmem>>, vector<128x128xf32>
    tpu.vector_store %arg16[%c0_66, %c0_67], %57 {strides = array<i32>} : memref<128x128xf32, #tpu.memory_space<vmem>>, vector<128x128xf32>,
    %c0_68 = arith.constant 0 : index
    %c0_69 = arith.constant 0 : index
    %175 = vector.load %arg17[%c0_68, %c0_69] : memref<1x128xf32, #tpu.memory_space<vmem>>, vector<1x128xf32>
    tpu.vector_store %arg17[%c0_68, %c0_69], %96 {strides = array<i32>} : memref<1x128xf32, #tpu.memory_space<vmem>>, vector<1x128xf32>,
    %c0_70 = arith.constant 0 : index
    %c0_71 = arith.constant 0 : index
    %176 = vector.load %arg18[%c0_70, %c0_71] : memref<1x128xf32, #tpu.memory_space<vmem>>, vector<1x128xf32>
    tpu.vector_store %arg18[%c0_70, %c0_71], %119 {strides = array<i32>} : memref<1x128xf32, #tpu.memory_space<vmem>>, vector<1x128xf32>,
    %177 = arith.mulf %157, %171 : vector<128x128xf32>
    %c0_72 = arith.constant 0 : index
    %c0_73 = arith.constant 0 : index
    %178 = vector.load %arg19[%c0_72, %c0_73] : memref<128x128xf32, #tpu.memory_space<vmem>>, vector<128x128xf32>
    tpu.vector_store %arg19[%c0_72, %c0_73], %177 {strides = array<i32>} : memref<128x128xf32, #tpu.memory_space<vmem>>, vector<128x128xf32>,
    %179 = arith.mulf %160, %171 : vector<128x128xf32>
    %c0_74 = arith.constant 0 : index
    %c0_75 = arith.constant 0 : index
    %180 = vector.load %arg20[%c0_74, %c0_75] : memref<128x128xf32, #tpu.memory_space<vmem>>, vector<128x128xf32>
    tpu.vector_store %arg20[%c0_74, %c0_75], %179 {strides = array<i32>} : memref<128x128xf32, #tpu.memory_space<vmem>>, vector<128x128xf32>,
    %181 = arith.mulf %163, %171 : vector<128x128xf32>
    %c0_76 = arith.constant 0 : index
    %c0_77 = arith.constant 0 : index
    %182 = vector.load %arg21[%c0_76, %c0_77] : memref<128x128xf32, #tpu.memory_space<vmem>>, vector<128x128xf32>
    tpu.vector_store %arg21[%c0_76, %c0_77], %181 {strides = array<i32>} : memref<128x128xf32, #tpu.memory_space<vmem>>, vector<128x128xf32>,
    %183 = arith.mulf %166, %171 : vector<128x128xf32>
    %c0_78 = arith.constant 0 : index
    %c0_79 = arith.constant 0 : index
    %184 = vector.load %arg22[%c0_78, %c0_79] : memref<128x128xf32, #tpu.memory_space<vmem>>, vector<128x128xf32>
    tpu.vector_store %arg22[%c0_78, %c0_79], %183 {strides = array<i32>} : memref<128x128xf32, #tpu.memory_space<vmem>>, vector<128x128xf32>,
    return
  }
  func.func @transform_0(%arg0: i32) -> (i32, i32) {
    %c0_i32 = arith.constant 0 : i32
    %c0_i32_0 = arith.constant 0 : i32
    %c0_i32_1 = arith.constant 0 : i32
    return %c0_i32, %c0_i32_0 : i32, i32
  }
  func.func @transform_1(%arg0: i32) -> (i32, i32) {
    %c0_i32 = arith.constant 0 : i32
    %c0_i32_0 = arith.constant 0 : i32
    %c0_i32_1 = arith.constant 0 : i32
    return %c0_i32, %c0_i32_0 : i32, i32
  }
  func.func @transform_2(%arg0: i32) -> (i32, i32) {
    %c0_i32 = arith.constant 0 : i32
    %c0_i32_0 = arith.constant 0 : i32
    %c0_i32_1 = arith.constant 0 : i32
    return %c0_i32, %c0_i32_0 : i32, i32
  }
  func.func @transform_3(%arg0: i32) -> (i32, i32) {
    %c0_i32 = arith.constant 0 : i32
    %c0_i32_0 = arith.constant 0 : i32
    %c0_i32_1 = arith.constant 0 : i32
    return %c0_i32, %c0_i32_0 : i32, i32
  }
  func.func @transform_4(%arg0: i32) -> (i32, i32) {
    %c0_i32 = arith.constant 0 : i32
    %c0_i32_0 = arith.constant 0 : i32
    %c0_i32_1 = arith.constant 0 : i32
    return %c0_i32, %c0_i32_0 : i32, i32
  }
  func.func @transform_5(%arg0: i32) -> (i32, i32) {
    %c0_i32 = arith.constant 0 : i32
    %c0_i32_0 = arith.constant 0 : i32
    %c0_i32_1 = arith.constant 0 : i32
    return %c0_i32, %c0_i32_0 : i32, i32
  }
  func.func @transform_6(%arg0: i32) -> (i32, i32) {
    %c0_i32 = arith.constant 0 : i32
    %c0_i32_0 = arith.constant 0 : i32
    %c0_i32_1 = arith.constant 0 : i32
    return %c0_i32, %c0_i32_0 : i32, i32
  }
  func.func @transform_7(%arg0: i32) -> (i32, i32) {
    %c0_i32 = arith.constant 0 : i32
    %c0_i32_0 = arith.constant 0 : i32
    %c0_i32_1 = arith.constant 0 : i32
    return %c0_i32, %c0_i32_0 : i32, i32
  }
  func.func @transform_8(%arg0: i32) -> (i32, i32) {
    %c0_i32 = arith.constant 0 : i32
    %c0_i32_0 = arith.constant 0 : i32
    %c0_i32_1 = arith.constant 0 : i32
    return %c0_i32, %c0_i32_0 : i32, i32
  }
  func.func @transform_9(%arg0: i32) -> (i32, i32) {
    %c0_i32 = arith.constant 0 : i32
    %c0_i32_0 = arith.constant 0 : i32
    %c0_i32_1 = arith.constant 0 : i32
    return %c0_i32, %c0_i32_0 : i32, i32
  }
  func.func @transform_10(%arg0: i32) -> (i32, i32) {
    %c0_i32 = arith.constant 0 : i32
    %c0_i32_0 = arith.constant 0 : i32
    %c0_i32_1 = arith.constant 0 : i32
    return %c0_i32, %c0_i32_0 : i32, i32
  }
  func.func @transform_11(%arg0: i32) -> (i32, i32) {
    %c0_i32 = arith.constant 0 : i32
    %c0_i32_0 = arith.constant 0 : i32
    %c0_i32_1 = arith.constant 0 : i32
    return %c0_i32, %c0_i32_0 : i32, i32
  }
  func.func @transform_12(%arg0: i32) -> (i32, i32) {
    %c0_i32 = arith.constant 0 : i32
    %c0_i32_0 = arith.constant 0 : i32
    %c0_i32_1 = arith.constant 0 : i32
    return %c0_i32, %c0_i32_0 : i32, i32
  }
  func.func @transform_13(%arg0: i32) -> (i32, i32) {
    %c0_i32 = arith.constant 0 : i32
    %c0_i32_0 = arith.constant 0 : i32
    %c0_i32_1 = arith.constant 0 : i32
    return %c0_i32, %c0_i32_0 : i32, i32
  }
  func.func @transform_14(%arg0: i32) -> (i32, i32) {
    %c0_i32 = arith.constant 0 : i32
    %c0_i32_0 = arith.constant 0 : i32
    %c0_i32_1 = arith.constant 0 : i32
    return %c0_i32, %c0_i32_0 : i32, i32
  }
  func.func @transform_15(%arg0: i32) -> (i32, i32) {
    %c0_i32 = arith.constant 0 : i32
    %c0_i32_0 = arith.constant 0 : i32
    %c0_i32_1 = arith.constant 0 : i32
    return %c0_i32, %c0_i32_0 : i32, i32
  }
  func.func @transform_16(%arg0: i32) -> (i32, i32) {
    %c0_i32 = arith.constant 0 : i32
    %c0_i32_0 = arith.constant 0 : i32
    %c0_i32_1 = arith.constant 0 : i32
    return %c0_i32, %c0_i32_0 : i32, i32
  }
  func.func @transform_17(%arg0: i32) -> (i32, i32) {
    %c0_i32 = arith.constant 0 : i32
    %c0_i32_0 = arith.constant 0 : i32
    %c0_i32_1 = arith.constant 0 : i32
    return %c0_i32, %c0_i32_0 : i32, i32
  }
  func.func @transform_18(%arg0: i32) -> (i32, i32) {
    %c0_i32 = arith.constant 0 : i32
    %c0_i32_0 = arith.constant 0 : i32
    %c0_i32_1 = arith.constant 0 : i32
    return %c0_i32, %c0_i32_0 : i32, i32
  }
  func.func @transform_19(%arg0: i32) -> (i32, i32) {
    %c0_i32 = arith.constant 0 : i32
    %c0_i32_0 = arith.constant 0 : i32
    %c0_i32_1 = arith.constant 0 : i32
    return %c0_i32, %c0_i32_0 : i32, i32
  }
  func.func @transform_20(%arg0: i32) -> (i32, i32) {
    %c0_i32 = arith.constant 0 : i32
    %c0_i32_0 = arith.constant 0 : i32
    %c0_i32_1 = arith.constant 0 : i32
    return %c0_i32, %c0_i32_0 : i32, i32
  }
  func.func @transform_21(%arg0: i32) -> (i32, i32) {
    %c0_i32 = arith.constant 0 : i32
    %c0_i32_0 = arith.constant 0 : i32
    %c0_i32_1 = arith.constant 0 : i32
    return %c0_i32, %c0_i32_0 : i32, i32
  }
}

</mosaic_0001>

<bundles_post_ra>
// kernel: tpu_custom_call.1
= control target key start
LH: loop header
LB: loop body
LE: loop exit
PB: predicated region body
PF: predicated region fallthrough
CT: control target
= control target key end

     0   :  { %s7334_s0 = inlined_call_operand.vmem [shape: f32[128,128], index: 0, kind: input, shape index: {}]   ;;  %s7335_s1 = inlined_call_operand.vmem [shape: f32[128,1], index: 1, kind: input, shape index: {}]   ;;  %s7336_s2 = inlined_call_operand.vmem [shape: f32[1,128], index: 2, kind: input, shape index: {}]   ;;  %s7337_s3 = inlined_call_operand.vmem [shape: f32[1,128], index: 3, kind: input, shape index: {}]   ;;  %s7338_s4 = inlined_call_operand.hbm [shape: f32[4,32], index: 4, kind: input, shape index: {}]   ;;  %s7339_s5 = inlined_call_operand.hbm [shape: f32[1,32], index: 5, kind: input, shape index: {}]   ;;  %s7340_s6 = inlined_call_operand.hbm [shape: f32[1,32], index: 6, kind: input, shape index: {}]   ;;  %s7341_s7 = inlined_call_operand.hbm [shape: f32[4,32], index: 7, kind: input, shape index: {}]   ;;  %s7342_s8 = inlined_call_operand.hbm [shape: f32[1,32], index: 8, kind: input, shape index: {}]   ;;  %s7343_s9 = inlined_call_operand.vmem [shape: f32[32,32], index: 9, kind: input, shape index: {}]   ;;  %s7344_s10 = inlined_call_operand.vmem [shape: f32[1,32], index: 10, kind: input, shape index: {}]   ;;  %s7345_s11 = inlined_call_operand.vmem [shape: f32[1,32], index: 11, kind: input, shape index: {}]   ;;  %s7346_s12 = inlined_call_operand.<no memory space> [shape: f32[1,1], index: 12, kind: input, shape index: {}]   ;;  %s7347_s13 = inlined_call_operand.hbm [shape: f32[1,128], index: 13, kind: output, shape index: {0}]   ;;  %s7348_s14 = inlined_call_operand.hbm [shape: f32[1,128], index: 14, kind: output, shape index: {1}]   ;;  %s7349_s15 = inlined_call_operand.hbm [shape: f32[128,128], index: 15, kind: output, shape index: {2}]   ;;  %s7350_s16 = inlined_call_operand.hbm [shape: f32[1,128], index: 16, kind: output, shape index: {3}]   ;;  %s7351_s17 = inlined_call_operand.hbm [shape: f32[1,128], index: 17, kind: output, shape index: {4}]   ;;  %s7352_s18 = inlined_call_operand.hbm [shape: f32[128,128], index: 18, kind: output, shape index: {5}]   ;;  %s7353_s19 = inlined_call_operand.hbm [shape: f32[128,128], index: 19, kind: output, shape index: {6}]   ;;  %s7354_s20 = inlined_call_operand.hbm [shape: f32[128,128], index: 20, kind: output, shape index: {7}]   ;;  %s7355_s21 = inlined_call_operand.hbm [shape: f32[128,128], index: 21, kind: output, shape index: {8}]  }
   0x1   :  { %7513 = sst [smem:[#allocation92_spill]] %s7334_s0  ;;  %v27_v0 = vstv %s7346_s12 }
   0x2   :  { %7514 = sst [smem:[#allocation93_spill]] %s7335_s1  ;;  %28 = vst [vmem:[#allocation2] sm:$0x1] %v27_v0 }
   0x3   :  { %7515 = sst [smem:[#allocation94_spill]] %s7336_s2 }
   0x4   :  { %7516 = sst [smem:[#allocation95_spill]] %s7337_s3 }
   0x5   :  { %7517 = sst [smem:[#allocation96_spill]] %s7338_s4 }
   0x6   :  { %7518 = sst [smem:[#allocation97_spill]] %s7339_s5 }
   0x7   :  { %29 = vsyncpa [#allocation4], 0 }
   0x8   :  { %30 = vsyncpa [#allocation7], 0 }
   0x9   :  { %31 = vsyncpa [#allocation10], 0 }
   0xa   :  { %32 = vsyncpa [#allocation5], 0 }
   0xb   :  { %33 = vsyncpa [#allocation14], 0 }
   0xc   :  { %34 = vsyncpa [#allocation17], 0 }
   0xd   :  { %35 = vsyncpa [#allocation20], 0 }
   0xe   :  { %36 = vsyncpa [#allocation23], 0  ;;  %s4582_s26 = smov [#allocation6]   ;;  %s4583_s3 = smov [#allocation9]  }
   0xf   :  { %s61_s27 = sshll.u32 %s4582_s26, 4  ;;  %s81_s28 = sshll.u32 %s4583_s3, 4  ;;  %s62_s27 = int_to_ptr.vmem [resolvable:$true] %s61_s27  ;;  %s82_s28 = int_to_ptr.vmem [resolvable:$true] %s81_s28 }
  0x10   :  { %s7519_s4 = sld [smem:[#allocation97_spill]] }
  0x16   :  { %s3954_s30 = scalar_lea.hbm %s7519_s4, 16 }
  0x17   :  { %p3955_p0 = scmp.ne.s32.totalorder %s7519_s4, %s3954_s30  ;;  %p3958_p1 = scmp.lt.u32.totalorder %s3954_s30, %s7519_s4 }
  0x19   :  { %p3960_p2 = pnand %p3958_p1, %p3955_p0 }
  0x1b   :  { %3963 = shalt.err (!%p3960_p2)
}
  0x1c   :  { %s3964_s1 = scalar_lea.vmem %s62_s27, 16  ;;  %s3968_s24 = scalar_lea.vmem %s62_s27, 32 }
  0x1d   :  { %p3965_p3 = scmp.ne.s32.totalorder %s62_s27, %s3964_s1  ;;  %p3969_p4 = scmp.lt.s32.totalorder %s62_s27, %s62_s27 }
  0x1e   :  { %p3970_p5 = scmp.lt.s32.totalorder %s3968_s24, %s3964_s1 }
  0x20   :  { %p3971_p6 = por %p3970_p5, %p3969_p4 }
  0x22   :  { %p3972_p7 = pnand %p3971_p6, %p3965_p3 }
  0x24   :  { %3975 = shalt.err (!%p3972_p7)
}
  0x25   :  { %64 = dma.hbm_to_vmem [thread:$0]  %s7519_s4, 16, %s62_s27, [#allocation7]  }
  0x26   :  { %s3976_s29 = scalar_lea.hbm %s7341_s7, 64 }
  0x27   :  { %p3977_p8 = scmp.ne.s32.totalorder %s7341_s7, %s3976_s29  ;;  %p3980_p9 = scmp.lt.u32.totalorder %s3976_s29, %s7341_s7 }
  0x29   :  { %p3982_p10 = pnand %p3980_p9, %p3977_p8 }
  0x2b   :  { %3985 = shalt.err (!%p3982_p10)
}
  0x2c   :  { %s3986_s22 = scalar_lea.vmem %s82_s28, 64  ;;  %p3991_p12 = scmp.lt.s32.totalorder %s82_s28, %s82_s28 }
  0x2d   :  { %p3987_p11 = scmp.ne.s32.totalorder %s82_s28, %s3986_s22  ;;  %p3992_p13 = scmp.lt.s32.totalorder %s3986_s22, %s3986_s22 }
  0x2f   :  { %p3993_p0 = por %p3992_p13, %p3991_p12 }
  0x31   :  { %p3994_p1 = pnand %p3993_p0, %p3987_p11 }
  0x33   :  { %3997 = shalt.err (!%p3994_p1)
}
  0x34   :  { %84 = dma.hbm_to_vmem [thread:$0]  %s7341_s7, 64, %s82_s28, [#allocation10]  }
  0x35   :  { %s4584_s23 = smov [#allocation3]   ;;  %s4585_s24 = smov [#allocation8]  }
  0x36   :  { %s51_s1 = sshll.u32 %s4584_s23, 4  ;;  %s71_s2 = sshll.u32 %s4585_s24, 4  ;;  %s52_s1 = int_to_ptr.vmem [resolvable:$true] %s51_s1  ;;  %s72_s2 = int_to_ptr.vmem [resolvable:$true] %s71_s2 }
  0x37   :  { %s7520_s3 = sld [smem:[#allocation96_spill]] }
  0x3d   :  { %s3998_s29 = scalar_lea.hbm %s7520_s3, 64 }
  0x3e   :  { %p3999_p2 = scmp.ne.s32.totalorder %s7520_s3, %s3998_s29  ;;  %p4002_p3 = scmp.lt.u32.totalorder %s3998_s29, %s7520_s3 }
  0x40   :  { %p4004_p4 = pnand %p4002_p3, %p3999_p2 }
  0x42   :  { %4007 = shalt.err (!%p4004_p4)
}
  0x43   :  { %s4008_s7 = scalar_lea.vmem %s52_s1, 64  ;;  %p4013_p6 = scmp.lt.s32.totalorder %s52_s1, %s52_s1 }
  0x44   :  { %p4009_p5 = scmp.ne.s32.totalorder %s52_s1, %s4008_s7  ;;  %p4014_p7 = scmp.lt.s32.totalorder %s4008_s7, %s4008_s7 }
  0x46   :  { %p4015_p8 = por %p4014_p7, %p4013_p6 }
  0x48   :  { %p4016_p9 = pnand %p4015_p8, %p4009_p5 }
  0x4a   :  { %4019 = shalt.err (!%p4016_p9)
}
  0x4b   :  { %54 = dma.hbm_to_vmem [thread:$0]  %s7520_s3, 64, %s52_s1, [#allocation4]  }
  0x4c   :  { %s4020_s23 = scalar_lea.hbm %s7340_s6, 16 }
  0x4d   :  { %p4021_p10 = scmp.ne.s32.totalorder %s7340_s6, %s4020_s23  ;;  %p4024_p11 = scmp.lt.u32.totalorder %s4020_s23, %s7340_s6 }
  0x4f   :  { %p4026_p12 = pnand %p4024_p11, %p4021_p10 }
  0x51   :  { %4029 = shalt.err (!%p4026_p12)
}
  0x52   :  { %s4030_s0 = scalar_lea.vmem %s72_s2, 16  ;;  %s4034_s30 = scalar_lea.vmem %s72_s2, 32 }
  0x53   :  { %p4031_p13 = scmp.ne.s32.totalorder %s72_s2, %s4030_s0  ;;  %p4035_p0 = scmp.lt.s32.totalorder %s72_s2, %s72_s2 }
  0x54   :  { %p4036_p1 = scmp.lt.s32.totalorder %s4034_s30, %s4030_s0 }
  0x56   :  { %p4037_p2 = por %p4036_p1, %p4035_p0 }
  0x58   :  { %p4038_p3 = pnand %p4037_p2, %p4031_p13 }
  0x5a   :  { %4041 = shalt.err (!%p4038_p3)
}
  0x5b   :  { %74 = dma.hbm_to_vmem [thread:$0]  %s7340_s6, 16, %s72_s2, [#allocation7]  }
  0x5c   :  { %s4586_s12 = smov [#allocation11]   ;;  %s4042_s22 = scalar_lea.hbm %s7342_s8, 16 }
  0x5d   :  { %s91_s5 = sshll.u32 %s4586_s12, 4  ;;  %p4043_p4 = scmp.ne.s32.totalorder %s7342_s8, %s4042_s22  ;;  %s92_s5 = int_to_ptr.vmem [resolvable:$true] %s91_s5 }
  0x5e   :  { %p4046_p5 = scmp.lt.u32.totalorder %s4042_s22, %s7342_s8 }
  0x60   :  { %p4048_p6 = pnand %p4046_p5, %p4043_p4 }
  0x62   :  { %4051 = shalt.err (!%p4048_p6)
}
  0x63   :  { %s4052_s25 = scalar_lea.vmem %s92_s5, 16  ;;  %s4056_s6 = scalar_lea.vmem %s92_s5, 32 }
  0x64   :  { %p4053_p7 = scmp.ne.s32.totalorder %s92_s5, %s4052_s25  ;;  %p4057_p8 = scmp.lt.s32.totalorder %s92_s5, %s92_s5 }
  0x65   :  { %p4058_p9 = scmp.lt.s32.totalorder %s4056_s6, %s4052_s25 }
  0x67   :  { %p4059_p10 = por %p4058_p9, %p4057_p8 }
  0x69   :  { %p4060_p11 = pnand %p4059_p10, %p4053_p7 }
  0x6b   :  { %4063 = shalt.err (!%p4060_p11)
}
  0x6c   :  { %94 = dma.hbm_to_vmem [thread:$0]  %s7342_s8, 16, %s92_s5, [#allocation10]  }
  0x6d   :  { %4414 = dma.done.wait [#allocation4], 64  }
  0x6e   :  { %4415 = vsyncadd [#allocation4], 4294967232 }
  0x6f   :  { %4416 = dma.done.wait [#allocation7], 32  }
  0x70   :  { %4417 = vsyncadd [#allocation7], 4294967264 }
  0x71   :  { %4418 = dma.done.wait [#allocation10], 80  }
  0x72   :  { %4419 = vsyncadd [#allocation10], 4294967216  ;;  %v4587_v1 = vmov 0   ;;  %s7521_s30 = sld [smem:[#allocation92_spill]]  ;;  %v7522_v9 = vmov 0  ;;  %v7525_v10 = vmov 0 }
  0x73   :  { %3634 = vset.pattern.permute.xlu0 %v4587_v1  ;;  %3635 = vset.pattern.permute.xlu1 %v4587_v1  ;;  %v7528_v11 = vmov 0  ;;  %v7361_v13 = vmov 0.0   ;;  %v7531_v17 = vmov 0  ;;  %v7534_v21 = vmov 0  ;;  %s7540_s29 = sld [smem:[#allocation93_spill]]  ;;  %s7647_s6 = sld [smem:[#allocation95_spill]] }
  0x74   :  { %v7537_v26 = vmov 0  ;;  %v7541_v33 = vmov 0  ;;  %v7544_v39 = vmov 0  ;;  %v7547_v44 = vmov 0  ;;  %s7650_s26 = sld [smem:[#allocation94_spill]]  ;;  %s5909_s0 = smov 0  }
  0x75   :  { %v7550_v49 = vmov 0  ;;  %v7553_v53 = vmov 0  ;;  %v7556_v56 = vmov 0  ;;  %v7559_v60 = vmov 0 }
  0x76   :  { %v7562_v0 = vmov 0 }
  0x78   :  { %v118_v2 = vld [vmem:[%s7521_s30] sm:$0xff]  ;;  %v119_v3 = vld [vmem:[%s7521_s30 + $0x8] sm:$0xff]  ;;  %v120_v4 = vld [vmem:[%s7521_s30 + $0x10] sm:$0xff] }
  0x79   :  { %232 = vadd.xlane.f32.xlu1 %v118_v2  ;;  %v152_v5 = vand.u32 2147483647, %v118_v2  ;;  %v154_v6 = vand.u32 2147483647, %v120_v4  ;;  %v153_v7 = vand.u32 2147483647, %v119_v3 }
  0x7a   :  { %v121_v8 = vld [vmem:[%s7521_s30 + $0x18] sm:$0xff]  ;;  %v122_v18 = vld [vmem:[%s7521_s30 + $0x20] sm:$0xff]  ;;  %v124_v22 = vld [vmem:[%s7521_s30 + $0x30] sm:$0xff] }
  0x7b   :  { %vm4787_vm0 = vcmp.gt.f32.partialorder %v152_v5, 0.0  ;;  %vm4791_vm1 = vcmp.gt.f32.partialorder %v154_v6, 0.0  ;;  %vm4795_vm2 = vcmp.gt.f32.partialorder %v153_v7, 0.0  ;;  %v155_v12 = vand.u32 2147483647, %v121_v8  ;;  %v123_v25 = vld [vmem:[%s7521_s30 + $0x28] sm:$0xff] }
  0x7c   :  { %v7523_v9 = vsel %vm4787_vm0, 4294967295, %v7522_v9  ;;  %v7526_v10 = vsel %vm4791_vm1, 4294967295, %v7525_v10  ;;  %v7529_v11 = vsel %vm4795_vm2, 4294967295, %v7528_v11  ;;  %v184_v14 = vsel %vm4787_vm0, 1.0, %v7361_v13  ;;  %v126_v27 = vld [vmem:[%s7521_s30 + $0x40] sm:$0xff]  ;;  %v125_v31 = vld [vmem:[%s7521_s30 + $0x38] sm:$0xff] }
  0x7d   :  { %7524 = vst [vmem:[#allocation33_spill] sm:$0xff] %v7523_v9  ;;  %7527 = vst [vmem:[#allocation34_spill] sm:$0xff] %v7526_v10  ;;  %234 = vadd.xlane.f32.xlu1 %v119_v3  ;;  %200 = vadd.xlane.f32.xlu0 %v184_v14  ;;  %v186_v15 = vsel %vm4791_vm1, 1.0, %v7361_v13  ;;  %v185_v16 = vsel %vm4795_vm2, 1.0, %v7361_v13  ;;  %vm4808_vm3 = vcmp.gt.f32.partialorder %v155_v12, 0.0  ;;  %v134_v30 = vld [vmem:[%s7540_s29] sm:$0xff] }
  0x7e   :  { %7530 = vst [vmem:[#allocation35_spill] sm:$0xff] %v7529_v11  ;;  %v7532_v17 = vsel %vm4808_vm3, 4294967295, %v7531_v17  ;;  %v187_v19 = vsel %vm4808_vm3, 1.0, %v7361_v13  ;;  %v156_v20 = vand.u32 2147483647, %v122_v18  ;;  %v265_v32 = vsub.f32 0.0, %v134_v30 }
  0x7f   :  { %7533 = vst [vmem:[#allocation36_spill] sm:$0xff] %v7532_v17  ;;  %v158_v24 = vand.u32 2147483647, %v124_v22  ;;  %v160_v29 = vand.u32 2147483647, %v126_v27  ;;  %v4854_v34 = vld [vmem:[%s7521_s30 + $0x50] sm:$0xff] }
  0x80   :  { %vm4818_vm4 = vcmp.gt.f32.partialorder %v156_v20, 0.0  ;;  %v162_v36 = vand.u32 2147483647, %v4854_v34  ;;  %v136_v37 = vld [vmem:[%s7540_s29 + $0x10] sm:$0xff]  ;;  %v127_v38 = vld [vmem:[%s7521_s30 + $0x48] sm:$0xff]  ;;  %v4873_v40 = vld [vmem:[%s7521_s30 + $0x60] sm:$0xff] }
  0x81   :  { %204 = vadd.xlane.f32.xlu1 %v186_v15  ;;  %202 = vadd.xlane.f32.xlu0 %v185_v16  ;;  %v7535_v21 = vsel %vm4818_vm4, 4294967295, %v7534_v21  ;;  %v188_v23 = vsel %vm4818_vm4, 1.0, %v7361_v13  ;;  %vm4831_vm5 = vcmp.gt.f32.partialorder %v158_v24, 0.0  ;;  %vm4847_vm6 = vcmp.gt.f32.partialorder %v160_v29, 0.0  ;;  %v129_v43 = vld [vmem:[%s7521_s30 + $0x58] sm:$0xff]  ;;  %v4889_v45 = vld [vmem:[%s7521_s30 + $0x70] sm:$0xff] }
  0x82   :  { %7536 = vst [vmem:[#allocation37_spill] sm:$0xff] %v7535_v21  ;;  %v7538_v26 = vsel %vm4831_vm5, 4294967295, %v7537_v26  ;;  %v190_v28 = vsel %vm4831_vm5, 1.0, %v7361_v13  ;;  %v7542_v33 = vsel %vm4847_vm6, 4294967295, %v7541_v33  ;;  %v192_v35 = vsel %vm4847_vm6, 1.0, %v7361_v13  ;;  %v131_v48 = vld [vmem:[%s7521_s30 + $0x68] sm:$0xff] }
  0x83   :  { %7539 = vst [vmem:[#allocation38_spill] sm:$0xff] %v7538_v26  ;;  %7543 = vst [vmem:[#allocation39_spill] sm:$0xff] %v7542_v33  ;;  %vm4866_vm7 = vcmp.gt.f32.partialorder %v162_v36, 0.0  ;;  %v164_v42 = vand.u32 2147483647, %v4873_v40  ;;  %v133_v52 = vld [vmem:[%s7521_s30 + $0x78] sm:$0xff] }
  0x84   :  { %v7545_v39 = vsel %vm4866_vm7, 4294967295, %v7544_v39  ;;  %v194_v41 = vsel %vm4866_vm7, 1.0, %v7361_v13  ;;  %v166_v47 = vand.u32 2147483647, %v4889_v45  ;;  %v157_v51 = vand.u32 2147483647, %v123_v25 }
  0x85   :  { %236 = vadd.xlane.f32.xlu1 %v120_v4  ;;  %206 = vadd.xlane.f32.xlu0 %v187_v19  ;;  %7546 = vst [vmem:[#allocation40_spill] sm:$0xff] %v7545_v39  ;;  %vm4882_vm8 = vcmp.gt.f32.partialorder %v164_v42, 0.0  ;;  %v159_v55 = vand.u32 2147483647, %v125_v31  ;;  %v161_v58 = vand.u32 2147483647, %v127_v38 }
  0x86   :  { %v7548_v44 = vsel %vm4882_vm8, 4294967295, %v7547_v44  ;;  %v196_v46 = vsel %vm4882_vm8, 1.0, %v7361_v13  ;;  %vm4898_vm9 = vcmp.gt.f32.partialorder %v166_v47, 0.0  ;;  %vm4908_vm10 = vcmp.gt.f32.partialorder %v157_v51, 0.0  ;;  %v135_v59 = vld [vmem:[%s7540_s29 + $0x8] sm:$0xff]  ;;  %v137_v3 = vld [vmem:[%s7540_s29 + $0x18] sm:$0xff] }
  0x87   :  { %7549 = vst [vmem:[#allocation41_spill] sm:$0xff] %v7548_v44  ;;  %v7551_v49 = vsel %vm4898_vm9, 4294967295, %v7550_v49  ;;  %v198_v50 = vsel %vm4898_vm9, 1.0, %v7361_v13  ;;  %v7554_v53 = vsel %vm4908_vm10, 4294967295, %v7553_v53  ;;  %v189_v54 = vsel %vm4908_vm10, 1.0, %v7361_v13  ;;  %v1111_v5 = vld [vmem:[%s7343_s9] sm:$0xff] }
  0x88   :  { %7552 = vst [vmem:[#allocation42_spill] sm:$0xff] %v7551_v49  ;;  %7555 = vst [vmem:[#allocation43_spill] sm:$0xff] %v7554_v53  ;;  %vm4915_vm11 = vcmp.gt.f32.partialorder %v159_v55, 0.0  ;;  %vm4925_vm12 = vcmp.gt.f32.partialorder %v161_v58, 0.0  ;;  %v266_v61 = vsub.f32 0.0, %v135_v59  ;;  %v267_v1 = vsub.f32 0.0, %v136_v37 }
  0x89   :  { %238 = vadd.xlane.f32.xlu1 %v121_v8  ;;  %v7557_v56 = vsel %vm4915_vm11, 4294967295, %v7556_v56  ;;  %v191_v57 = vsel %vm4915_vm11, 1.0, %v7361_v13  ;;  %v7560_v60 = vsel %vm4925_vm12, 4294967295, %v7559_v60  ;;  %v193_v62 = vsel %vm4925_vm12, 1.0, %v7361_v13  ;;  %v1112_v6 = vld [vmem:[%s7343_s9 + $0x8] sm:$0xff]  ;;  %v1113_v14 = vld [vmem:[%s7343_s9 + $0x10] sm:$0xff] }
  0x8a   :  { %7558 = vst [vmem:[#allocation44_spill] sm:$0xff] %v7557_v56  ;;  %7561 = vst [vmem:[#allocation45_spill] sm:$0xff] %v7560_v60  ;;  %v163_v63 = vand.u32 2147483647, %v129_v43  ;;  %v165_v4 = vand.u32 2147483647, %v131_v48  ;;  %v3265_v7 = vpack.c.bf16 %v1112_v6, %v1111_v5 }
  0x8b   :  { %v268_v8 = vsub.f32 0.0, %v137_v3  ;;  %v7565_v12 = vmov 0  ;;  %v1114_v15 = vld [vmem:[%s7343_s9 + $0x18] sm:$0xff]  ;;  %v167_v19 = vand.u32 2147483647, %v133_v52  ;;  %v7363_v20 = vmov 0.0|0.0  }
  0x8c   :  { %vm4932_vm13 = vcmp.gt.f32.partialorder %v163_v63, 0.0  ;;  %3266 = vmatprep.subr.bf16.mxu1 %v3265_v7  ;;  %vm4948_vm14 = vcmp.gt.f32.partialorder %v165_v4, 0.0  ;;  %v3269_v16 = vpack.c.bf16 %v1114_v15, %v1113_v14  ;;  %3233 = vmatprep.subr.bf16.mxu0 %v7363_v20  ;;  %v7568_v24 = vmov 0  ;;  %v141_v29 = vld [vmem:[%s7540_s29 + $0x38] sm:$0xff] }
  0x8d   :  { %208 = vadd.xlane.f32.xlu1 %v188_v23  ;;  %v7563_v0 = vsel %vm4932_vm13, 4294967295, %v7562_v0  ;;  %v195_v2 = vsel %vm4932_vm13, 1.0, %v7361_v13  ;;  %v7566_v12 = vsel %vm4948_vm14, 4294967295, %v7565_v12  ;;  %3268 = vmatpush3.bf16.msra.mxu1 %v3265_v7  ;;  %v139_v23 = vld [vmem:[%s7540_s29 + $0x28] sm:$0xff]  ;;  %vm4970_vm15 = vcmp.gt.f32.partialorder %v167_v19, 0.0  ;;  %v145_v36 = vld [vmem:[%s7540_s29 + $0x58] sm:$0xff] }
  0x8e   :  { %7564 = vst [vmem:[#allocation46_spill] sm:$0xff] %v7563_v0  ;;  %7567 = vst [vmem:[#allocation47_spill] sm:$0xff] %v7566_v12  ;;  %3270 = vmatprep.subr.bf16.mxu1 %v3269_v16  ;;  %v7569_v24 = vsel %vm4970_vm15, 4294967295, %v7568_v24  ;;  %v149_v47 = vld [vmem:[%s7540_s29 + $0x78] sm:$0xff]  ;;  %v361_v14 = vlaneseq  ;;  %vm7592_vm13 = vcmask 261120  }
  0x8f   :  { %7570 = vst [vmem:[#allocation48_spill] sm:$0xff] %v7569_v24 }
  0x91   :  { %242 = vadd.xlane.f32.xlu1 %v123_v25  ;;  %3272 = vmatpush3.bf16.msra.mxu1 %v3269_v16  ;;  %v270_v25 = vsub.f32 0.0, %v139_v23 }
  0x92   :  { %3273 = vmatprep.subr.bf16.mxu1 %v7363_v20 }
  0x95   :  { %212 = vadd.xlane.f32.xlu1 %v190_v28  ;;  %v140_v28 = vld [vmem:[%s7540_s29 + $0x30] sm:$0xff] }
  0x99   :  { %246 = vadd.xlane.f32.xlu1 %v125_v31  ;;  %v142_v31 = vld [vmem:[%s7540_s29 + $0x40] sm:$0xff] }
  0x9a   :  { %v273_v51 = vsub.f32 0.0, %v142_v31 }
  0x9b   :  { %283 = vperm.xlu0 %3634, %v265_v32   ;;  %v143_v32 = vld [vmem:[%s7540_s29 + $0x48] sm:$0xff] }
  0x9d   :  { %216 = vadd.xlane.f32.xlu1 %v192_v35  ;;  %v144_v35 = vld [vmem:[%s7540_s29 + $0x50] sm:$0xff] }
  0x9e   :  { %v275_v55 = vsub.f32 0.0, %v144_v35 }
  0x9f   :  { %393 = vperm.xlu0 %3634, %v136_v37   ;;  %v276_v37 = vsub.f32 0.0, %v145_v36 }
  0xa1   :  { %250 = vadd.xlane.f32.xlu1 %v127_v38 }
  0xa5   :  { %220 = vadd.xlane.f32.xlu1 %v194_v41  ;;  %v147_v41 = vld [vmem:[%s7540_s29 + $0x68] sm:$0xff] }
  0xa6   :  { %v278_v42 = vsub.f32 0.0, %v147_v41 }
  0xa9   :  { %254 = vadd.xlane.f32.xlu1 %v129_v43  ;;  %v271_v43 = vsub.f32 0.0, %v140_v28 }
  0xad   :  { %224 = vadd.xlane.f32.xlu1 %v196_v46  ;;  %v148_v46 = vld [vmem:[%s7540_s29 + $0x70] sm:$0xff] }
  0xae   :  { %v279_v63 = vsub.f32 0.0, %v148_v46 }
  0xb1   :  { %258 = vadd.xlane.f32.xlu1 %v131_v48 }
  0xb5   :  { %228 = vadd.xlane.f32.xlu1 %v198_v50  ;;  %v280_v50 = vsub.f32 0.0, %v149_v47 }
  0xb9   :  { %262 = vadd.xlane.f32.xlu1 %v133_v52 }
  0xbe   :  { %210 = vadd.xlane.f32.xlu0 %v189_v54 }
  0xc2   :  { %240 = vadd.xlane.f32.xlu0 %v122_v18  ;;  %v197_v18 = vsel %vm4948_vm14, 1.0, %v7361_v13  ;;  %vm7590_vm14 = vmmov 0  }
  0xc6   :  { %214 = vadd.xlane.f32.xlu0 %v191_v57 }
  0xca   :  { %383 = vperm.xlu1 %3635, %v134_v30   ;;  %244 = vadd.xlane.f32.xlu0 %v124_v22  ;;  %v138_v22 = vld [vmem:[%s7540_s29 + $0x20] sm:$0xff]  ;;  %v272_v30 = vsub.f32 0.0, %v141_v29 }
  0xcb   :  { %v269_v38 = vsub.f32 0.0, %v138_v22 }
  0xce   :  { %288 = vperm.xlu1 %3635, %v266_v61   ;;  %218 = vadd.xlane.f32.xlu0 %v193_v62 }
  0xd2   :  { %388 = vperm.xlu1 %3635, %v135_v59   ;;  %248 = vadd.xlane.f32.xlu0 %v126_v27  ;;  %v199_v27 = vsel %vm4970_vm15, 1.0, %v7361_v13  ;;  %vm7365_vm15 = vmmov 0  }
  0xd3   :  { %3163 = vmatprep.mubr.msk.f32.mxu0 %vm7365_vm15, %v7361_v13  ;;  %v5083_v13 = vld [vmem:[#allocation11] ss:$0 sm:$0xff]  ;;  %vm7392_vm15 = vcmask 261120  }
  0xd4   :  { %vm5119_vm9 = vmpackc.low %vm7392_vm15, %vm7392_vm15 }
  0xd6   :  { %293 = vperm.xlu1 %3635, %v267_v1   ;;  %222 = vadd.xlane.f32.xlu0 %v195_v2 }
  0xda   :  { %298 = vperm.xlu1 %3635, %v268_v8   ;;  %252 = vadd.xlane.f32.xlu0 %v4854_v34  ;;  %v274_v34 = vsub.f32 0.0, %v143_v32 }
  0xde   :  { %398 = vperm.xlu1 %3635, %v137_v3   ;;  %226 = vadd.xlane.f32.xlu0 %v197_v18  ;;  %v362_v18 = vshrl.u32 %v361_v14, 7 }
  0xe2   :  { %403 = vperm.xlu1 %3635, %v138_v22   ;;  %256 = vadd.xlane.f32.xlu0 %v4873_v40  ;;  %v146_v40 = vld [vmem:[%s7540_s29 + $0x60] sm:$0xff] }
  0xe3   :  { %v277_v59 = vsub.f32 0.0, %v146_v40 }
  0xe6   :  { %308 = vperm.xlu1 %3635, %v270_v25   ;;  %230 = vadd.xlane.f32.xlu0 %v199_v27  ;;  %v499_v25 = vsub.s32 2, %v362_v18  ;;  %v463_v27 = vsub.s32 1, %v362_v18 }
  0xea   :  { %413 = vperm.xlu1 %3635, %v140_v28   ;;  %260 = vadd.xlane.f32.xlu0 %v4889_v45  ;;  %v264_v28 = vld [vmem:[#allocation3] sm:$0xf] }
  0xee   :  { %318 = vperm.xlu1 %3635, %v272_v30   ;;  %v943_v30 = vld [vmem:[#allocation9] sm:$0xf] }
  0xf2   :  { %423 = vperm.xlu1 %3635, %v142_v31  }
  0xf6   :  { %328 = vperm.xlu1 %3635, %v274_v34  }
  0xfa   :  { %433 = vperm.xlu1 %3635, %v144_v35  }
  0xfe   :  { %338 = vperm.xlu1 %3635, %v276_v37   ;;  %v5057_v37 = vrot.slane %v943_v30, %v499_v25 }
 0x100   :  { %303 = vperm.xlu0 %3634, %v269_v38   ;;  %v5059_v38 = vrot.slane %v264_v28, %v463_v27 }
 0x102   :  { %443 = vperm.xlu1 %3635, %v146_v40   ;;  %v5061_v40 = vrot.slane %v943_v30, %v463_v27 }
 0x104   :  { %408 = vperm.xlu0 %3634, %v139_v23   ;;  %v5045_v23 = vsub.s32 0, %v362_v18 }
 0x106   :  { %348 = vperm.xlu1 %3635, %v278_v42   ;;  %v5003_v45 = vpop.xlane.xlu1 %232  ;;  %7572 = vst [vmem:[#allocation50_spill] sm:$0xff] %v5045_v23  ;;  %v5053_v34 = vrot.slane %v943_v30, %v5045_v23 }
 0x108   :  { %313 = vperm.xlu0 %3634, %v271_v43  }
 0x10a   :  { %453 = vperm.xlu1 %3635, %v148_v46   ;;  %v5011_v48 = vpop.xlane.xlu1 %234  ;;  %v201_v4 = vpop.xlane.xlu0 %200 }
 0x10c   :  { %418 = vperm.xlu0 %3634, %v141_v29   ;;  %v535_v29 = vsub.s32 3, %v362_v18 }
 0x10e   :  { %358 = vperm.xlu1 %3635, %v280_v50   ;;  %v5013_v52 = vpop.xlane.xlu1 %204  ;;  %v203_v7 = vpop.xlane.xlu0 %202  ;;  %v5065_v42 = vrot.slane %v943_v30, %v535_v29 }
 0x10f   :  { %v1005_v24 = vmul.f32 %v5057_v37, %v203_v7 }
 0x110   :  { %323 = vperm.xlu0 %3634, %v273_v51  }
 0x112   :  { %v5015_v54 = vpop.xlane.xlu1 %236  ;;  %v5039_v15 = vpop.xlane.xlu0 %206 }
 0x114   :  { %428 = vperm.xlu0 %3634, %v143_v32   ;;  %v5050_v32 = vrot.slane %v264_v28, %v5045_v23 }
 0x116   :  { %v5017_v57 = vpop.xlane.xlu1 %238 }
 0x118   :  { %333 = vperm.xlu0 %3634, %v275_v55  }
 0x11a   :  { %v5019_v58 = vpop.xlane.xlu1 %208  ;;  %v284_v19 = vpop.permute.xlu0 %283 }
 0x11b   :  { %v365_v46 = vmul.f32 %v5050_v32, %v284_v19 }
 0x11c   :  { %438 = vperm.xlu0 %3634, %v145_v36   ;;  %v5055_v36 = vrot.slane %v264_v28, %v499_v25 }
 0x11e   :  { %v5021_v61 = vpop.xlane.xlu1 %242  ;;  %v394_v35 = vpop.permute.xlu0 %393 }
 0x11f   :  { %v970_v12 = vmul.f32 %v5061_v40, %v394_v35 }
 0x120   :  { %343 = vperm.xlu0 %3634, %v277_v59   ;;  %v501_v59 = vmul.f32 %v5055_v36, %v201_v4 }
 0x122   :  { %v5023_v62 = vpop.xlane.xlu1 %212 }
 0x124   :  { %448 = vperm.xlu0 %3634, %v147_v41   ;;  %v5063_v41 = vrot.slane %v264_v28, %v535_v29  ;;  %v1040_v28 = vmul.f32 %v5065_v42, %v5003_v45 }
 0x126   :  { %v5025_v1 = vpop.xlane.xlu1 %246  ;;  %v537_v27 = vmul.f32 %v5063_v41, %v5003_v45 }
 0x128   :  { %353 = vperm.xlu0 %3634, %v279_v63   ;;  %v1004_v63 = vmul.f32 %v5057_v37, %v201_v4 }
 0x12a   :  { %v5027_v2 = vpop.xlane.xlu1 %216 }
 0x12c   :  { %458 = vperm.xlu0 %3634, %v149_v47   ;;  %v948_v47 = vmul.f32 %v5053_v34, %v284_v19 }
 0x12e   :  { %v5029_v3 = vpop.xlane.xlu1 %250 }
 0x132   :  { %v5031_v5 = vpop.xlane.xlu1 %220 }
 0x136   :  { %v5033_v6 = vpop.xlane.xlu1 %254 }
 0x137   :  { %v5229_v56 = vmul.f32 %v5065_v42, %v5033_v6 }
 0x13a   :  { %v5035_v8 = vpop.xlane.xlu1 %224 }
 0x13b   :  { %v5237_v26 = vmul.f32 %v5057_v37, %v5035_v8 }
 0x13e   :  { %v5041_v16 = vpop.xlane.xlu1 %258 }
 0x13f   :  { %v5241_v53 = vmul.f32 %v5063_v41, %v5041_v16 }
 0x141   :  { %7579 = vst [vmem:[#allocation54_spill] sm:$0xff] %v5241_v53 }
 0x142   :  { %v5043_v22 = vpop.xlane.xlu1 %228 }
 0x143   :  { %7571 = vst [vmem:[#allocation49_spill] sm:$0xff] %v5043_v22 }
 0x146   :  { %v5047_v31 = vpop.xlane.xlu1 %262 }
 0x147   :  { %7573 = vst [vmem:[#allocation51_spill] sm:$0xff] %v5047_v31 }
 0x14a   :  { %v384_v43 = vpop.permute.xlu1 %383 }
 0x14b   :  { %v465_v50 = vmul.f32 %v5059_v38, %v384_v43  ;;  %v968_v51 = vmul.f32 %v5061_v40, %v384_v43  ;;  %v5071_v55 = vpop.xlane.xlu0 %210  ;;  %v5081_v43 = vld [vmem:[#allocation6] ss:$0 sm:$0xff] }
 0x14d   :  { %v481_v14 = vadd.f32 %v465_v50, %v365_v46  ;;  %v984_v18 = vadd.f32 %v968_v51, %v948_v47 }
 0x14e   :  { %v289_v25 = vpop.permute.xlu1 %288 }
 0x14f   :  { %v517_v19 = vadd.f32 %v501_v59, %v481_v14  ;;  %v1020_v29 = vadd.f32 %v1004_v63, %v984_v18  ;;  %v5079_v30 = vpop.xlane.xlu0 %240  ;;  %v366_v20 = vmul.f32 %v5050_v32, %v289_v25  ;;  %v949_v4 = vmul.f32 %v5053_v34, %v289_v25 }
 0x150   :  { %v502_v18 = vmul.f32 %v5055_v36, %v203_v7  ;;  %v541_v17 = vmul.f32 %v5063_v41, %v5079_v30 }
 0x151   :  { %v553_v46 = vadd.f32 %v537_v27, %v517_v19  ;;  %v1056_v47 = vadd.f32 %v1040_v28, %v1020_v29  ;;  %v538_v19 = vmul.f32 %v5063_v41, %v5011_v48  ;;  %v1041_v29 = vmul.f32 %v5065_v42, %v5011_v48 }
 0x152   :  { %v389_v50 = vpop.permute.xlu1 %388  ;;  %v1006_v48 = vmul.f32 %v5057_v37, %v5013_v52 }
 0x153   :  { %v466_v51 = vmul.f32 %v5059_v38, %v389_v50  ;;  %v969_v45 = vmul.f32 %v5061_v40, %v389_v50  ;;  %v5089_v59 = vpop.xlane.xlu0 %214  ;;  %v576_v63 = vmul.f32 %v5081_v43, %v553_v46  ;;  %v1079_v14 = vadd.f32 %v5083_v13, %v1056_v47 }
 0x154   :  { %v467_v50 = vmul.f32 %v5059_v38, %v394_v35 }
 0x155   :  { %v482_v49 = vadd.f32 %v466_v51, %v366_v20  ;;  %v985_v25 = vadd.f32 %v969_v45, %v949_v4  ;;  %v593_v27 = vsel %vm7392_vm15, %v576_v63, 0.0  ;;  %v1095_v28 = vmax.f32 %v1079_v14, 0.0 }
 0x156   :  { %v294_v47 = vpop.permute.xlu1 %293  ;;  %594 = vadd.xlane.f32.xlu1 %v593_v27  ;;  %v503_v51 = vmul.f32 %v5055_v36, %v5013_v52 }
 0x157   :  { %v518_v44 = vadd.f32 %v502_v18, %v482_v49  ;;  %v1021_v0 = vadd.f32 %v1005_v24, %v985_v25  ;;  %v367_v20 = vmul.f32 %v5050_v32, %v294_v47  ;;  %v950_v7 = vmul.f32 %v5053_v34, %v294_v47  ;;  %3174 = vmatprep.mubr.msk.f32.mxu1 %vm7392_vm15, %v1095_v28  ;;  %v5105_v4 = vpop.xlane.xlu0 %244 }
 0x158   :  { %v539_v24 = vmul.f32 %v5063_v41, %v5015_v54  ;;  %v1042_v18 = vmul.f32 %v5065_v42, %v5015_v54 }
 0x159   :  { %v1057_v45 = vadd.f32 %v1041_v29, %v1021_v0  ;;  %v483_v35 = vadd.f32 %v467_v50, %v367_v20  ;;  %v986_v63 = vadd.f32 %v970_v12, %v950_v7  ;;  %v554_v14 = vadd.f32 %v538_v19, %v518_v44 }
 0x15a   :  { %v299_v49 = vpop.permute.xlu1 %298 }
 0x15b   :  { %v519_v25 = vadd.f32 %v503_v51, %v483_v35  ;;  %v1022_v27 = vadd.f32 %v1006_v48, %v986_v63  ;;  %v5115_v28 = vpop.xlane.xlu0 %218  ;;  %v368_v0 = vmul.f32 %v5050_v32, %v299_v49  ;;  %v3234_v44 = vpack.c.bf16 %v554_v14, %v553_v46 }
 0x15c   :  { %v577_v12 = vmul.f32 %v5081_v43, %v554_v14  ;;  %v951_v19 = vmul.f32 %v5053_v34, %v299_v49  ;;  %v1080_v54 = vadd.f32 %v5083_v13, %v1057_v45  ;;  %v7576_v63 = vmov 0.0|0.0  }
 0x15d   :  { %v1058_v52 = vadd.f32 %v1042_v18, %v1022_v27  ;;  %v555_v29 = vadd.f32 %v539_v24, %v519_v25  ;;  %3236 = vmatpush3.bf16.xpose.msk.msra.mxu0 %vm5119_vm9, %v3234_v44  ;;  %v504_v45 = vmul.f32 %v5055_v36, %v5039_v15  ;;  %v1007_v49 = vmul.f32 %v5057_v37, %v5039_v15 }
 0x15e   :  { %v399_v50 = vpop.permute.xlu1 %398  ;;  %v596_v20 = vsel %vm7392_vm15, %v577_v12, 0.0  ;;  %v1096_v46 = vmax.f32 %v1080_v54, 0.0  ;;  %3237 = vmatprep.subr.bf16.mxu0 %v7576_v63  ;;  %v540_v44 = vmul.f32 %v5063_v41, %v5017_v57  ;;  %v1043_v12 = vmul.f32 %v5065_v42, %v5017_v57 }
 0x15f   :  { %v468_v7 = vmul.f32 %v5059_v38, %v399_v50  ;;  %v971_v51 = vmul.f32 %v5061_v40, %v399_v50  ;;  %597 = vadd.xlane.f32.xlu0 %v596_v20  ;;  %v5132_v48 = vpop.xlane.xlu0 %248  ;;  %v578_v35 = vmul.f32 %v5081_v43, %v555_v29  ;;  %v1081_v14 = vadd.f32 %v5083_v13, %v1058_v52 }
 0x160   :  { %3175 = vmatmul.mubr.msk.f32.vlgmr.msra.gmra.mrb[0].mxu1 %vm7392_vm15, %v1096_v46 }
 0x161   :  { %v484_v24 = vadd.f32 %v468_v7, %v368_v0  ;;  %v987_v18 = vadd.f32 %v971_v51, %v951_v19  ;;  %v599_v25 = vsel %vm7392_vm15, %v578_v35, 0.0  ;;  %v1097_v27 = vmax.f32 %v1081_v14, 0.0 }
 0x162   :  { %v404_v19 = vpop.permute.xlu1 %403 }
 0x163   :  { %v520_v54 = vadd.f32 %v504_v45, %v484_v24  ;;  %v1023_v50 = vadd.f32 %v1007_v49, %v987_v18  ;;  %600 = vadd.xlane.f32.xlu0 %v599_v25  ;;  %v5147_v52 = vpop.xlane.xlu0 %222  ;;  %3177 = vmatprep.mubr.msk.f32.mxu1 %vm7392_vm15, %v1097_v27  ;;  %v505_v27 = vmul.f32 %v5055_v36, %v5019_v58 }
 0x164   :  { %v469_v39 = vmul.f32 %v5059_v38, %v404_v19  ;;  %v972_v60 = vmul.f32 %v5061_v40, %v404_v19  ;;  %v5245_v19 = vmul.f32 %v5065_v42, %v5041_v16 }
 0x165   :  { %v556_v15 = vadd.f32 %v540_v44, %v520_v54  ;;  %v1059_v0 = vadd.f32 %v1043_v12, %v1023_v50  ;;  %v1008_v44 = vmul.f32 %v5057_v37, %v5019_v58  ;;  %v542_v12 = vmul.f32 %v5063_v41, %v5021_v61 }
 0x166   :  { %v309_v14 = vpop.permute.xlu1 %308  ;;  %v1045_v54 = vmul.f32 %v5065_v42, %v5021_v61  ;;  %v5179_v50 = vmul.f32 %v5055_v36, %v5023_v62  ;;  %v5191_v58 = vmul.f32 %v5065_v42, %v5025_v1  ;;  %v5199_v61 = vmul.f32 %v5057_v37, %v5027_v2  ;;  %7580 = vst [vmem:[#allocation55_spill] sm:$0xff] %v5245_v19 }
 0x167   :  { %v3238_v20 = vpack.c.bf16 %v556_v15, %v555_v29  ;;  %v5150_v7 = vpop.xlane.xlu0 %252  ;;  %v579_v51 = vmul.f32 %v5081_v43, %v556_v15  ;;  %v1082_v46 = vadd.f32 %v5083_v13, %v1059_v0  ;;  %v5183_v15 = vmul.f32 %v5057_v37, %v5023_v62 }
 0x168   :  { %v5187_v0 = vmul.f32 %v5063_v41, %v5025_v1  ;;  %v5203_v62 = vmul.f32 %v5063_v41, %v5029_v3  ;;  %v5213_v1 = vmul.f32 %v5055_v36, %v5031_v5  ;;  %v370_v10 = vmul.f32 %v5050_v32, %v309_v14 }
 0x169   :  { %3240 = vmatpush3.bf16.xpose.msk.msra.mxu0 %vm5119_vm9, %v3238_v20  ;;  %v602_v57 = vsel %vm7392_vm15, %v579_v51, 0.0  ;;  %v1098_v35 = vmax.f32 %v1082_v46, 0.0  ;;  %v5195_v20 = vmul.f32 %v5055_v36, %v5027_v2  ;;  %v5209_v46 = vmul.f32 %v5065_v42, %v5029_v3 }
 0x16a   :  { %603 = vadd.xlane.f32.xlu1 %v602_v57  ;;  %3241 = vmatprep.subr.bf16.mxu0 %v7576_v63  ;;  %v414_v49 = vpop.permute.xlu1 %413  ;;  %v5217_v57 = vmul.f32 %v5057_v37, %v5031_v5  ;;  %v5221_v2 = vmul.f32 %v5063_v41, %v5033_v6  ;;  %v5233_v5 = vmul.f32 %v5055_v36, %v5035_v8 }
 0x16b   :  { %v5158_v45 = vpop.xlane.xlu0 %226  ;;  %3178 = vmatmul.mubr.msk.f32.gmra.mrb[2].mxu1 %vm7392_vm15, %v1098_v35  ;;  %v5249_v6 = vmul.f32 %v5055_v36, %v5043_v22  ;;  %v1044_v8 = vmul.f32 %v5065_v42, %v5079_v30  ;;  %v953_v11 = vmul.f32 %v5053_v34, %v309_v14  ;;  %v508_v30 = vmul.f32 %v5055_v36, %v5089_v59 }
 0x16c   :  { %v1011_v14 = vmul.f32 %v5057_v37, %v5089_v59 }
 0x16d   :  { %7581 = vst [vmem:[#allocation56_spill] sm:$0xff] %v5249_v6 }
 0x16e   :  { %v5165_v18 = vpop.permute.xlu1 %318 }
 0x16f   :  { %v5161_v29 = vpop.xlane.xlu0 %256 }
 0x172   :  { %v5205_v51 = vpop.permute.xlu1 %423 }
 0x173   :  { %v5163_v24 = vpop.xlane.xlu0 %230 }
 0x174   :  { %7577 = vst [vmem:[#allocation52_spill] sm:$0xff] %v5163_v24 }
 0x176   :  { %v5257_v23 = vpop.permute.xlu1 %328 }
 0x177   :  { %v5167_v25 = vpop.xlane.xlu0 %260 }
 0x178   :  { %7578 = vst [vmem:[#allocation53_spill] sm:$0xff] %v5167_v25 }
 0x17f   :  { %v304_v35 = vpop.permute.xlu0 %303 }
 0x180   :  { %v369_v3 = vmul.f32 %v5050_v32, %v304_v35  ;;  %v952_v33 = vmul.f32 %v5053_v34, %v304_v35 }
 0x182   :  { %v485_v35 = vadd.f32 %v469_v39, %v369_v3  ;;  %v988_v21 = vadd.f32 %v972_v60, %v952_v33  ;;  %v506_v33 = vmul.f32 %v5055_v36, %v5071_v55  ;;  %v1009_v60 = vmul.f32 %v5057_v37, %v5071_v55 }
 0x183   :  { %v409_v9 = vpop.permute.xlu0 %408  ;;  %v974_v55 = vmul.f32 %v5061_v40, %v414_v49 }
 0x184   :  { %v521_v16 = vadd.f32 %v505_v27, %v485_v35  ;;  %v1024_v31 = vadd.f32 %v1008_v44, %v988_v21  ;;  %v470_v24 = vmul.f32 %v5059_v38, %v409_v9  ;;  %v973_v39 = vmul.f32 %v5061_v40, %v409_v9 }
 0x185   :  { %v543_v44 = vmul.f32 %v5063_v41, %v5105_v4  ;;  %v1046_v9 = vmul.f32 %v5065_v42, %v5105_v4  ;;  %v471_v35 = vmul.f32 %v5059_v38, %v414_v49  ;;  %v5287_v4 = vpop.permute.xlu1 %433 }
 0x186   :  { %v1060_v3 = vadd.f32 %v1044_v8, %v1024_v31  ;;  %v486_v6 = vadd.f32 %v470_v24, %v370_v10  ;;  %v989_v27 = vadd.f32 %v973_v39, %v953_v11  ;;  %v557_v21 = vadd.f32 %v541_v17, %v521_v16 }
 0x187   :  { %v314_v19 = vpop.permute.xlu0 %313  ;;  %v5279_v10 = vmul.f32 %v5055_v36, %v5115_v28  ;;  %v5283_v11 = vmul.f32 %v5057_v37, %v5115_v28  ;;  %v372_v16 = vmul.f32 %v5050_v32, %v5165_v18 }
 0x188   :  { %v522_v53 = vadd.f32 %v506_v33, %v486_v6  ;;  %v1025_v25 = vadd.f32 %v1009_v60, %v989_v27  ;;  %v371_v22 = vmul.f32 %v5050_v32, %v314_v19  ;;  %v954_v31 = vmul.f32 %v5053_v34, %v314_v19 }
 0x189   :  { %v580_v17 = vmul.f32 %v5081_v43, %v557_v21  ;;  %v1083_v59 = vadd.f32 %v5083_v13, %v1060_v3  ;;  %v545_v19 = vmul.f32 %v5063_v41, %v5132_v48 }
 0x18a   :  { %v558_v49 = vadd.f32 %v542_v12, %v522_v53  ;;  %v1061_v24 = vadd.f32 %v1045_v54, %v1025_v25  ;;  %v487_v6 = vadd.f32 %v471_v35, %v371_v22  ;;  %v990_v8 = vadd.f32 %v974_v55, %v954_v31 }
 0x18b   :  { %v605_v39 = vsel %vm7392_vm15, %v580_v17, 0.0  ;;  %v419_v28 = vpop.permute.xlu0 %418  ;;  %v1099_v33 = vmax.f32 %v1083_v59, 0.0  ;;  %v955_v22 = vmul.f32 %v5053_v34, %v5165_v18  ;;  %v473_v18 = vmul.f32 %v5059_v38, %v5205_v51 }
 0x18c   :  { %v523_v60 = vadd.f32 %v5179_v50, %v487_v6  ;;  %v1026_v3 = vadd.f32 %v5183_v15, %v990_v8  ;;  %606 = vadd.xlane.f32.xlu0 %v605_v39  ;;  %v3242_v27 = vpack.c.bf16 %v558_v49, %v557_v21  ;;  %v472_v53 = vmul.f32 %v5059_v38, %v419_v28 }
 0x18d   :  { %v975_v25 = vmul.f32 %v5061_v40, %v419_v28  ;;  %3180 = vmatprep.mubr.msk.f32.mxu1 %vm7392_vm15, %v1099_v33  ;;  %v581_v12 = vmul.f32 %v5081_v43, %v558_v49  ;;  %v1084_v54 = vadd.f32 %v5083_v13, %v1061_v24  ;;  %v1048_v50 = vmul.f32 %v5065_v42, %v5132_v48  ;;  %v5313_v49 = vpop.permute.xlu1 %338 }
 0x18e   :  { %v1062_v35 = vadd.f32 %v1046_v9, %v1026_v3  ;;  %v488_v15 = vadd.f32 %v472_v53, %v372_v16  ;;  %3244 = vmatpush3.bf16.xpose.msk.msra.mxu0 %vm5119_vm9, %v3242_v27  ;;  %v559_v21 = vadd.f32 %v543_v44, %v523_v60  ;;  %v976_v55 = vmul.f32 %v5061_v40, %v5205_v51 }
 0x18f   :  { %v991_v31 = vadd.f32 %v975_v25, %v955_v22  ;;  %v608_v17 = vsel %vm7392_vm15, %v581_v12, 0.0  ;;  %v324_v59 = vpop.permute.xlu0 %323  ;;  %3245 = vmatprep.subr.bf16.mxu0 %v7576_v63  ;;  %v1100_v24 = vmax.f32 %v1084_v54, 0.0  ;;  %v5319_v6 = vmul.f32 %v5055_v36, %v5147_v52 }
 0x190   :  { %v524_v48 = vadd.f32 %v508_v30, %v488_v15  ;;  %609 = vadd.xlane.f32.xlu1 %v608_v17  ;;  %v373_v9 = vmul.f32 %v5050_v32, %v324_v59  ;;  %v956_v44 = vmul.f32 %v5053_v34, %v324_v59  ;;  %v582_v8 = vmul.f32 %v5081_v43, %v559_v21 }
 0x191   :  { %v1027_v51 = vadd.f32 %v1011_v14, %v991_v31  ;;  %v1085_v16 = vadd.f32 %v5083_v13, %v1062_v35  ;;  %v5325_v39 = vmul.f32 %v5057_v37, %v5147_v52  ;;  %3181 = vmatmul.mubr.msk.f32.gmra.mrb[4].mxu1 %vm7392_vm15, %v1100_v24  ;;  %v374_v60 = vmul.f32 %v5050_v32, %v5257_v23  ;;  %v444_v15 = vpop.permute.xlu1 %443 }
 0x192   :  { %v560_v30 = vadd.f32 %v5187_v0, %v524_v48  ;;  %v489_v28 = vadd.f32 %v473_v18, %v373_v9  ;;  %v992_v33 = vadd.f32 %v976_v55, %v956_v44  ;;  %v611_v14 = vsel %vm7392_vm15, %v582_v8, 0.0 }
 0x193   :  { %v1063_v3 = vadd.f32 %v5191_v58, %v1027_v51  ;;  %v429_v27 = vpop.permute.xlu0 %428  ;;  %v1101_v53 = vmax.f32 %v1085_v16, 0.0  ;;  %612 = vadd.xlane.f32.xlu0 %v611_v14  ;;  %v957_v12 = vmul.f32 %v5053_v34, %v5257_v23  ;;  %v978_v23 = vmul.f32 %v5061_v40, %v5287_v4 }
 0x194   :  { %v525_v22 = vadd.f32 %v5195_v20, %v489_v28  ;;  %v1028_v52 = vadd.f32 %v5199_v61, %v992_v33  ;;  %v3246_v25 = vpack.c.bf16 %v560_v30, %v559_v21  ;;  %v474_v0 = vmul.f32 %v5059_v38, %v429_v27 }
 0x195   :  { %v977_v54 = vmul.f32 %v5061_v40, %v429_v27  ;;  %3183 = vmatprep.mubr.msk.f32.mxu1 %vm7392_vm15, %v1101_v53  ;;  %v583_v58 = vmul.f32 %v5081_v43, %v560_v30  ;;  %v1086_v35 = vadd.f32 %v5083_v13, %v1063_v3  ;;  %v475_v20 = vmul.f32 %v5059_v38, %v5287_v4  ;;  %v349_v3 = vpop.permute.xlu1 %348 }
 0x196   :  { %v1064_v61 = vadd.f32 %v1048_v50, %v1028_v52  ;;  %v490_v18 = vadd.f32 %v474_v0, %v374_v60  ;;  %3248 = vmatpush3.bf16.xpose.msk.msra.mxu0 %vm5119_vm9, %v3246_v25  ;;  %v561_v21 = vadd.f32 %v545_v19, %v525_v22  ;;  %v547_v19 = vmul.f32 %v5063_v41, %v5150_v7 }
 0x197   :  { %v993_v55 = vadd.f32 %v977_v54, %v957_v12  ;;  %v614_v31 = vsel %vm7392_vm15, %v583_v58, 0.0  ;;  %v334_v17 = vpop.permute.xlu0 %333  ;;  %v1102_v59 = vmax.f32 %v1086_v35, 0.0  ;;  %3249 = vmatprep.subr.bf16.mxu0 %v7576_v63  ;;  %v1050_v4 = vmul.f32 %v5065_v42, %v5150_v7 }
 0x198   :  { %v526_v48 = vadd.f32 %v5279_v10, %v490_v18  ;;  %615 = vadd.xlane.f32.xlu1 %v614_v31  ;;  %v375_v50 = vmul.f32 %v5050_v32, %v334_v17  ;;  %v958_v9 = vmul.f32 %v5053_v34, %v334_v17  ;;  %v584_v44 = vmul.f32 %v5081_v43, %v561_v21 }
 0x199   :  { %v1029_v24 = vadd.f32 %v5283_v11, %v993_v55  ;;  %3184 = vmatmul.mubr.msk.f32.gmra.mrb[6].mxu1 %vm7392_vm15, %v1102_v59  ;;  %v1087_v51 = vadd.f32 %v5083_v13, %v1064_v61  ;;  %v5365_v28 = vmul.f32 %v5055_v36, %v5158_v45  ;;  %v376_v33 = vmul.f32 %v5050_v32, %v5313_v49 }
 0x19a   :  { %v562_v10 = vadd.f32 %v5203_v62, %v526_v48  ;;  %v491_v8 = vadd.f32 %v475_v20, %v375_v50  ;;  %v994_v16 = vadd.f32 %v978_v23, %v958_v9  ;;  %v617_v30 = vsel %vm7392_vm15, %v584_v44, 0.0 }
 0x19b   :  { %v1065_v7 = vadd.f32 %v5209_v46, %v1029_v24  ;;  %618 = vadd.xlane.f32.xlu0 %v617_v30  ;;  %v439_v11 = vpop.permute.xlu0 %438  ;;  %v1103_v60 = vmax.f32 %v1087_v51, 0.0  ;;  %v959_v22 = vmul.f32 %v5053_v34, %v5313_v49  ;;  %v477_v0 = vmul.f32 %v5059_v38, %v444_v15 }
 0x19c   :  { %v527_v14 = vadd.f32 %v5213_v1, %v491_v8  ;;  %v1030_v62 = vadd.f32 %v5217_v57, %v994_v16  ;;  %v3250_v27 = vpack.c.bf16 %v562_v10, %v561_v21  ;;  %v476_v53 = vmul.f32 %v5059_v38, %v439_v11 }
 0x19d   :  { %v979_v52 = vmul.f32 %v5061_v40, %v439_v11  ;;  %3186 = vmatprep.mubr.msk.f32.mxu1 %vm7392_vm15, %v1103_v60  ;;  %v585_v46 = vmul.f32 %v5081_v43, %v562_v10  ;;  %v1088_v25 = vadd.f32 %v5083_v13, %v1065_v7  ;;  %v980_v54 = vmul.f32 %v5061_v40, %v444_v15 }
 0x19e   :  { %v1066_v12 = vadd.f32 %v1050_v4, %v1030_v62  ;;  %v492_v1 = vadd.f32 %v476_v53, %v376_v33  ;;  %3252 = vmatpush3.bf16.xpose.msk.msra.mxu0 %vm5119_vm9, %v3250_v27  ;;  %v563_v57 = vadd.f32 %v547_v19, %v527_v14  ;;  %v1017_v55 = vmul.f32 %v5057_v37, %v5158_v45 }
 0x19f   :  { %v995_v58 = vadd.f32 %v979_v52, %v959_v22  ;;  %v620_v49 = vsel %vm7392_vm15, %v585_v46, 0.0  ;;  %v344_v35 = vpop.permute.xlu0 %343  ;;  %v1104_v20 = vmax.f32 %v1088_v25, 0.0  ;;  %3253 = vmatprep.subr.bf16.mxu0 %v7576_v63  ;;  %v549_v15 = vmul.f32 %v5063_v41, %v5161_v29  ;;  %v7582_v46 = vld [vmem:[#allocation49_spill] sm:$0xff] }
 0x1a0   :  { %v528_v61 = vadd.f32 %v5319_v6, %v492_v1  ;;  %621 = vadd.xlane.f32.xlu1 %v620_v49  ;;  %v377_v18 = vmul.f32 %v5050_v32, %v344_v35  ;;  %v960_v21 = vmul.f32 %v5053_v34, %v344_v35  ;;  %v586_v23 = vmul.f32 %v5081_v43, %v563_v57  ;;  %v454_v6 = vpop.permute.xlu1 %453 }
 0x1a1   :  { %v1031_v31 = vadd.f32 %v5325_v39, %v995_v58  ;;  %3187 = vmatmul.mubr.msk.f32.gmra.mrb[8].mxu1 %vm7392_vm15, %v1104_v20  ;;  %v1089_v17 = vadd.f32 %v5083_v13, %v1066_v12  ;;  %v1052_v44 = vmul.f32 %v5065_v42, %v5161_v29  ;;  %v378_v45 = vmul.f32 %v5050_v32, %v349_v3 }
 0x1a2   :  { %v564_v59 = vadd.f32 %v5221_v2, %v528_v61  ;;  %v493_v48 = vadd.f32 %v477_v0, %v377_v18  ;;  %v996_v50 = vadd.f32 %v980_v54, %v960_v21  ;;  %v623_v9 = vsel %vm7392_vm15, %v586_v23, 0.0  ;;  %v7583_v0 = vld [vmem:[#allocation53_spill] sm:$0xff]  ;;  %v7584_v54 = vld [vmem:[#allocation54_spill] sm:$0xff]  ;;  %v7585_v18 = vld [vmem:[#allocation55_spill] sm:$0xff] }
 0x1a3   :  { %v1067_v19 = vadd.f32 %v5229_v56, %v1031_v31  ;;  %624 = vadd.xlane.f32.xlu0 %v623_v9  ;;  %v449_v39 = vpop.permute.xlu0 %448  ;;  %v1105_v4 = vmax.f32 %v1089_v17, 0.0  ;;  %v961_v8 = vmul.f32 %v5053_v34, %v349_v3  ;;  %v479_v30 = vmul.f32 %v5059_v38, %v454_v6 }
 0x1a4   :  { %v529_v24 = vadd.f32 %v5233_v5, %v493_v48  ;;  %v1032_v51 = vadd.f32 %v5237_v26, %v996_v50  ;;  %v3254_v10 = vpack.c.bf16 %v564_v59, %v563_v57  ;;  %v478_v2 = vmul.f32 %v5059_v38, %v449_v39  ;;  %v359_v62 = vpop.permute.xlu1 %358 }
 0x1a5   :  { %v981_v16 = vmul.f32 %v5061_v40, %v449_v39  ;;  %3189 = vmatprep.mubr.msk.f32.mxu1 %vm7392_vm15, %v1105_v4  ;;  %v587_v29 = vmul.f32 %v5081_v43, %v564_v59  ;;  %v1090_v56 = vadd.f32 %v5083_v13, %v1067_v19  ;;  %v982_v5 = vmul.f32 %v5061_v40, %v454_v6 }
 0x1a6   :  { %v1068_v33 = vadd.f32 %v1052_v44, %v1032_v51  ;;  %v494_v7 = vadd.f32 %v478_v2, %v378_v45  ;;  %3256 = vmatpush3.bf16.xpose.msk.msra.mxu0 %vm5119_vm9, %v3254_v10  ;;  %v565_v26 = vadd.f32 %v549_v15, %v529_v24  ;;  %v1018_v25 = vmul.f32 %v5057_v37, %v7582_v46  ;;  %v7586_v15 = vld [vmem:[#allocation56_spill] sm:$0xff]  ;;  %v7588_v51 = vld [vmem:[#allocation51_spill] sm:$0xff] }
 0x1a7   :  { %v997_v11 = vadd.f32 %v981_v16, %v961_v8  ;;  %v626_v60 = vsel %vm7392_vm15, %v587_v29, 0.0  ;;  %v354_v3 = vpop.permute.xlu0 %353  ;;  %v1106_v14 = vmax.f32 %v1090_v56, 0.0  ;;  %3257 = vmatprep.subr.bf16.mxu0 %v7576_v63  ;;  %v551_v12 = vmul.f32 %v5063_v41, %v7583_v0  ;;  %v7587_v44 = vld [vmem:[#allocation52_spill] sm:$0xff] }
 0x1a8   :  { %v530_v27 = vadd.f32 %v5365_v28, %v494_v7  ;;  %627 = vadd.xlane.f32.xlu1 %v626_v60  ;;  %v379_v53 = vmul.f32 %v5050_v32, %v354_v3  ;;  %v962_v22 = vmul.f32 %v5053_v34, %v354_v3  ;;  %v588_v52 = vmul.f32 %v5081_v43, %v565_v26  ;;  %v1332_v3 = vld [vmem:[#allocation2] sm:$0x1] }
 0x1a9   :  { %v1033_v1 = vadd.f32 %v1017_v55, %v997_v11  ;;  %3190 = vmatmul.mubr.msk.f32.gmra.mrb[10].mxu1 %vm7392_vm15, %v1106_v14  ;;  %v1091_v57 = vadd.f32 %v5083_v13, %v1068_v33  ;;  %v1054_v20 = vmul.f32 %v5065_v42, %v7583_v0  ;;  %v380_v61 = vmul.f32 %v5050_v32, %v359_v62  ;;  %v641_v11 = vld [vmem:[#allocation8] sm:$0x1] }
 0x1aa   :  { %v566_v28 = vadd.f32 %v7584_v54, %v530_v27  ;;  %v495_v58 = vadd.f32 %v479_v30, %v379_v53  ;;  %v998_v49 = vadd.f32 %v982_v5, %v962_v22  ;;  %v629_v35 = vsel %vm7392_vm15, %v588_v52, 0.0 }
 0x1ab   :  { %v1069_v21 = vadd.f32 %v7585_v18, %v1033_v1  ;;  %630 = vadd.xlane.f32.xlu0 %v629_v35  ;;  %v459_v23 = vpop.permute.xlu0 %458  ;;  %v1107_v55 = vmax.f32 %v1091_v57, 0.0  ;;  %v963_v48 = vmul.f32 %v5053_v34, %v359_v62  ;;  %v516_v45 = vmul.f32 %v5055_v36, %v7587_v44 }
 0x1ac   :  { %v531_v31 = vadd.f32 %v7586_v15, %v495_v58  ;;  %v1034_v17 = vadd.f32 %v1018_v25, %v998_v49  ;;  %v3258_v6 = vpack.c.bf16 %v566_v28, %v565_v26  ;;  %v480_v59 = vmul.f32 %v5059_v38, %v459_v23 }
 0x1ad   :  { %v983_v50 = vmul.f32 %v5061_v40, %v459_v23  ;;  %3192 = vmatprep.mubr.msk.f32.mxu1 %vm7392_vm15, %v1107_v55  ;;  %v589_v9 = vmul.f32 %v5081_v43, %v566_v28  ;;  %v1092_v32 = vadd.f32 %v5083_v13, %v1069_v21  ;;  %v1019_v34 = vmul.f32 %v5057_v37, %v7587_v44 }
 0x1ae   :  { %v1070_v19 = vadd.f32 %v1054_v20, %v1034_v17  ;;  %v496_v39 = vadd.f32 %v480_v59, %v380_v61  ;;  %3260 = vmatpush3.bf16.xpose.msk.msra.mxu0 %vm5119_vm9, %v3258_v6  ;;  %v567_v4 = vadd.f32 %v551_v12, %v531_v31  ;;  %v552_v10 = vmul.f32 %v5063_v41, %v7588_v51 }
 0x1af   :  { %v999_v38 = vadd.f32 %v983_v50, %v963_v48  ;;  %v632_v40 = vsel %vm7392_vm15, %v589_v9, 0.0  ;;  %v1108_v24 = vmax.f32 %v1092_v32, 0.0  ;;  %3261 = vmatprep.subr.bf16.mxu0 %v7576_v63  ;;  %v1055_v16 = vmul.f32 %v5065_v42, %v7588_v51 }
 0x1b0   :  { %v532_v2 = vadd.f32 %v516_v45, %v496_v39  ;;  %633 = vadd.xlane.f32.xlu1 %v632_v40  ;;  %v590_v36 = vmul.f32 %v5081_v43, %v567_v4  ;;  %v1093_v8 = vadd.f32 %v5083_v13, %v1070_v19  ;;  %v7589_v60 = vmov 0.0  }
 0x1b1   :  { %v1035_v29 = vadd.f32 %v1019_v34, %v999_v38  ;;  %3193 = vmatmul.mubr.msk.f32.gmra.mrb[12].mxu1 %vm7392_vm15, %v1108_v24 }
 0x1b2   :  { %v568_v37 = vadd.f32 %v552_v10, %v532_v2  ;;  %v635_v56 = vsel %vm7392_vm15, %v590_v36, 0.0  ;;  %v1109_v30 = vmax.f32 %v1093_v8, 0.0 }
 0x1b3   :  { %v1071_v33 = vadd.f32 %v1055_v16, %v1035_v29  ;;  %636 = vadd.xlane.f32.xlu0 %v635_v56 }
 0x1b4   :  { %v3262_v7 = vpack.c.bf16 %v568_v37, %v567_v4  ;;  %3195 = vmatprep.mubr.msk.f32.mxu1 %vm7392_vm15, %v1109_v30  ;;  %v591_v41 = vmul.f32 %v5081_v43, %v568_v37 }
 0x1b5   :  { %v1094_v26 = vadd.f32 %v5083_v13, %v1071_v33  ;;  %v5468_v13 = vld [vmem:[%s7344_s10] ss:$0 sm:$0xff] }
 0x1b6   :  { %3264 = vmatpush3.bf16.xpose.msk.msra.mxu0 %vm5119_vm9, %v3262_v7  ;;  %v638_v42 = vsel %vm7392_vm15, %v591_v41, 0.0 }
 0x1b7   :  { %639 = vadd.xlane.f32.xlu1 %v638_v42  ;;  %v1110_v5 = vmax.f32 %v1094_v26, 0.0 }
 0x1b9   :  { %3196 = vmatmul.mubr.msk.f32.gmra.mrb[14].mxu1 %vm7392_vm15, %v1110_v5 }
 0x1ba   :  { %3230 = vmatprep.mubr.msk.f32.mxu1 %vm7590_vm14, %v7589_v60 }
 0x1bd   :  { %3164 = vmatmul.mubr.msk.f32.vlgmr.msra.gmra.mrb[0].mxu0 %vm7392_vm15, %v641_v11  ;;  %v7591_v11 = vld [vmem:[#allocation50_spill] sm:$0xff] }
 0x1c8   :  { %1335 = vperm.xlu1 %3635, %v1332_v3  }
 0x1e3   :  { %v595_v41 = vpop.xlane.xlu1 %594 }
 0x1ec   :  { %v598_v37 = vpop.xlane.xlu0 %597 }
 0x233   :  { %v3176_v43 = vpop.f32.mrb[0].mxu1 }
 0x234   :  { %v1242_v14 = vadd.f32 %v3176_v43, %v5468_v13  ;;  %v1236_v62 = vpop.f32.mrb[1].mxu1 }
 0x235   :  { %v1237_v27 = vadd.f32 %v5468_v13, %v1236_v62 }
 0x236   :  { %v1316_v53 = vmax.f32 %v1242_v14, 0.0  ;;  %v601_v14 = vpop.xlane.xlu0 %600 }
 0x237   :  { %v1315_v22 = vmax.f32 %v1237_v27, 0.0  ;;  %v604_v27 = vpop.xlane.xlu1 %603 }
 0x239   :  { %v3274_v52 = vpack.c.bf16 %v1316_v53, %v1315_v22 }
 0x23b   :  { %3276 = vmatpush3.bf16.xpose.msk.msra.mxu1 %vm5119_vm9, %v3274_v52 }
 0x23c   :  { %3277 = vmatprep.subr.bf16.mxu1 %v7576_v63 }
 0x23e   :  { %v3179_v46 = vpop.f32.mrb[2].mxu1 }
 0x23f   :  { %v1252_v25 = vadd.f32 %v3179_v46, %v5468_v13  ;;  %v1246_v0 = vpop.f32.mrb[3].mxu1 }
 0x240   :  { %v1247_v12 = vadd.f32 %v5468_v13, %v1246_v0 }
 0x241   :  { %v1318_v1 = vmax.f32 %v1252_v25, 0.0 }
 0x242   :  { %v1317_v57 = vmax.f32 %v1247_v12, 0.0 }
 0x244   :  { %v3278_v54 = vpack.c.bf16 %v1318_v1, %v1317_v57  ;;  %v607_v1 = vpop.xlane.xlu0 %606 }
 0x246   :  { %3280 = vmatpush3.bf16.xpose.msk.msra.mxu1 %vm5119_vm9, %v3278_v54 }
 0x247   :  { %3281 = vmatprep.subr.bf16.mxu1 %v7576_v63 }
 0x264   :  { %v3182_v28 = vpop.f32.mrb[4].mxu1 }
 0x265   :  { %v1262_v58 = vadd.f32 %v3182_v28, %v5468_v13  ;;  %v1256_v49 = vpop.f32.mrb[5].mxu1  ;;  %v1331_v28 = vld [vmem:[%s7345_s11] sm:$0x1] }
 0x266   :  { %v1257_v35 = vadd.f32 %v5468_v13, %v1256_v49 }
 0x267   :  { %v1320_v20 = vmax.f32 %v1262_v58, 0.0 }
 0x268   :  { %v1319_v61 = vmax.f32 %v1257_v35, 0.0  ;;  %v610_v35 = vpop.xlane.xlu1 %609 }
 0x26a   :  { %v3282_v18 = vpack.c.bf16 %v1320_v20, %v1319_v61 }
 0x26c   :  { %v3185_v21 = vpop.f32.mrb[6].mxu1  ;;  %3284 = vmatpush3.bf16.xpose.msk.msra.mxu1 %vm5119_vm9, %v3282_v18 }
 0x26d   :  { %v1272_v23 = vadd.f32 %v3185_v21, %v5468_v13  ;;  %v1266_v55 = vpop.f32.mrb[7].mxu1  ;;  %3285 = vmatprep.subr.bf16.mxu1 %v7576_v63 }
 0x26e   :  { %v1267_v15 = vadd.f32 %v5468_v13, %v1266_v55 }
 0x26f   :  { %v1322_v31 = vmax.f32 %v1272_v23, 0.0  ;;  %v613_v23 = vpop.xlane.xlu0 %612 }
 0x270   :  { %v1321_v17 = vmax.f32 %v1267_v15, 0.0 }
 0x272   :  { %v3286_v6 = vpack.c.bf16 %v1322_v31, %v1321_v17 }
 0x274   :  { %v3188_v59 = vpop.f32.mrb[8].mxu1  ;;  %3288 = vmatpush3.bf16.xpose.msk.msra.mxu1 %vm5119_vm9, %v3286_v6 }
 0x275   :  { %v1282_v48 = vadd.f32 %v3188_v59, %v5468_v13  ;;  %v1276_v50 = vpop.f32.mrb[9].mxu1  ;;  %3289 = vmatprep.subr.bf16.mxu1 %v7576_v63  ;;  %v616_v59 = vpop.xlane.xlu1 %615 }
 0x276   :  { %v1277_v9 = vadd.f32 %v5468_v13, %v1276_v50 }
 0x277   :  { %v1324_v32 = vmax.f32 %v1282_v48, 0.0 }
 0x278   :  { %v1323_v44 = vmax.f32 %v1277_v9, 0.0 }
 0x27a   :  { %v3290_v45 = vpack.c.bf16 %v1324_v32, %v1323_v44 }
 0x27c   :  { %v3191_v19 = vpop.f32.mrb[10].mxu1  ;;  %3292 = vmatpush3.bf16.xpose.msk.msra.mxu1 %vm5119_vm9, %v3290_v45 }
 0x27d   :  { %v1292_v39 = vadd.f32 %v3191_v19, %v5468_v13  ;;  %v1286_v4 = vpop.f32.mrb[11].mxu1  ;;  %3293 = vmatprep.subr.bf16.mxu1 %v7576_v63 }
 0x27e   :  { %v1287_v34 = vadd.f32 %v5468_v13, %v1286_v4 }
 0x27f   :  { %v1326_v38 = vmax.f32 %v1292_v39, 0.0  ;;  %v619_v39 = vpop.xlane.xlu0 %618 }
 0x280   :  { %v1325_v40 = vmax.f32 %v1287_v34, 0.0 }
 0x282   :  { %v3294_v24 = vpack.c.bf16 %v1326_v38, %v1325_v40 }
 0x284   :  { %v3194_v51 = vpop.f32.mrb[12].mxu1  ;;  %3296 = vmatpush3.bf16.xpose.msk.msra.mxu1 %vm5119_vm9, %v3294_v24 }
 0x285   :  { %v1302_v10 = vadd.f32 %v3194_v51, %v5468_v13  ;;  %v1296_v2 = vpop.f32.mrb[13].mxu1  ;;  %3297 = vmatprep.subr.bf16.mxu1 %v7576_v63 }
 0x286   :  { %v1297_v36 = vadd.f32 %v5468_v13, %v1296_v2  ;;  %v622_v2 = vpop.xlane.xlu1 %621 }
 0x287   :  { %v1328_v8 = vmax.f32 %v1302_v10, 0.0 }
 0x288   :  { %v1327_v16 = vmax.f32 %v1297_v36, 0.0 }
 0x28a   :  { %v3298_v29 = vpack.c.bf16 %v1328_v8, %v1327_v16 }
 0x28c   :  { %v3197_v56 = vpop.f32.mrb[14].mxu1  ;;  %3300 = vmatpush3.bf16.xpose.msk.msra.mxu1 %vm5119_vm9, %v3298_v29 }
 0x28d   :  { %v1312_v30 = vadd.f32 %v3197_v56, %v5468_v13  ;;  %v1306_v33 = vpop.f32.mrb[15].mxu1  ;;  %3301 = vmatprep.subr.bf16.mxu1 %v7576_v63 }
 0x28e   :  { %v1307_v7 = vadd.f32 %v5468_v13, %v1306_v33  ;;  %v625_v33 = vpop.xlane.xlu0 %624 }
 0x28f   :  { %v1330_v26 = vmax.f32 %v1312_v30, 0.0 }
 0x290   :  { %v1329_v42 = vmax.f32 %v1307_v7, 0.0  ;;  %v759_v5 = vpop.f32.mrb[0].mxu0 }
 0x291   :  { %v5508_v3 = vrot.slane %v759_v5, %v7591_v11  ;;  %v3165_v43 = vpop.f32.mrb[1].mxu0 }
 0x292   :  { %v3302_v62 = vpack.c.bf16 %v1330_v26, %v1329_v42 }
 0x293   :  { %v767_v53 = vadd.f32 %v5508_v3, %v595_v41  ;;  %v768_v22 = vadd.f32 %v5508_v3, %v598_v37  ;;  %v769_v52 = vadd.f32 %v5508_v3, %v601_v14  ;;  %v770_v13 = vadd.f32 %v5508_v3, %v604_v27 }
 0x294   :  { %3304 = vmatpush3.bf16.xpose.msk.msra.mxu1 %vm5119_vm9, %v3302_v62  ;;  %v771_v47 = vadd.f32 %v5508_v3, %v607_v1  ;;  %v772_v21 = vadd.f32 %v5508_v3, %v610_v35  ;;  %v773_v17 = vadd.f32 %v5508_v3, %v613_v23  ;;  %v774_v45 = vadd.f32 %v5508_v3, %v616_v59  ;;  %v628_v62 = vpop.xlane.xlu1 %627 }
 0x295   :  { %vm783_vm14 = vcmp.gt.f32.partialorder %v767_v53, 0.0  ;;  %v799_v63 = vmul.f32 0.2, %v767_v53  ;;  %vm784_vm15 = vcmp.gt.f32.partialorder %v768_v22, 0.0  ;;  %v800_v46 = vmul.f32 0.2, %v768_v22 }
 0x296   :  { %vm785_vm8 = vcmp.gt.f32.partialorder %v769_v52, 0.0  ;;  %v801_v25 = vmul.f32 0.2, %v769_v52  ;;  %v802_v49 = vmul.f32 0.2, %v770_v13  ;;  %vm786_vm9 = vcmp.gt.f32.partialorder %v770_v13, 0.0 }
 0x297   :  { %v815_v0 = vsel %vm783_vm14, %v767_v53, %v799_v63  ;;  %v816_v12 = vsel %vm784_vm15, %v768_v22, %v800_v46  ;;  %v803_v18 = vmul.f32 0.2, %v771_v47  ;;  %vm787_vm15 = vcmp.gt.f32.partialorder %v771_v47, 0.0 }
 0x298   :  { %v831_v57 = vmul.f32 1.442695, %v815_v0  ;;  %v833_v54 = vmul.f32 1.442695, %v816_v12  ;;  %v817_v58 = vsel %vm785_vm8, %v769_v52, %v801_v25  ;;  %v818_v61 = vsel %vm786_vm9, %v770_v13, %v802_v49  ;;  %v631_v25 = vpop.xlane.xlu0 %630  ;;  %v634_v49 = vpop.xlane.xlu1 %633 }
 0x299   :  { %v835_v20 = vmul.f32 1.442695, %v817_v58  ;;  %v837_v55 = vmul.f32 1.442695, %v818_v61  ;;  %v819_v15 = vsel %vm787_vm15, %v771_v47, %v803_v18  ;;  %v804_v31 = vmul.f32 0.2, %v772_v21 }
 0x29a   :  { %3636 = vpow2.f32 %v831_v57  ;;  %vm788_vm8 = vcmp.gt.f32.partialorder %v772_v21, 0.0  ;;  %v839_v48 = vmul.f32 1.442695, %v819_v15  ;;  %v805_v44 = vmul.f32 0.2, %v773_v17 }
 0x29b   :  { %3231 = vmatmul.mubr.msk.f32.vlgmr.msra.gmra.mrb[16].mxu1 %vm7592_vm13, %v1331_v28  ;;  %3638 = vpow2.f32 %v833_v54  ;;  %v820_v32 = vsel %vm788_vm8, %v772_v21, %v804_v31  ;;  %vm789_vm13 = vcmp.gt.f32.partialorder %v773_v17, 0.0  ;;  %v806_v24 = vmul.f32 0.2, %v774_v45  ;;  %v3706_v31 = vld [vmem:[%s7521_s30] sm:$0xff] }
 0x29c   :  { %3640 = vpow2.f32 %v835_v20  ;;  %v841_v4 = vmul.f32 1.442695, %v820_v32  ;;  %v821_v40 = vsel %vm789_vm13, %v773_v17, %v805_v44  ;;  %v775_v51 = vadd.f32 %v5508_v3, %v619_v39  ;;  %v640_v32 = vpop.xlane.xlu1 %639 }
 0x29d   :  { %3642 = vpow2.f32 %v837_v55  ;;  %v843_v36 = vmul.f32 1.442695, %v821_v40  ;;  %v776_v56 = vadd.f32 %v5508_v3, %v622_v2  ;;  %v777_v43 = vadd.f32 %v5508_v3, %v625_v33  ;;  %v637_v55 = vpop.xlane.xlu0 %636 }
 0x29e   :  { %3644 = vpow2.f32 %v839_v48  ;;  %v807_v37 = vmul.f32 0.2, %v775_v51  ;;  %v778_v63 = vadd.f32 %v5508_v3, %v628_v62  ;;  %v779_v28 = vadd.f32 %v5508_v3, %v631_v25  ;;  %v7608_v62 = vld [vmem:[#allocation47_spill] sm:$0xff] }
 0x29f   :  { %3646 = vpow2.f32 %v841_v4  ;;  %v808_v5 = vmul.f32 0.2, %v776_v56  ;;  %v809_v13 = vmul.f32 0.2, %v777_v43  ;;  %v780_v21 = vadd.f32 %v5508_v3, %v634_v49 }
 0x2a0   :  { %3648 = vpow2.f32 %v843_v36  ;;  %v810_v54 = vmul.f32 0.2, %v778_v63  ;;  %v811_v18 = vmul.f32 0.2, %v779_v28  ;;  %v781_v48 = vadd.f32 %v5508_v3, %v637_v55 }
 0x2a1   :  { %v812_v59 = vmul.f32 0.2, %v780_v21  ;;  %v782_v34 = vadd.f32 %v5508_v3, %v640_v32 }
 0x2a2   :  { %v813_v4 = vmul.f32 0.2, %v781_v48 }
 0x2a3   :  { %v814_v36 = vmul.f32 0.2, %v782_v34 }
 0x2a4   :  { %v3637_v6 = vpop.eup %3636 }
 0x2a5   :  { %v5525_v9 = vsel %vm4787_vm0, %v3637_v6, 0.0  ;;  %v3639_v19 = vpop.eup %3638  ;;  %vm790_vm0 = vcmp.gt.f32.partialorder %v774_v45, 0.0 }
 0x2a6   :  { %879 = vxpose.xlu0.b32.start [1/16] %v5525_v9, 128  ;;  %v5531_v38 = vsel %vm4795_vm2, %v3639_v19, 0.0  ;;  %v3641_v10 = vpop.eup %3640  ;;  %v822_v29 = vsel %vm790_vm0, %v774_v45, %v806_v24  ;;  %vm791_vm2 = vcmp.gt.f32.partialorder %v775_v51, 0.0 }
 0x2a7   :  { %v5537_v16 = vsel %vm4791_vm1, %v3641_v10, 0.0  ;;  %v3643_v30 = vpop.eup %3642  ;;  %v845_v7 = vmul.f32 1.442695, %v822_v29  ;;  %v823_v42 = vsel %vm791_vm2, %v775_v51, %v807_v37  ;;  %vm792_vm1 = vcmp.gt.f32.partialorder %v776_v56, 0.0 }
 0x2a8   :  { %v5543_v26 = vsel %vm4808_vm3, %v3643_v30, 0.0  ;;  %v3645_v14 = vpop.eup %3644  ;;  %v847_v27 = vmul.f32 1.442695, %v823_v42  ;;  %v824_v52 = vsel %vm792_vm1, %v776_v56, %v808_v5  ;;  %vm793_vm3 = vcmp.gt.f32.partialorder %v777_v43, 0.0  ;;  %v7606_v5 = vld [vmem:[#allocation41_spill] sm:$0xff] }
 0x2a9   :  { %3650 = vpow2.f32 %v845_v7  ;;  %v5549_v22 = vsel %vm4818_vm4, %v3645_v14, 0.0  ;;  %v3647_v46 = vpop.eup %3646  ;;  %v849_v0 = vmul.f32 1.442695, %v824_v52  ;;  %v825_v57 = vsel %vm793_vm3, %v777_v43, %v809_v13  ;;  %v7604_v7 = vld [vmem:[#allocation46_spill] sm:$0xff] }
 0x2aa   :  { %880 = vxpose.xlu0.b32.cont [2/16] %v5531_v38, 128  ;;  %3652 = vpow2.f32 %v847_v27  ;;  %v5555_v1 = vsel %vm4908_vm10, %v3647_v46, 0.0  ;;  %v3649_v58 = vpop.eup %3648  ;;  %vm794_vm4 = vcmp.gt.f32.partialorder %v778_v63, 0.0  ;;  %v851_v47 = vmul.f32 1.442695, %v825_v57  ;;  %v7610_v52 = vld [vmem:[#allocation42_spill] sm:$0xff]  ;;  %v7612_v46 = vld [vmem:[#allocation48_spill] sm:$0xff] }
 0x2ab   :  { %3654 = vpow2.f32 %v849_v0  ;;  %v5561_v20 = vsel %vm4831_vm5, %v3649_v58, 0.0  ;;  %v826_v61 = vsel %vm794_vm4, %v778_v63, %v810_v54  ;;  %vm795_vm10 = vcmp.gt.f32.partialorder %v779_v28, 0.0 }
 0x2ac   :  { %3656 = vpow2.f32 %v851_v47  ;;  %v853_v15 = vmul.f32 1.442695, %v826_v61  ;;  %v827_v6 = vsel %vm795_vm10, %v779_v28, %v811_v18  ;;  %vm796_vm5 = vcmp.gt.f32.partialorder %v780_v21, 0.0 }
 0x2ad   :  { %v855_v44 = vmul.f32 1.442695, %v827_v6  ;;  %v828_v39 = vsel %vm796_vm5, %v780_v21, %v812_v59  ;;  %vm7607_vm14 = vnez %v7606_v5  ;;  %vm7611_vm9 = vnez %v7610_v52 }
 0x2ae   :  { %881 = vxpose.xlu0.b32.cont [3/16] %v5537_v16, 128  ;;  %3658 = vpow2.f32 %v853_v15  ;;  %v857_v24 = vmul.f32 1.442695, %v828_v39  ;;  %vm7613_vm15 = vnez %v7612_v46  ;;  %v5881_v5 = vmov 0.0  }
 0x2af   :  { %3660 = vpow2.f32 %v855_v44 }
 0x2b0   :  { %3662 = vpow2.f32 %v857_v24 }
 0x2b2   :  { %882 = vxpose.xlu0.b32.cont [4/16] %v5543_v26, 128 }
 0x2b3   :  { %v3651_v23 = vpop.eup %3650 }
 0x2b4   :  { %v5567_v17 = vsel %vm4915_vm11, %v3651_v23, 0.0  ;;  %v3653_v50 = vpop.eup %3652  ;;  %vm797_vm11 = vcmp.gt.f32.partialorder %v781_v48, 0.0 }
 0x2b5   :  { %v5573_v19 = vsel %vm4847_vm6, %v3653_v50, 0.0  ;;  %v3655_v40 = vpop.eup %3654  ;;  %v829_v2 = vsel %vm797_vm11, %v781_v48, %v813_v4  ;;  %vm798_vm6 = vcmp.gt.f32.partialorder %v782_v34, 0.0  ;;  %v5887_v48 = vmov 0.0  }
 0x2b6   :  { %883 = vxpose.xlu0.b32.cont [5/16] %v5549_v22, 128  ;;  %v5579_v10 = vsel %vm4925_vm12, %v3655_v40, 0.0  ;;  %v3657_v8 = vpop.eup %3656  ;;  %v859_v29 = vmul.f32 1.442695, %v829_v2  ;;  %v830_v56 = vsel %vm798_vm6, %v782_v34, %v814_v36  ;;  %vm7605_vm12 = vnez %v7604_v7 }
 0x2b7   :  { %v5584_v3 = vsel %vm4866_vm7, %v3657_v8, 0.0  ;;  %v861_v33 = vmul.f32 1.442695, %v830_v56  ;;  %vm7609_vm7 = vnez %v7608_v62  ;;  %v5885_v34 = vmov 0.0  }
 0x2b8   :  { %v3659_v30 = vpop.eup %3658  ;;  %3664 = vpow2.f32 %v859_v29  ;;  %v5883_v29 = vmov 0.0  }
 0x2b9   :  { %v5589_v41 = vsel %vm7605_vm12, %v3659_v30, 0.0  ;;  %v3661_v42 = vpop.eup %3660  ;;  %3666 = vpow2.f32 %v861_v33 }
 0x2ba   :  { %884 = vxpose.xlu0.b32.cont [6/16] %v5555_v1, 128  ;;  %v5594_v43 = vsel %vm7607_vm14, %v3661_v42, 0.0  ;;  %v3663_v14 = vpop.eup %3662 }
 0x2bb   :  { %v5599_v27 = vsel %vm7609_vm7, %v3663_v14, 0.0 }
 0x2be   :  { %885 = vxpose.xlu0.b32.cont [7/16] %v5561_v20, 128 }
 0x2c2   :  { %886 = vxpose.xlu0.b32.cont [8/16] %v5567_v17, 128  ;;  %v3665_v53 = vpop.eup %3664 }
 0x2c3   :  { %v5604_v13 = vsel %vm7611_vm9, %v3665_v53, 0.0  ;;  %v3667_v63 = vpop.eup %3666 }
 0x2c4   :  { %v5609_v25 = vsel %vm7613_vm15, %v3667_v63, 0.0 }
 0x2c6   :  { %887 = vxpose.xlu0.b32.cont [9/16] %v5573_v19, 128 }
 0x2ca   :  { %888 = vxpose.xlu0.b32.cont [10/16] %v5579_v10, 128 }
 0x2ce   :  { %889 = vxpose.xlu0.b32.cont [11/16] %v5584_v3, 128 }
 0x2d2   :  { %890 = vxpose.xlu0.b32.cont [12/16] %v5589_v41, 128 }
 0x2d6   :  { %891 = vxpose.xlu0.b32.cont [13/16] %v5594_v43, 128 }
 0x2da   :  { %892 = vxpose.xlu0.b32.cont [14/16] %v5599_v27, 128 }
 0x2de   :  { %893 = vxpose.xlu0.b32.cont [15/16] %v5604_v13, 128 }
 0x2e2   :  { %894 = vxpose.xlu0.b32.end [16/16] %v5609_v25, 128 }
 0x326   :  { %v895_v0 = vpop.trf.xlu0 }
 0x327   :  { %v911_v12 = vadd.f32 %v895_v0, %v5525_v9  ;;  %v5879_v0 = vmov 0.0  }
 0x329   :  { %v5613_v57 = vmul.f32 0.5, %v911_v12 }
 0x32a   :  { %v896_v54 = vpop.trf.xlu0 }
 0x32b   :  { %7614 = vst [vmem:[#allocation49_spill] sm:$0xff] %v5613_v57  ;;  %vm1499_vm8 = vcmp.ne.f32.partialorder %v5613_v57, 0.0  ;;  %v912_v28 = vadd.f32 %v896_v54, %v5531_v38 }
 0x32c   :  { %v1515_v58 = vsel %vm1499_vm8, %v5613_v57, 1.0 }
 0x32d   :  { %3668 = vrcp.f32 %v1515_v58  ;;  %v5618_v49 = vmul.f32 0.5, %v912_v28  ;;  %v3711_v58 = vld [vmem:[%s7521_s30 + $0x28] sm:$0xff] }
 0x32e   :  { %v897_v47 = vpop.trf.xlu0 }
 0x32f   :  { %7615 = vst [vmem:[#allocation53_spill] sm:$0xff] %v5618_v49  ;;  %vm1500_vm13 = vcmp.ne.f32.partialorder %v5618_v49, 0.0  ;;  %v913_v35 = vadd.f32 %v897_v47, %v5537_v16  ;;  %v1463_v28 = vadd.f32 %v5618_v49, %v5613_v57 }
 0x330   :  { %v1516_v61 = vsel %vm1500_vm13, %v5618_v49, 1.0 }
 0x331   :  { %3670 = vrcp.f32 %v1516_v61  ;;  %v5623_v9 = vmul.f32 0.5, %v913_v35 }
 0x332   :  { %v898_v18 = vpop.trf.xlu0 }
 0x333   :  { %7616 = vst [vmem:[#allocation54_spill] sm:$0xff] %v5623_v9  ;;  %vm1501_vm0 = vcmp.ne.f32.partialorder %v5623_v9, 0.0  ;;  %v914_v38 = vadd.f32 %v898_v18, %v5543_v26  ;;  %v1464_v61 = vadd.f32 %v1463_v28, %v5623_v9 }
 0x334   :  { %v1517_v21 = vsel %vm1501_vm0, %v5623_v9, 1.0 }
 0x335   :  { %3672 = vrcp.f32 %v1517_v21  ;;  %v5628_v23 = vmul.f32 0.5, %v914_v38  ;;  %v5877_v38 = vmov 0.0  }
 0x336   :  { %v899_v55 = vpop.trf.xlu0 }
 0x337   :  { %7617 = vst [vmem:[#allocation55_spill] sm:$0xff] %v5628_v23  ;;  %v3669_v15 = vpop.eup %3668  ;;  %vm1502_vm2 = vcmp.ne.f32.partialorder %v5628_v23, 0.0  ;;  %v915_v16 = vadd.f32 %v899_v55, %v5549_v22  ;;  %v3707_v22 = vld [vmem:[%s7521_s30 + $0x8] sm:$0xff] }
 0x338   :  { %v5635_v6 = vmul.f32 %v3706_v31, %v3669_v15  ;;  %v1518_v59 = vsel %vm1502_vm2, %v5628_v23, 1.0  ;;  %v1465_v15 = vadd.f32 %v1464_v61, %v5628_v23 }
 0x339   :  { %3674 = vrcp.f32 %v1518_v59  ;;  %v5638_v26 = vmul.f32 0.5, %v915_v16  ;;  %v3712_v16 = vld [vmem:[%s7521_s30 + $0x30] sm:$0xff] }
 0x33a   :  { %7618 = vst [vmem:[#allocation56_spill] sm:$0xff] %v5635_v6  ;;  %v900_v50 = vpop.trf.xlu0 }
 0x33b   :  { %7619 = vst [vmem:[#allocation52_spill] sm:$0xff] %v5638_v26  ;;  %v3671_v32 = vpop.eup %3670  ;;  %vm1503_vm1 = vcmp.ne.f32.partialorder %v5638_v26, 0.0  ;;  %v916_v44 = vadd.f32 %v900_v50, %v5555_v1  ;;  %v3708_v1 = vld [vmem:[%s7521_s30 + $0x10] sm:$0xff]  ;;  %v1466_v50 = vadd.f32 %v1465_v15, %v5638_v26  ;;  %v5869_v15 = vmov 0.0  }
 0x33c   :  { %v5646_v45 = vmul.f32 %v3707_v22, %v3671_v32  ;;  %v1519_v39 = vsel %vm1503_vm1, %v5638_v26, 1.0 }
 0x33d   :  { %3676 = vrcp.f32 %v1519_v39  ;;  %v5649_v4 = vmul.f32 0.5, %v916_v44  ;;  %v5875_v44 = vmov 0.0  }
 0x33e   :  { %7620 = vst [vmem:[#allocation51_spill] sm:$0xff] %v5646_v45  ;;  %v901_v40 = vpop.trf.xlu0 }
 0x33f   :  { %7621 = vst [vmem:[#allocation33_spill] sm:$0xff] %v5649_v4  ;;  %v3673_v24 = vpop.eup %3672  ;;  %vm1504_vm3 = vcmp.ne.f32.partialorder %v5649_v4, 0.0  ;;  %v917_v51 = vadd.f32 %v901_v40, %v5561_v20  ;;  %v3709_v20 = vld [vmem:[%s7521_s30 + $0x18] sm:$0xff]  ;;  %v1467_v40 = vadd.f32 %v1466_v50, %v5649_v4  ;;  %v3716_v50 = vld [vmem:[%s7521_s30 + $0x50] sm:$0xff] }
 0x340   :  { %v5657_v2 = vmul.f32 %v3708_v1, %v3673_v24  ;;  %v1520_v36 = vsel %vm1504_vm3, %v5649_v4, 1.0  ;;  %v3713_v24 = vld [vmem:[%s7521_s30 + $0x38] sm:$0xff] }
 0x341   :  { %3678 = vrcp.f32 %v1520_v36  ;;  %v5660_v8 = vmul.f32 0.5, %v917_v51 }
 0x342   :  { %7622 = vst [vmem:[#allocation35_spill] sm:$0xff] %v5657_v2  ;;  %v902_v37 = vpop.trf.xlu0 }
 0x343   :  { %7623 = vst [vmem:[#allocation34_spill] sm:$0xff] %v5660_v8  ;;  %v3675_v56 = vpop.eup %3674  ;;  %vm1505_vm4 = vcmp.ne.f32.partialorder %v5660_v8, 0.0  ;;  %v918_v30 = vadd.f32 %v902_v37, %v5567_v17  ;;  %v3710_v17 = vld [vmem:[%s7521_s30 + $0x20] sm:$0xff]  ;;  %v1468_v36 = vadd.f32 %v1467_v40, %v5660_v8 }
 0x344   :  { %v5668_v33 = vmul.f32 %v3709_v20, %v3675_v56  ;;  %v1521_v7 = vsel %vm1505_vm4, %v5660_v8, 1.0  ;;  %v5873_v56 = vmov 0.0  }
 0x345   :  { %3680 = vrcp.f32 %v1521_v7  ;;  %v5671_v42 = vmul.f32 0.5, %v918_v30 }
 0x346   :  { %7624 = vst [vmem:[#allocation36_spill] sm:$0xff] %v5668_v33  ;;  %v903_v14 = vpop.trf.xlu0 }
 0x347   :  { %7625 = vst [vmem:[#allocation37_spill] sm:$0xff] %v5671_v42  ;;  %v3677_v62 = vpop.eup %3676  ;;  %vm1506_vm10 = vcmp.ne.f32.partialorder %v5671_v42, 0.0  ;;  %v919_v53 = vadd.f32 %v903_v14, %v5573_v19  ;;  %v1469_v7 = vadd.f32 %v1468_v36, %v5671_v42  ;;  %v3714_v14 = vld [vmem:[%s7521_s30 + $0x40] sm:$0xff] }
 0x348   :  { %v5679_v52 = vmul.f32 %v3710_v17, %v3677_v62  ;;  %v1522_v63 = vsel %vm1506_vm10, %v5671_v42, 1.0 }
 0x349   :  { %3682 = vrcp.f32 %v1522_v63  ;;  %v5682_v46 = vmul.f32 0.5, %v919_v53 }
 0x34a   :  { %7626 = vst [vmem:[#allocation43_spill] sm:$0xff] %v5679_v52  ;;  %v904_v12 = vpop.trf.xlu0 }
 0x34b   :  { %7627 = vst [vmem:[#allocation38_spill] sm:$0xff] %v5682_v46  ;;  %v3679_v54 = vpop.eup %3678  ;;  %vm1507_vm5 = vcmp.ne.f32.partialorder %v5682_v46, 0.0  ;;  %v920_v19 = vadd.f32 %v904_v12, %v5579_v10  ;;  %v1470_v17 = vadd.f32 %v1469_v7, %v5682_v46  ;;  %v5871_v12 = vmov 0.0  }
 0x34c   :  { %v5692_v47 = vmul.f32 %v3711_v58, %v3679_v54  ;;  %v1523_v35 = vsel %vm1507_vm5, %v5682_v46, 1.0  ;;  %v3715_v58 = vld [vmem:[%s7521_s30 + $0x48] sm:$0xff] }
 0x34d   :  { %3684 = vrcp.f32 %v1523_v35  ;;  %v5696_v18 = vmul.f32 0.5, %v920_v19 }
 0x34e   :  { %7628 = vst [vmem:[#allocation44_spill] sm:$0xff] %v5692_v47  ;;  %v905_v21 = vpop.trf.xlu0 }
 0x34f   :  { %7629 = vst [vmem:[#allocation39_spill] sm:$0xff] %v5696_v18  ;;  %v3681_v55 = vpop.eup %3680  ;;  %vm1508_vm11 = vcmp.ne.f32.partialorder %v5696_v18, 0.0  ;;  %v921_v10 = vadd.f32 %v905_v21, %v5584_v3  ;;  %v1471_v19 = vadd.f32 %v1470_v17, %v5696_v18  ;;  %v5865_v17 = vmov 0.0  }
 0x350   :  { %v5705_v31 = vmul.f32 %v3712_v16, %v3681_v55  ;;  %v1524_v59 = vsel %vm1508_vm11, %v5696_v18, 1.0 }
 0x351   :  { %3686 = vrcp.f32 %v1524_v59  ;;  %v5709_v32 = vmul.f32 0.5, %v921_v10 }
 0x352   :  { %7630 = vst [vmem:[#allocation45_spill] sm:$0xff] %v5705_v31  ;;  %v906_v22 = vpop.trf.xlu0 }
 0x353   :  { %7631 = vst [vmem:[#allocation40_spill] sm:$0xff] %v5709_v32  ;;  %v3683_v39 = vpop.eup %3682  ;;  %vm1509_vm6 = vcmp.ne.f32.partialorder %v5709_v32, 0.0  ;;  %v922_v3 = vadd.f32 %v906_v22, %v5589_v41  ;;  %v1472_v21 = vadd.f32 %v1471_v19, %v5709_v32 }
 0x354   :  { %v5718_v51 = vmul.f32 %v3713_v24, %v3683_v39  ;;  %v1525_v1 = vsel %vm1509_vm6, %v5709_v32, 1.0  ;;  %v5867_v24 = vmov 0.0  }
 0x355   :  { %3688 = vrcp.f32 %v1525_v1  ;;  %v5722_v37 = vmul.f32 0.5, %v922_v3 }
 0x356   :  { %7632 = vst [vmem:[#allocation46_spill] sm:$0xff] %v5718_v51  ;;  %v907_v30 = vpop.trf.xlu0 }
 0x357   :  { %7633 = vst [vmem:[#allocation41_spill] sm:$0xff] %v5722_v37  ;;  %v3685_v20 = vpop.eup %3684  ;;  %vm1510_vm12 = vcmp.ne.f32.partialorder %v5722_v37, 0.0  ;;  %v923_v41 = vadd.f32 %v907_v30, %v5594_v43  ;;  %v1473_v59 = vadd.f32 %v1472_v21, %v5722_v37 }
 0x358   :  { %v5731_v62 = vmul.f32 %v3714_v14, %v3685_v20  ;;  %v1526_v53 = vsel %vm1510_vm12, %v5722_v37, 1.0  ;;  %v3717_v20 = vld [vmem:[%s7521_s30 + $0x58] sm:$0xff] }
 0x359   :  { %3690 = vrcp.f32 %v1526_v53  ;;  %v5735_v63 = vmul.f32 0.5, %v923_v41 }
 0x35a   :  { %7634 = vst [vmem:[#allocation47_spill] sm:$0xff] %v5731_v62  ;;  %v908_v54 = vpop.trf.xlu0 }
 0x35b   :  { %7635 = vst [vmem:[#allocation42_spill] sm:$0xff] %v5735_v63  ;;  %v3687_v28 = vpop.eup %3686  ;;  %vm1511_vm14 = vcmp.ne.f32.partialorder %v5735_v63, 0.0  ;;  %v924_v43 = vadd.f32 %v908_v54, %v5599_v27  ;;  %v1474_v40 = vadd.f32 %v1473_v59, %v5735_v63 }
 0x35c   :  { %v5744_v35 = vmul.f32 %v3715_v58, %v3687_v28  ;;  %v1527_v61 = vsel %vm1511_vm14, %v5735_v63, 1.0  ;;  %v5907_v63 = vmov 0.0  }
 0x35d   :  { %3692 = vrcp.f32 %v1527_v61  ;;  %v5748_v55 = vmul.f32 0.5, %v924_v43  ;;  %v5863_v61 = vmov 0.0  }
 0x35e   :  { %7636 = vst [vmem:[#allocation48_spill] sm:$0xff] %v5744_v35  ;;  %v909_v10 = vpop.trf.xlu0 }
 0x35f   :  { %7637 = vst [vmem:[#allocation57_spill] sm:$0xff] %v5748_v55  ;;  %v3689_v16 = vpop.eup %3688  ;;  %vm1512_vm7 = vcmp.ne.f32.partialorder %v5748_v55, 0.0  ;;  %v925_v27 = vadd.f32 %v909_v10, %v5604_v13  ;;  %v1475_v30 = vadd.f32 %v1474_v40, %v5748_v55 }
 0x360   :  { %v5757_v22 = vmul.f32 %v3716_v50, %v3689_v16  ;;  %v1528_v39 = vsel %vm1512_vm7, %v5748_v55, 1.0  ;;  %v3719_v16 = vld [vmem:[%s7521_s30 + $0x68] sm:$0xff]  ;;  %v1336_v50 = vpop.permute.xlu1 %1335  ;;  %v5905_v55 = vmov 0.0  }
 0x361   :  { %3694 = vrcp.f32 %v1528_v39  ;;  %v5761_v3 = vmul.f32 0.5, %v925_v27  ;;  %v5861_v39 = vmov 0.0  }
 0x362   :  { %7638 = vst [vmem:[#allocation58_spill] sm:$0xff] %v5757_v22  ;;  %v910_v1 = vpop.trf.xlu0 }
 0x363   :  { %7639 = vst [vmem:[#allocation59_spill] sm:$0xff] %v5761_v3  ;;  %v3691_v36 = vpop.eup %3690  ;;  %vm1513_vm9 = vcmp.ne.f32.partialorder %v5761_v3, 0.0  ;;  %v926_v13 = vadd.f32 %v910_v1, %v5609_v25  ;;  %v1476_v14 = vadd.f32 %v1475_v30, %v5761_v3  ;;  %v3718_v25 = vld [vmem:[%s7521_s30 + $0x60] sm:$0xff]  ;;  %v3720_v30 = vld [vmem:[%s7521_s30 + $0x70] sm:$0xff] }
 0x364   :  { %v5770_v7 = vmul.f32 %v3717_v20, %v3691_v36  ;;  %v1529_v41 = vsel %vm1513_vm9, %v5761_v3, 1.0  ;;  %v5903_v3 = vmov 0.0  }
 0x365   :  { %3696 = vrcp.f32 %v1529_v41  ;;  %v5774_v53 = vmul.f32 0.5, %v926_v13  ;;  %v1341_v41 = vrot.slane %v1336_v50, %v7591_v11  ;;  %v5811_v11 = vld [vmem:[%s7647_s6] sm:$0x1] }
 0x366   :  { %7640 = vst [vmem:[#allocation60_spill] sm:$0xff] %v5770_v7  ;;  %7648 = vst [vmem:[#allocation67_spill] sm:$0xff] %v5811_v11  ;;  %vm1493_vm2 = vcmp.gt.f32.partialorder %v5811_v11, 0.0  ;;  %v5893_v11 = vmov 0.0  }
 0x367   :  { %7641 = vst [vmem:[#allocation61_spill] sm:$0xff] %v5774_v53  ;;  %v3693_v54 = vpop.eup %3692  ;;  %v1477_v28 = vadd.f32 %v1476_v14, %v5774_v53  ;;  %vm1514_vm15 = vcmp.ne.f32.partialorder %v5774_v53, 0.0 }
 0x368   :  { %v5782_v19 = vmul.f32 %v3718_v25, %v3693_v54  ;;  %v1530_v43 = vsel %vm1514_vm15, %v5774_v53, 1.0  ;;  %v5901_v53 = vmov 0.0  }
 0x369   :  { %v1478_v58 = vrot.slane %v1477_v28, 4  ;;  %3698 = vrcp.f32 %v1530_v43 }
 0x36a   :  { %7642 = vst [vmem:[#allocation62_spill] sm:$0xff] %v5782_v19 }
 0x36b   :  { %v3695_v21 = vpop.eup %3694  ;;  %v1479_v10 = vadd.f32 %v1478_v58, %v1477_v28  ;;  %v3721_v58 = vld [vmem:[%s7521_s30 + $0x78] sm:$0xff] }
 0x36c   :  { %v5789_v59 = vmul.f32 %v3719_v16, %v3695_v21 }
 0x36d   :  { %v1480_v27 = vrot.slane %v1479_v10, 2 }
 0x36e   :  { %7643 = vst [vmem:[#allocation63_spill] sm:$0xff] %v5789_v59  ;;  %v1459_v1 = vpop.f32.mrb[16].mxu1 }
 0x36f   :  { %v3697_v40 = vpop.eup %3696  ;;  %v1481_v36 = vadd.f32 %v1480_v27, %v1479_v10  ;;  %v3232_v20 = vpop.f32.mrb[17].mxu1  ;;  %v5799_v25 = vadd.f32 %v1459_v1, %v1341_v41 }
 0x370   :  { %v5795_v13 = vmul.f32 %v3720_v30, %v3697_v40  ;;  %v150_v20 = vld [vmem:[%s7650_s26] sm:$0x1] }
 0x371   :  { %v1482_v14 = vrot.slane %v1481_v36, 1  ;;  %7645 = vst [vmem:[#allocation65_spill] sm:$0xff] %v5799_v25 }
 0x372   :  { %7644 = vst [vmem:[#allocation64_spill] sm:$0xff] %v5795_v13 }
 0x373   :  { %v3699_v28 = vpop.eup %3698  ;;  %v1483_v43 = vadd.f32 %v1482_v14, %v1481_v36 }
 0x374   :  { %v5804_v21 = vmul.f32 %v3721_v58, %v3699_v28 }
 0x375   :  { %v1484_v10 = vadd.f32 %v1483_v43, %v5799_v25  ;;  %v5891_v25 = vmov 0.0  }
 0x376   :  { %7646 = vst [vmem:[#allocation66_spill] sm:$0xff] %v5804_v21 }
 0x377   :  { %vm1485_vm8 = vcmp.gt.f32.partialorder %v1484_v10, 0.0  ;;  %vm1486_vm13 = vcmp.lt.f32.partialorder %v1484_v10, 0.0  ;;  %v1489_v27 = vand.u32 2147483647, %v1484_v10 }
 0x378   :  { %v1487_v50 = vsel %vm1486_vm13, -1.0, %v7589_v60 }
 0x379   :  { %v1488_v40 = vsel %vm1485_vm8, 1.0, %v1487_v50  ;;  %vm1490_vm0 = vcmp.gt.f32.partialorder %v1489_v27, 0.1 }
 0x37a   :  { %v1491_v1 = vsel %vm1490_vm0, %v1489_v27, 0.1 }
 0x37b   :  { %v1492_v36 = vmul.f32 %v1491_v1, %v1488_v40 }
 0x37d   :  { %v5815_v30 = vsel %vm1493_vm2, %v1492_v36, 1.0 }
 0x37e   :  { %7649 = vst [vmem:[#allocation68_spill] sm:$0xff] %v5815_v30  ;;  %3700 = vrcp.f32 %v5815_v30  ;;  %v5889_v30 = vmov 0.0  }
 0x388   :  { %v5821_v41 = vpop.eup %3700 }
 0x389   :  { %7651 = vst [vmem:[#allocation69_spill] sm:$0xff] %v5821_v41  ;;  %v5824_v14 = vmul.f32 %v5821_v41, %v150_v20   ;;  %v5899_v41 = vmov 0.0  }
 0x38b   :  { %7652 = vst [vmem:[#allocation70_spill] sm:$0xff] %v5824_v14  ;;  %v5827_v60 = vsub.f32 0.0, %v5824_v14  }
 0x38d   :  { %7653 = vst [vmem:[#allocation71_spill] sm:$0xff] %v5827_v60  ;;  %v1580_v28 = vsub.f32 %v5827_v60, %v5824_v14  ;;  %v1579_v1 = vmax.f32 %v5827_v60, %v5824_v14 }
 0x38f   :  { %v1581_v43 = vand.u32 2147483647, %v1580_v28  ;;  %v7654_v28 = vmov %v5824_v14 }
 0x391   :  { %v1582_v58 = vsub.f32 0.0, %v1581_v43  ;;  %v7655_v43 = vmov %v5827_v60 }
 0x393   :  { %v1583_v10 = vmul.f32 1.442695, %v1582_v58  ;;  %v5845_v58 = vmov 0.0  }
 0x395   :  { %3702 = vpow2.f32 %v1583_v10  ;;  %v5847_v10 = vmov 0.0  }
 0x39f   :  { %v3703_v27 = vpop.eup %3702 }
 0x3a0   :  { %v1585_v50 = vadd.f32 1.0, %v3703_v27  ;;  %v5849_v27 = vmov 0.0  }
 0x3a2   :  { %3704 = vlog2.f32 %v1585_v50  ;;  %v5851_v50 = vmov 0.0  }
 0x3ac   :  { %v3705_v40 = vpop.eup %3704 }
 0x3ad   :  { %v1587_v36 = vmul.f32 0.6931472, %v3705_v40  ;;  %v5853_v40 = vmov 0.0  }
 0x3af   :  { %v1588_v20 = vadd.f32 %v1587_v36, %v1579_v1  ;;  %v5855_v1 = vmov 0.0   ;;  %v5857_v36 = vmov 0.0  }
 0x3b1   :  { %v1589_v16 = vsub.f32 %v5827_v60, %v1588_v20   ;;  %v1590_v54 = vsub.f32 %v5824_v14, %v1588_v20   ;;  %v5859_v20 = vmov 0.0   ;;  %v5895_v14 = vmov 0.0  }
 0x3b2   :  { %v5897_v60 = vmov 0.0  }
 0x3b3 LB: > { %v7656_v57 = vld [vmem:[#allocation49_spill] sm:$0xff]  ;;  %v7658_v9 = vld [vmem:[#allocation54_spill] sm:$0xff]  ;;  %v7659_v23 = vld [vmem:[#allocation55_spill] sm:$0xff]  ;;  %7678 = vst [vmem:[#allocation72_spill] sm:$0xff] %v4432_v54  ;;  %s2123_s29 = ssub.s32 0, %s4576_s0  ;;  %p2122_p12 = scmp.lt.s32.totalorder %s4576_s0, 0  ;;  %v4516_v0 = vphi %v5879_v0, %v7818_v0   ;;  %v4512_v38 = vphi %v5877_v38, %v7816_v38   ;;  %v4508_v44 = vphi %v5875_v44, %v7814_v44   ;;  %v4504_v56 = vphi %v5873_v56, %v7813_v56   ;;  %v4500_v12 = vphi %v5871_v12, %v7812_v12   ;;  %v4496_v15 = vphi %v5869_v15, %v7811_v15   ;;  %v4492_v24 = vphi %v5867_v24, %v7810_v24   ;;  %v4488_v17 = vphi %v5865_v17, %v7809_v17   ;;  %v4484_v61 = vphi %v5863_v61, %v7808_v61   ;;  %v4480_v39 = vphi %v5861_v39, %v7807_v39   ;;  %v4476_v20 = vphi %v5859_v20, %v7806_v20   ;;  %v4472_v36 = vphi %v5857_v36, %v7805_v36   ;;  %v4468_v1 = vphi %v5855_v1, %v7804_v1   ;;  %v4464_v40 = vphi %v5853_v40, %v7803_v40   ;;  %v4460_v50 = vphi %v5851_v50, %v7802_v50   ;;  %v4456_v27 = vphi %v5849_v27, %v7800_v27   ;;  %v4452_v10 = vphi %v5847_v10, %v7798_v10   ;;  %v4448_v58 = vphi %v5845_v58, %v7796_v58   ;;  %v4444_v43 = vphi %v7655_v43, %v2107_v43   ;;  %v4440_v28 = vphi %v7654_v28, %v2109_v28   ;;  %v4436_v16 = vphi %v1589_v16, %v7794_v16   ;;  %v4432_v54 = vphi %v1590_v54, %v7793_v54   ;;  %s4576_s0 = sphi %s5909_s0, %s7835_s0   ;;  %v4572_v63 = vphi %v5907_v63, %v7834_v63   ;;  %v4568_v55 = vphi %v5905_v55, %v7833_v55   ;;  %v4564_v3 = vphi %v5903_v3, %v7832_v3   ;;  %v4560_v53 = vphi %v5901_v53, %v7831_v53   ;;  %v4556_v41 = vphi %v5899_v41, %v7830_v41   ;;  %v4552_v60 = vphi %v5897_v60, %v7829_v60   ;;  %v4548_v14 = vphi %v5895_v14, %v7828_v14   ;;  %v4544_v11 = vphi %v5893_v11, %v7827_v11   ;;  %v4540_v25 = vphi %v5891_v25, %v7826_v25   ;;  %v4536_v30 = vphi %v5889_v30, %v7825_v30   ;;  %v4532_v48 = vphi %v5887_v48, %v7824_v48   ;;  %v4528_v34 = vphi %v5885_v34, %v7823_v34   ;;  %v4524_v29 = vphi %v5883_v29, %v7822_v29   ;;  %v4520_v5 = vphi %v5881_v5, %v7820_v5  }
 0x3b4   : > { %v7657_v49 = vld [vmem:[#allocation53_spill] sm:$0xff]  ;;  %v7660_v26 = vld [vmem:[#allocation52_spill] sm:$0xff]  ;;  %v7662_v21 = vld [vmem:[#allocation66_spill] sm:$0xff]  ;;  %7679 = vst [vmem:[#allocation73_spill] sm:$0xff] %v4436_v16  ;;  %s3074_s1 = smin.u32 %s4576_s0, %s2123_s29  ;;  %p2135_p1 = scmp.eq.s32.totalorder %s4576_s0, 9 }
 0x3b5   : > { %v7661_v4 = vld [vmem:[#allocation33_spill] sm:$0xff]  ;;  %v7663_v13 = vld [vmem:[#allocation64_spill] sm:$0xff]  ;;  %v7665_v45 = vld [vmem:[#allocation51_spill] sm:$0xff]  ;;  %s2125_s10 = sand.u32 1, %s3074_s1   ;;  %s4578_s7 = smov 0  }
 0x3b6   : > { %v7664_v6 = vld [vmem:[#allocation56_spill] sm:$0xff]  ;;  %v7666_v2 = vld [vmem:[#allocation35_spill] sm:$0xff]  ;;  %v7669_v19 = vld [vmem:[#allocation62_spill] sm:$0xff]  ;;  %s2126_s3 = ssub.s32 0, %s2125_s10 }
 0x3b7   : > { %v7667_v33 = vld [vmem:[#allocation36_spill] sm:$0xff]  ;;  %v7670_v59 = vld [vmem:[#allocation63_spill] sm:$0xff]  ;;  %v7673_v31 = vld [vmem:[#allocation45_spill] sm:$0xff]  ;;  %s7899_s3 = smov (!%p2122_p12, %s2126_s3), %s2125_s10 }
 0x3b8   : > { %v7668_v7 = vld [vmem:[#allocation60_spill] sm:$0xff]  ;;  %v7671_v52 = vld [vmem:[#allocation43_spill] sm:$0xff]  ;;  %v7674_v51 = vld [vmem:[#allocation46_spill] sm:$0xff]  ;;  %p3076_p13 = scmp.lt.s32.totalorder %s7899_s3, 0  ;;  %s2132_s11 = sadd.s32 2, %s7899_s3 }
 0x3b9   : > { %v7672_v47 = vld [vmem:[#allocation44_spill] sm:$0xff]  ;;  %v7675_v62 = vld [vmem:[#allocation47_spill] sm:$0xff]  ;;  %v7677_v22 = vld [vmem:[#allocation58_spill] sm:$0xff] }
 0x3ba   : > { %v7676_v35 = vld [vmem:[#allocation48_spill] sm:$0xff]  ;;  %v7680_v54 = vld [vmem:[#allocation50_spill] sm:$0xff]  ;;  %s7901_s11 = smov (!%p3076_p13, %s2132_s11), %s7899_s3 }
 0x3bb   : > { %v5979_v16 = vrot.slane %v4444_v43, %v7680_v54  ;;  %v5982_v37 = vrot.slane %v4440_v28, %v7680_v54  ;;  %p2134_p0 = scmp.eq.s32.totalorder %s7901_s11, 1 }
 0x3bd   : > { %v1642_v32 = vsub.f32 %v4572_v63, %v5979_v16  ;;  %v1696_v18 = vsub.f32 %v4508_v44, %v5982_v37  ;;  %v1643_v46 = vsub.f32 %v4568_v55, %v5979_v16  ;;  %v1697_v42 = vsub.f32 %v4504_v56, %v5982_v37  ;;  %p6164_p2 = por %p2135_p1, %p2134_p0 }
 0x3be   : > { %v1644_v8 = vsub.f32 %v4564_v3, %v5979_v16  ;;  %v1698_v43 = vsub.f32 %v4500_v12, %v5982_v37  ;;  %v1645_v54 = vsub.f32 %v4560_v53, %v5979_v16  ;;  %v1699_v63 = vsub.f32 %v4496_v15, %v5982_v37 }
 0x3bf   : > { %1658 = vxpose.xlu0.b32.start [1/16] %v1642_v32, 128  ;;  %1712 = vxpose.xlu1.b32.start [1/16] %v1696_v18, 128  ;;  %v1646_v18 = vsub.f32 %v4556_v41, %v5979_v16  ;;  %v1700_v32 = vsub.f32 %v4492_v24, %v5982_v37  ;;  %v1702_v44 = vsub.f32 %v4484_v61, %v5982_v37  ;;  %vm2146_vm1 = vcmask (%p6164_p2), 1040384  }
 0x3c0   : > { %v1649_v56 = vsub.f32 %v4544_v11, %v5979_v16  ;;  %v1703_v12 = vsub.f32 %v4480_v39, %v5982_v37  ;;  %v1650_v55 = vsub.f32 %v4540_v25, %v5979_v16  ;;  %v1704_v15 = vsub.f32 %v4476_v20, %v5982_v37 }
 0x3c1   : > { %v1651_v3 = vsub.f32 %v4536_v30, %v5979_v16  ;;  %v1705_v24 = vsub.f32 %v4472_v36, %v5982_v37  ;;  %v1652_v53 = vsub.f32 %v4532_v48, %v5979_v16  ;;  %v1653_v61 = vsub.f32 %v4528_v34, %v5979_v16 }
 0x3c2   : > { %v1707_v39 = vsub.f32 %v4464_v40, %v5982_v37  ;;  %v1654_v25 = vsub.f32 %v4524_v29, %v5979_v16  ;;  %v1708_v11 = vsub.f32 %v4460_v50, %v5982_v37  ;;  %v1655_v48 = vsub.f32 %v4520_v5, %v5979_v16 }
 0x3c3   : > { %1659 = vxpose.xlu0.b32.cont [2/16] %v1643_v46, 128  ;;  %1713 = vxpose.xlu1.b32.cont [2/16] %v1697_v42, 128  ;;  %v1647_v42 = vsub.f32 %v4552_v60, %v5979_v16  ;;  %v1701_v46 = vsub.f32 %v4488_v17, %v5982_v37  ;;  %v1706_v17 = vsub.f32 %v4468_v1, %v5982_v37 }
 0x3c4   : > { %v1709_v30 = vsub.f32 %v4456_v27, %v5982_v37  ;;  %v1656_v34 = vsub.f32 %v4516_v0, %v5979_v16  ;;  %v1710_v41 = vsub.f32 %v4452_v10, %v5982_v37  ;;  %v1657_v29 = vsub.f32 %v4512_v38, %v5979_v16 }
 0x3c5   : > { %v7681_v27 = vsub.f32 0.0, %v7664_v6 }
 0x3c7   : > { %1660 = vxpose.xlu0.b32.cont [3/16] %v1644_v8, 128  ;;  %1714 = vxpose.xlu1.b32.cont [3/16] %v1698_v43, 128  ;;  %v1648_v8 = vsub.f32 %v4548_v14, %v5979_v16  ;;  %v1711_v14 = vsub.f32 %v4448_v58, %v5982_v37  ;;  %v7682_v50 = vmov %v7681_v27 }
 0x3cb   : > { %1661 = vxpose.xlu0.b32.cont [4/16] %v1645_v54, 128  ;;  %1715 = vxpose.xlu1.b32.cont [4/16] %v1699_v63, 128  ;;  %v7683_v54 = vsub.f32 0.0, %v7665_v45 }
 0x3cf   : > { %1662 = vxpose.xlu0.b32.cont [5/16] %v1646_v18, 128  ;;  %1716 = vxpose.xlu1.b32.cont [5/16] %v1700_v32, 128  ;;  %v7684_v18 = vmov %v7683_v54 }
 0x3d3   : > { %1663 = vxpose.xlu0.b32.cont [6/16] %v1647_v42, 128  ;;  %1717 = vxpose.xlu1.b32.cont [6/16] %v1701_v46, 128 }
 0x3d7   : > { %1664 = vxpose.xlu0.b32.cont [7/16] %v1648_v8, 128  ;;  %1718 = vxpose.xlu1.b32.cont [7/16] %v1702_v44, 128 }
 0x3db   : > { %1665 = vxpose.xlu0.b32.cont [8/16] %v1649_v56, 128  ;;  %1719 = vxpose.xlu1.b32.cont [8/16] %v1703_v12, 128  ;;  %v7685_v56 = vsub.f32 0.0, %v7666_v2 }
 0x3df   : > { %1666 = vxpose.xlu0.b32.cont [9/16] %v1650_v55, 128  ;;  %1720 = vxpose.xlu1.b32.cont [9/16] %v1704_v15, 128  ;;  %v7686_v55 = vmov %v7685_v56 }
 0x3e3   : > { %1667 = vxpose.xlu0.b32.cont [10/16] %v1651_v3, 128  ;;  %1721 = vxpose.xlu1.b32.cont [10/16] %v1705_v24, 128 }
 0x3e7   : > { %1668 = vxpose.xlu0.b32.cont [11/16] %v1652_v53, 128  ;;  %1722 = vxpose.xlu1.b32.cont [11/16] %v1706_v17, 128 }
 0x3eb   : > { %1669 = vxpose.xlu0.b32.cont [12/16] %v1653_v61, 128  ;;  %1723 = vxpose.xlu1.b32.cont [12/16] %v1707_v39, 128 }
 0x3ef   : > { %1670 = vxpose.xlu0.b32.cont [13/16] %v1654_v25, 128  ;;  %1724 = vxpose.xlu1.b32.cont [13/16] %v1708_v11, 128 }
 0x3f3   : > { %1671 = vxpose.xlu0.b32.cont [14/16] %v1655_v48, 128  ;;  %1725 = vxpose.xlu1.b32.cont [14/16] %v1709_v30, 128 }
 0x3f7   : > { %1672 = vxpose.xlu0.b32.cont [15/16] %v1656_v34, 128  ;;  %1726 = vxpose.xlu1.b32.cont [15/16] %v1710_v41, 128 }
 0x3fb   : > { %1673 = vxpose.xlu0.b32.end [16/16] %v1657_v29, 128  ;;  %1727 = vxpose.xlu1.b32.end [16/16] %v1711_v14, 128 }
 0x43f   : > { %v1674_v5 = vpop.trf.xlu0  ;;  %v1728_v60 = vpop.trf.xlu1 }
 0x440   : > { %v1744_v28 = vsub.f32 %v7664_v6, %v1674_v5  ;;  %v1792_v0 = vsub.f32 %v7681_v27, %v1674_v5  ;;  %v1760_v10 = vsub.f32 %v7682_v50, %v1728_v60  ;;  %v1808_v40 = vsub.f32 %v7664_v6, %v1728_v60 }
 0x441   : > { %v7687_v5 = vsub.f32 0.0, %v7667_v33 }
 0x442   : > { %v6034_v38 = vmax.f32 %v1744_v28, %v1760_v10  ;;  %v6036_v16 = vmax.f32 %v1792_v0, %v1808_v40  ;;  %v7689_v10 = vsub.f32 0.0, %v7671_v52 }
 0x443   : > { %v1675_v1 = vpop.trf.xlu0  ;;  %v1729_v36 = vpop.trf.xlu1  ;;  %v7688_v28 = vmov %v7687_v5 }
 0x444   : > { %v1856_v20 = vsub.f32 %v6034_v38, %v6036_v16  ;;  %v1745_v43 = vsub.f32 %v7665_v45, %v1675_v1  ;;  %v1793_v63 = vsub.f32 %v7683_v54, %v1675_v1  ;;  %v1761_v32 = vsub.f32 %v7684_v18, %v1729_v36 }
 0x445   : > { %v1809_v42 = vsub.f32 %v7665_v45, %v1729_v36  ;;  %v7690_v1 = vmov %v7689_v10 }
 0x446   : > { %v1872_v24 = vand.u32 2147483647, %v1856_v20  ;;  %v6052_v53 = vmax.f32 %v1745_v43, %v1761_v32 }
 0x447   : > { %v1676_v37 = vpop.trf.xlu0  ;;  %v1730_v58 = vpop.trf.xlu1  ;;  %v6054_v17 = vmax.f32 %v1793_v63, %v1809_v42 }
 0x448   : > { %v1746_v44 = vsub.f32 %v7666_v2, %v1676_v37  ;;  %v1794_v12 = vsub.f32 %v7685_v56, %v1676_v37  ;;  %v1762_v15 = vsub.f32 %v7686_v55, %v1730_v58  ;;  %v1810_v3 = vsub.f32 %v7666_v2, %v1730_v58 }
 0x449   : > { %v1888_v48 = vsub.f32 0.0, %v1872_v24  ;;  %v1857_v30 = vsub.f32 %v6052_v53, %v6054_v17 }
 0x44a   : > { %v6056_v25 = vmax.f32 %v1746_v44, %v1762_v15  ;;  %v6058_v11 = vmax.f32 %v1794_v12, %v1810_v3  ;;  %v7691_v44 = vsub.f32 0.0, %v7672_v47 }
 0x44b   : > { %v1677_v46 = vpop.trf.xlu0  ;;  %v1731_v8 = vpop.trf.xlu1  ;;  %v1904_v58 = vmul.f32 1.442695, %v1888_v48  ;;  %v1873_v54 = vand.u32 2147483647, %v1857_v30 }
 0x44c   : > { %v1747_v34 = vsub.f32 %v7667_v33, %v1677_v46  ;;  %v1858_v14 = vsub.f32 %v6056_v25, %v6058_v11  ;;  %v1795_v60 = vsub.f32 %v7687_v5, %v1677_v46  ;;  %v1763_v27 = vsub.f32 %v7688_v28, %v1731_v8 }
 0x44d   : > { %v1811_v0 = vsub.f32 %v7667_v33, %v1731_v8  ;;  %v7692_v12 = vmov %v7691_v44  ;;  %3722 = vpow2.f32 %v1904_v58  ;;  %v7693_v5 = vsub.f32 0.0, %v7673_v31 }
 0x44e   : > { %v6076_v63 = vmax.f32 %v1747_v34, %v1763_v27  ;;  %v1874_v18 = vand.u32 2147483647, %v1858_v14 }
 0x44f   : > { %v1678_v61 = vpop.trf.xlu0  ;;  %v1732_v39 = vpop.trf.xlu1  ;;  %v6078_v32 = vmax.f32 %v1795_v60, %v1811_v0  ;;  %v7694_v60 = vmov %v7693_v5 }
 0x450   : > { %v1748_v50 = vsub.f32 %v7671_v52, %v1678_v61  ;;  %v1796_v40 = vsub.f32 %v7689_v10, %v1678_v61  ;;  %v1764_v36 = vsub.f32 %v7690_v1, %v1732_v39  ;;  %v1812_v37 = vsub.f32 %v7671_v52, %v1732_v39 }
 0x451   : > { %v1889_v61 = vsub.f32 0.0, %v1873_v54  ;;  %v1890_v39 = vsub.f32 0.0, %v1874_v18  ;;  %v1859_v48 = vsub.f32 %v6076_v63, %v6078_v32 }
 0x452   : > { %v6080_v42 = vmax.f32 %v1748_v50, %v1764_v36  ;;  %v6082_v46 = vmax.f32 %v1796_v40, %v1812_v37  ;;  %v7695_v40 = vsub.f32 0.0, %v7674_v51 }
 0x453   : > { %v1679_v41 = vpop.trf.xlu0  ;;  %v1733_v29 = vpop.trf.xlu1  ;;  %v1906_v54 = vmul.f32 1.442695, %v1889_v61  ;;  %v1875_v18 = vand.u32 2147483647, %v1859_v48 }
 0x454   : > { %v1749_v8 = vsub.f32 %v7672_v47, %v1679_v41  ;;  %v1797_v56 = vsub.f32 %v7691_v44, %v1679_v41  ;;  %v1765_v55 = vsub.f32 %v7692_v12, %v1733_v29  ;;  %v1813_v15 = vsub.f32 %v7672_v47, %v1733_v29 }
 0x455   : > { %v1860_v30 = vsub.f32 %v6080_v42, %v6082_v46  ;;  %v7696_v36 = vmov %v7695_v40  ;;  %3724 = vpow2.f32 %v1906_v54 }
 0x456   : > { %v6094_v34 = vmax.f32 %v1749_v8, %v1765_v55  ;;  %v6096_v14 = vmax.f32 %v1797_v56, %v1813_v15  ;;  %v1908_v8 = vmul.f32 1.442695, %v1890_v39 }
 0x457   : > { %v1680_v20 = vpop.trf.xlu0  ;;  %v1734_v43 = vpop.trf.xlu1 }
 0x458   : > { %v1750_v41 = vsub.f32 %v7673_v31, %v1680_v20  ;;  %v1798_v29 = vsub.f32 %v7693_v5, %v1680_v20  ;;  %v1766_v28 = vsub.f32 %v7694_v60, %v1734_v43  ;;  %v1814_v27 = vsub.f32 %v7673_v31, %v1734_v43  ;;  %v3723_v39 = vpop.eup %3722 }
 0x459   : > { %v1861_v20 = vsub.f32 %v6094_v34, %v6096_v14  ;;  %v1876_v43 = vand.u32 2147483647, %v1860_v30  ;;  %v7699_v60 = vsub.f32 0.0, %v7676_v35  ;;  %3726 = vpow2.f32 %v1908_v8 }
 0x45a   : > { %v6112_v44 = vmax.f32 %v1750_v41, %v1766_v28  ;;  %v6114_v56 = vmax.f32 %v1798_v29, %v1814_v27  ;;  %v1891_v27 = vsub.f32 0.0, %v1875_v18 }
 0x45b   : > { %v1681_v3 = vpop.trf.xlu0  ;;  %v1735_v24 = vpop.trf.xlu1  ;;  %v1892_v18 = vsub.f32 0.0, %v1876_v43  ;;  %v7701_v43 = vsub.f32 0.0, %v7677_v22 }
 0x45c   : > { %v1751_v10 = vsub.f32 %v7674_v51, %v1681_v3  ;;  %v1799_v1 = vsub.f32 %v7695_v40, %v1681_v3  ;;  %v1767_v37 = vsub.f32 %v7696_v36, %v1735_v24  ;;  %v1815_v58 = vsub.f32 %v7674_v51, %v1735_v24 }
 0x45d   : > { %v7697_v3 = vsub.f32 0.0, %v7675_v62  ;;  %v1877_v40 = vand.u32 2147483647, %v1861_v20  ;;  %v1912_v8 = vmul.f32 1.442695, %v1892_v18 }
 0x45e   : > { %v6122_v30 = vmax.f32 %v1751_v10, %v1767_v37  ;;  %v6124_v41 = vmax.f32 %v1799_v1, %v1815_v58  ;;  %v1936_v1 = vadd.f32 1.0, %v3723_v39 }
 0x45f   : > { %v1682_v0 = vpop.trf.xlu0  ;;  %v1736_v50 = vpop.trf.xlu1  ;;  %v7698_v61 = vmov %v7697_v3 }
 0x460   : > { %v1752_v15 = vsub.f32 %v7675_v62, %v1682_v0  ;;  %v1800_v24 = vsub.f32 %v7697_v3, %v1682_v0  ;;  %v1768_v48 = vsub.f32 %v7698_v61, %v1736_v50  ;;  %v1816_v5 = vsub.f32 %v7675_v62, %v1736_v50 }
 0x461   : > { %v7700_v0 = vmov %v7699_v60  ;;  %v1862_v50 = vsub.f32 %v6112_v44, %v6114_v56  ;;  %v1863_v20 = vsub.f32 %v6122_v30, %v6124_v41  ;;  %3728 = vlog2.f32 %v1936_v1 }
 0x462   : > { %v6137_v37 = vmax.f32 %v1752_v15, %v1768_v48  ;;  %v6139_v58 = vmax.f32 %v1800_v24, %v1816_v5  ;;  %v7702_v5 = vmov %v7701_v43 }
 0x463   : > { %v1683_v12 = vpop.trf.xlu0  ;;  %v1737_v55 = vpop.trf.xlu1  ;;  %v1878_v15 = vand.u32 2147483647, %v1862_v50 }
 0x464   : > { %v1753_v29 = vsub.f32 %v7676_v35, %v1683_v12  ;;  %v1801_v28 = vsub.f32 %v7699_v60, %v1683_v12  ;;  %v1769_v36 = vsub.f32 %v7700_v0, %v1737_v55  ;;  %v1817_v3 = vsub.f32 %v7676_v35, %v1737_v55 }
 0x465   : > { %v1910_v60 = vmul.f32 1.442695, %v1891_v27  ;;  %v1893_v0 = vsub.f32 0.0, %v1877_v40  ;;  %v1864_v24 = vsub.f32 %v6137_v37, %v6139_v58  ;;  %v1894_v50 = vsub.f32 0.0, %v1878_v15 }
 0x466   : > { %v6143_v12 = vmax.f32 %v1753_v29, %v1769_v36  ;;  %v6145_v55 = vmax.f32 %v1801_v28, %v1817_v3  ;;  %v1879_v28 = vand.u32 2147483647, %v1863_v20  ;;  %v7704_v15 = vsub.f32 0.0, %v7668_v7 }
 0x467   : > { %v1684_v10 = vpop.trf.xlu0  ;;  %v1738_v61 = vpop.trf.xlu1  ;;  %3730 = vpow2.f32 %v1910_v60  ;;  %v1914_v40 = vmul.f32 1.442695, %v1893_v0  ;;  %v1916_v0 = vmul.f32 1.442695, %v1894_v50 }
 0x468   : > { %v1754_v54 = vsub.f32 %v7677_v22, %v1684_v10  ;;  %v1802_v48 = vsub.f32 %v7701_v43, %v1684_v10  ;;  %v1770_v39 = vsub.f32 %v7702_v5, %v1738_v61  ;;  %v1818_v29 = vsub.f32 %v7677_v22, %v1738_v61  ;;  %v3725_v60 = vpop.eup %3724 }
 0x469   : > { %v1865_v27 = vsub.f32 %v6143_v12, %v6145_v55  ;;  %v1880_v43 = vand.u32 2147483647, %v1864_v24  ;;  %3732 = vpow2.f32 %v1912_v8  ;;  %v1895_v20 = vsub.f32 0.0, %v1879_v28  ;;  %v3727_v24 = vpop.eup %3726 }
 0x46a   : > { %v6157_v36 = vmax.f32 %v1754_v54, %v1770_v39  ;;  %v6159_v3 = vmax.f32 %v1802_v48, %v1818_v29  ;;  %3734 = vpow2.f32 %v1914_v40  ;;  %v7705_v8 = vmov %v7704_v15 }
 0x46b   : > { %v1685_v10 = vpop.trf.xlu0  ;;  %v1739_v18 = vpop.trf.xlu1  ;;  %v1881_v61 = vand.u32 2147483647, %v1865_v27  ;;  %v1896_v5 = vsub.f32 0.0, %v1880_v43  ;;  %v1918_v29 = vmul.f32 1.442695, %v1895_v20  ;;  %v1937_v35 = vadd.f32 1.0, %v3725_v60 }
 0x46c   : > { %v1866_v1 = vsub.f32 %v6157_v36, %v6159_v3  ;;  %v1755_v54 = vsub.f32 %v7668_v7, %v1685_v10  ;;  %v1771_v48 = vsub.f32 %v7704_v15, %v1739_v18  ;;  %v1803_v28 = vsub.f32 %v7705_v8, %v1685_v10  ;;  %v3729_v62 = vpop.eup %3728 }
 0x46d   : > { %v1897_v22 = vsub.f32 0.0, %v1881_v61  ;;  %v1938_v51 = vadd.f32 1.0, %v3727_v24  ;;  %3736 = vpow2.f32 %v1916_v0  ;;  %v1819_v50 = vsub.f32 %v7668_v7, %v1739_v18 }
 0x46e   : > { %v1882_v39 = vand.u32 2147483647, %v1866_v1  ;;  %v6173_v40 = vmax.f32 %v1755_v54, %v1771_v48  ;;  %v1920_v15 = vmul.f32 1.442695, %v1896_v5  ;;  %3738 = vpow2.f32 %v1918_v29 }
 0x46f   : > { %v1686_v27 = vpop.trf.xlu0  ;;  %v1740_v31 = vpop.trf.xlu1  ;;  %v1922_v43 = vmul.f32 1.442695, %v1897_v22  ;;  %v6176_v1 = vmax.f32 %v1803_v28, %v1819_v50  ;;  %3740 = vlog2.f32 %v1937_v35  ;;  %v7706_v20 = vsub.f32 0.0, %v7669_v19 }
 0x470   : > { %v1898_v52 = vsub.f32 0.0, %v1882_v39  ;;  %v1756_v10 = vsub.f32 %v7669_v19, %v1686_v27  ;;  %v1953_v0 = vmul.f32 0.6931472, %v3729_v62  ;;  %3742 = vlog2.f32 %v1938_v51 }
 0x471   : > { %v3731_v47 = vpop.eup %3730  ;;  %v1804_v61 = vsub.f32 %v7706_v20, %v1686_v27  ;;  %v1867_v18 = vsub.f32 %v6173_v40, %v6176_v1  ;;  %3744 = vpow2.f32 %v1920_v15  ;;  %v7707_v22 = vmov %v7706_v20 }
 0x472   : > { %v1939_v54 = vadd.f32 1.0, %v3731_v47  ;;  %v1924_v5 = vmul.f32 1.442695, %v1898_v52  ;;  %v1772_v39 = vsub.f32 %v7707_v22, %v1740_v31  ;;  %v1820_v35 = vsub.f32 %v7669_v19, %v1740_v31 }
 0x473   : > { %v3733_v60 = vpop.eup %3732  ;;  %v1687_v48 = vpop.trf.xlu0  ;;  %v1840_v29 = vmax.f32 %v6034_v38, %v6036_v16  ;;  %3746 = vpow2.f32 %v1922_v43  ;;  %v1883_v8 = vand.u32 2147483647, %v1867_v18  ;;  %v7709_v43 = vsub.f32 0.0, %v7670_v59 }
 0x474   : > { %v3735_v24 = vpop.eup %3734  ;;  %v1741_v62 = vpop.trf.xlu1  ;;  %v1940_v51 = vadd.f32 1.0, %v3733_v60  ;;  %v6188_v47 = vmax.f32 %v1756_v10, %v1772_v39  ;;  %v6190_v28 = vmax.f32 %v1804_v61, %v1820_v35  ;;  %3748 = vlog2.f32 %v1939_v54 }
 0x475   : > { %v6192_v27 = vadd.f32 %v1953_v0, %v1840_v29  ;;  %v1941_v52 = vadd.f32 1.0, %v3735_v24  ;;  %v1757_v50 = vsub.f32 %v7670_v59, %v1687_v48  ;;  %3750 = vpow2.f32 %v1924_v5 }
 0x476   : > { %7708 = vst [vmem:[#allocation74_spill] sm:$0xff] %v6188_v47  ;;  %v1899_v15 = vsub.f32 0.0, %v1883_v8  ;;  %v1868_v31 = vsub.f32 %v6188_v47, %v6190_v28  ;;  %v1773_v20 = vsub.f32 %v7709_v43, %v1741_v62  ;;  %v7710_v10 = vmov %v7709_v43 }
 0x477   : > { %v3737_v18 = vpop.eup %3736  ;;  %v1805_v60 = vsub.f32 %v7710_v10, %v1687_v48  ;;  %v1688_v61 = vpop.trf.xlu0  ;;  %v1841_v0 = vmax.f32 %v6052_v53, %v6054_v17  ;;  %3752 = vlog2.f32 %v1940_v51  ;;  %v1842_v5 = vmax.f32 %v6056_v25, %v6058_v11 }
 0x478   : > { %v1926_v54 = vmul.f32 1.442695, %v1899_v15  ;;  %v1884_v24 = vand.u32 2147483647, %v1868_v31  ;;  %v3739_v22 = vpop.eup %3738  ;;  %3754 = vlog2.f32 %v1941_v52  ;;  %v6205_v39 = vmax.f32 %v1757_v50, %v1773_v20  ;;  %v1742_v29 = vpop.trf.xlu1 }
 0x479   : > { %v1821_v35 = vsub.f32 %v7670_v59, %v1741_v62  ;;  %v3741_v8 = vpop.eup %3740  ;;  %v2000_v48 = vsub.f32 %v6034_v38, %v6192_v27  ;;  %v1942_v43 = vadd.f32 1.0, %v3737_v18  ;;  %v1843_v15 = vmax.f32 %v6076_v63, %v6078_v32 }
 0x47a   : > { %7711 = vst [vmem:[#allocation75_spill] sm:$0xff] %v6205_v39  ;;  %3756 = vpow2.f32 %v1926_v54  ;;  %v1900_v10 = vsub.f32 0.0, %v1884_v24  ;;  %v3743_v51 = vpop.eup %3742  ;;  %v1943_v54 = vadd.f32 1.0, %v3739_v22  ;;  %v1758_v52 = vsub.f32 %v7663_v13, %v1688_v61 }
 0x47b   : > { %v6216_v50 = vmax.f32 %v1805_v60, %v1821_v35  ;;  %v3745_v62 = vpop.eup %3744  ;;  %v7713_v60 = vsub.f32 0.0, %v7663_v13  ;;  %v1689_v19 = vpop.trf.xlu0  ;;  %v6230_v20 = vmul.f32 %v2000_v48, %v7656_v57   ;;  %v1955_v33 = vmul.f32 0.6931472, %v3741_v8 }
 0x47c   : > { %v1928_v59 = vmul.f32 1.442695, %v1900_v10  ;;  %3758 = vlog2.f32 %v1942_v43  ;;  %v1944_v2 = vadd.f32 1.0, %v3745_v62  ;;  %v1822_v45 = vsub.f32 %v7663_v13, %v1742_v29  ;;  %v1743_v6 = vpop.trf.xlu1 }
 0x47d   : > { %7712 = vst [vmem:[#allocation76_spill] sm:$0xff] %v6216_v50  ;;  %v3747_v24 = vpop.eup %3746  ;;  %v1869_v31 = vsub.f32 %v6205_v39, %v6216_v50  ;;  %v1806_v35 = vsub.f32 %v7713_v60, %v1688_v61  ;;  %7714 = vst [vmem:[#allocation77_spill] sm:$0xff] %v6230_v20  ;;  %v7715_v7 = vmov %v6230_v20  ;;  %v7716_v38 = vmov %v7713_v60 }
 0x47e   : > { %v1774_v18 = vsub.f32 %v7716_v38, %v1742_v29  ;;  %v3749_v22 = vpop.eup %3748  ;;  %3760 = vpow2.f32 %v1928_v59  ;;  %v1957_v50 = vmul.f32 0.6931472, %v3743_v51  ;;  %v1945_v61 = vadd.f32 1.0, %v3747_v24 }
 0x47f   : > { %v1885_v10 = vand.u32 2147483647, %v1869_v31  ;;  %v3751_v39 = vpop.eup %3750  ;;  %3762 = vlog2.f32 %v1943_v54  ;;  %v1759_v60 = vsub.f32 %v7662_v21, %v1689_v19  ;;  %v6238_v8 = vmax.f32 %v1806_v35, %v1822_v45 }
 0x480   : > { %v6236_v20 = vmax.f32 %v1758_v52, %v1774_v18  ;;  %v7717_v43 = vsub.f32 0.0, %v7662_v21  ;;  %v1985_v59 = vadd.f32 %v1955_v33, %v1841_v0  ;;  %v1959_v31 = vmul.f32 0.6931472, %v3749_v22 }
 0x481   : > { %v1901_v48 = vsub.f32 0.0, %v1885_v10  ;;  %v3753_v62 = vpop.eup %3752  ;;  %v1823_v51 = vsub.f32 %v7662_v21, %v1743_v6  ;;  %3764 = vlog2.f32 %v1944_v2  ;;  %v1946_v24 = vadd.f32 1.0, %v3751_v39 }
 0x482   : > { %v1807_v38 = vsub.f32 %v7717_v43, %v1689_v19  ;;  %v7718_v29 = vmov %v7717_v43  ;;  %v3755_v54 = vpop.eup %3754  ;;  %v1870_v52 = vsub.f32 %v6236_v20, %v6238_v8  ;;  %v1986_v18 = vadd.f32 %v1957_v50, %v1842_v5 }
 0x483   : > { %v1775_v13 = vsub.f32 %v7718_v29, %v1743_v6  ;;  %v1930_v47 = vmul.f32 1.442695, %v1901_v48  ;;  %3766 = vlog2.f32 %v1945_v61  ;;  %v1961_v33 = vmul.f32 0.6931472, %v3753_v62 }
 0x484   : > { %v3757_v45 = vpop.eup %3756  ;;  %v6249_v19 = vmax.f32 %v1807_v38, %v1823_v51  ;;  %v1886_v22 = vand.u32 2147483647, %v1870_v52  ;;  %v2001_v6 = vsub.f32 %v6052_v53, %v1985_v59  ;;  %v2033_v39 = vsub.f32 %v6054_v17, %v1985_v59 }
 0x485   : > { %v6247_v35 = vmax.f32 %v1759_v60, %v1775_v13  ;;  %v1947_v0 = vadd.f32 1.0, %v3757_v45  ;;  %3768 = vpow2.f32 %v1930_v47  ;;  %v1987_v10 = vadd.f32 %v1959_v31, %v1843_v15 }
 0x486   : > { %v1963_v48 = vmul.f32 0.6931472, %v3755_v54  ;;  %3770 = vlog2.f32 %v1946_v24  ;;  %v3759_v5 = vpop.eup %3758  ;;  %v1902_v50 = vsub.f32 0.0, %v1886_v22  ;;  %v2002_v60 = vsub.f32 %v6056_v25, %v1986_v18 }
 0x487   : > { %v1871_v2 = vsub.f32 %v6247_v35, %v6249_v19  ;;  %v2034_v43 = vsub.f32 %v6058_v11, %v1986_v18  ;;  %v7719_v47 = vmax.f32 %v6080_v42, %v6082_v46  ;;  %3772 = vlog2.f32 %v1947_v0 }
 0x488   : > { %v3761_v61 = vpop.eup %3760  ;;  %v6261_v62 = vmul.f32 %v2001_v6, %v7657_v49   ;;  %v1932_v15 = vmul.f32 1.442695, %v1902_v50  ;;  %v6264_v31 = vmul.f32 %v2033_v39, %v7657_v49   ;;  %v2003_v29 = vsub.f32 %v6076_v63, %v1987_v10 }
 0x489   : > { %v1887_v13 = vand.u32 2147483647, %v1871_v2  ;;  %v1988_v53 = vadd.f32 %v1961_v33, %v7719_v47  ;;  %v3763_v38 = vpop.eup %3762  ;;  %v1948_v17 = vadd.f32 1.0, %v3761_v61  ;;  %v7721_v25 = vmax.f32 %v6094_v34, %v6096_v14 }
 0x48a   : > { %7720 = vst [vmem:[#allocation78_spill] sm:$0xff] %v6261_v62  ;;  %v1965_v51 = vmul.f32 0.6931472, %v3759_v5  ;;  %v7722_v54 = vsub.f32 %v6036_v16, %v6192_v27  ;;  %v2035_v45 = vsub.f32 %v6078_v32, %v1987_v10  ;;  %v6278_v0 = vmul.f32 %v2002_v60, %v7658_v9  }
 0x48b   : > { %v1903_v59 = vsub.f32 0.0, %v1887_v13  ;;  %v1989_v11 = vadd.f32 %v1963_v48, %v7721_v25  ;;  %3774 = vlog2.f32 %v1948_v17  ;;  %v3765_v33 = vpop.eup %3764  ;;  %v6281_v63 = vmul.f32 %v2034_v43, %v7658_v9  }
 0x48c   : > { %v6274_v24 = vmul.f32 %v7722_v54, %v7656_v57   ;;  %7724 = vst [vmem:[#allocation79_spill] sm:$0xff] %v6278_v0  ;;  %v7725_v22 = vmov %v6278_v0  ;;  %v2004_v2 = vsub.f32 %v6080_v42, %v1988_v53  ;;  %3776 = vpow2.f32 %v1932_v15 }
 0x48d   : > { %v1934_v18 = vmul.f32 1.442695, %v1903_v59  ;;  %v7726_v6 = vmov %v6281_v63  ;;  %v3767_v39 = vpop.eup %3766  ;;  %v2064_v16 = vadd.f32 %v6261_v62, %v7715_v7  ;;  %v2036_v27 = vsub.f32 %v6082_v46, %v1988_v53 }
 0x48e   : > { %v7723_v52 = vmov %v6274_v24  ;;  %v1967_v48 = vmul.f32 0.6931472, %v3763_v38  ;;  %v6290_v53 = vmul.f32 %v2003_v29, %v7659_v23   ;;  %v2005_v5 = vsub.f32 %v6094_v34, %v1989_v11 }
 0x48f   : > { %3778 = vpow2.f32 %v1934_v18  ;;  %v3769_v32 = vpop.eup %3768  ;;  %v2085_v10 = vadd.f32 %v6264_v31, %v7723_v52  ;;  %v7729_v42 = vmax.f32 %v6112_v44, %v6114_v56  ;;  %v6297_v15 = vmul.f32 %v2035_v45, %v7659_v23  }
 0x490   : > { %7727 = vst [vmem:[#allocation80_spill] sm:$0xff] %v6290_v53  ;;  %v7728_v13 = vmov %v6290_v53  ;;  %v1848_v46 = vmax.f32 %v6137_v37, %v6139_v58  ;;  %v1969_v61 = vmul.f32 0.6931472, %v3765_v33  ;;  %v1949_v60 = vadd.f32 1.0, %v3769_v32  ;;  %v3771_v43 = vpop.eup %3770 }
 0x491   : > { %v1990_v50 = vadd.f32 %v1965_v51, %v7729_v42  ;;  %v7730_v47 = vmov %v6297_v15  ;;  %v2065_v38 = vadd.f32 %v2064_v16, %v7725_v22  ;;  %v2086_v17 = vadd.f32 %v2085_v10, %v7726_v6  ;;  %v3773_v54 = vpop.eup %3772 }
 0x492   : > { %v6304_v53 = vmul.f32 %v2004_v2, %v7660_v26   ;;  %v2037_v34 = vsub.f32 %v6096_v14, %v1989_v11  ;;  %v6308_v24 = vmul.f32 %v2036_v27, %v7660_v26   ;;  %v7734_v15 = vmax.f32 %v6122_v30, %v6124_v41 }
 0x493   : > { %v1971_v25 = vmul.f32 0.6931472, %v3767_v39  ;;  %3780 = vlog2.f32 %v1949_v60  ;;  %v2066_v45 = vadd.f32 %v2065_v38, %v7728_v13  ;;  %v6315_v60 = vmul.f32 %v2005_v5, %v7661_v4  }
 0x494   : > { %7731 = vst [vmem:[#allocation81_spill] sm:$0xff] %v6304_v53  ;;  %v7732_v59 = vmov %v6304_v53  ;;  %v7733_v51 = vmov %v6308_v24  ;;  %v1991_v29 = vadd.f32 %v1967_v48, %v7734_v15  ;;  %v2006_v33 = vsub.f32 %v6112_v44, %v1990_v50 }
 0x495   : > { %7735 = vst [vmem:[#allocation82_spill] sm:$0xff] %v6315_v60  ;;  %v7736_v18 = vmov %v6315_v60  ;;  %v1849_v14 = vmax.f32 %v6143_v12, %v6145_v55  ;;  %v2087_v11 = vadd.f32 %v2086_v17, %v7730_v47  ;;  %v2038_v24 = vsub.f32 %v6114_v56, %v1990_v50  ;;  %v3775_v16 = vpop.eup %3774  ;;  %v7738_v50 = vld [vmem:[#allocation34_spill] sm:$0xff]  ;;  %v7741_v60 = vld [vmem:[#allocation74_spill] sm:$0xff] }
 0x496   : > { %v1992_v0 = vadd.f32 %v1969_v61, %v1848_v46  ;;  %v1973_v63 = vmul.f32 0.6931472, %v3771_v43  ;;  %v2067_v2 = vadd.f32 %v2066_v45, %v7732_v59  ;;  %v6324_v17 = vmul.f32 %v2037_v34, %v7661_v4   ;;  %v3777_v5 = vpop.eup %3776 }
 0x497   : > { %v1850_v39 = vmax.f32 %v6157_v36, %v6159_v3  ;;  %v1851_v44 = vmax.f32 %v6173_v40, %v6176_v1  ;;  %v2088_v27 = vadd.f32 %v2087_v11, %v7733_v51  ;;  %v2007_v48 = vsub.f32 %v6122_v30, %v1991_v29 }
 0x498   : > { %v7737_v32 = vmov %v6324_v17  ;;  %v1993_v10 = vadd.f32 %v1971_v25, %v1849_v14  ;;  %v1975_v56 = vmul.f32 0.6931472, %v3773_v54  ;;  %v2068_v42 = vadd.f32 %v2067_v2, %v7736_v18 }
 0x499   : > { %v6334_v14 = vmul.f32 %v2006_v33, %v7738_v50   ;;  %v2039_v61 = vsub.f32 %v6124_v41, %v1991_v29  ;;  %v1852_v43 = vmax.f32 %v7741_v60, %v6190_v28  ;;  %v3779_v38 = vpop.eup %3778  ;;  %v6340_v17 = vmul.f32 %v2038_v24, %v7738_v50  }
 0x49a   : > { %v2008_v53 = vsub.f32 %v6137_v37, %v1992_v0  ;;  %v1994_v30 = vadd.f32 %v1973_v63, %v1850_v39  ;;  %v1950_v34 = vadd.f32 1.0, %v3777_v5  ;;  %v2089_v15 = vadd.f32 %v2088_v27, %v7737_v32 }
 0x49b   : > { %7739 = vst [vmem:[#allocation83_spill] sm:$0xff] %v6334_v14  ;;  %v7740_v46 = vmov %v6334_v14  ;;  %v7742_v45 = vmov %v6340_v17  ;;  %v2040_v25 = vsub.f32 %v6139_v58, %v1992_v0  ;;  %v1977_v54 = vmul.f32 0.6931472, %v3775_v16  ;;  %v7743_v14 = vld [vmem:[#allocation37_spill] sm:$0xff]  ;;  %v7746_v0 = vld [vmem:[#allocation38_spill] sm:$0xff] }
 0x49c   : > { %v1951_v33 = vadd.f32 1.0, %v3779_v38  ;;  %v6346_v11 = vmul.f32 %v2007_v48, %v7743_v14   ;;  %v2009_v41 = vsub.f32 %v6143_v12, %v1993_v10  ;;  %v1995_v29 = vadd.f32 %v1975_v56, %v1851_v44  ;;  %v7748_v48 = vld [vmem:[#allocation76_spill] sm:$0xff]  ;;  %v7749_v12 = vld [vmem:[#allocation75_spill] sm:$0xff] }
 0x49d   : > { %3782 = vlog2.f32 %v1950_v34  ;;  %v2069_v24 = vadd.f32 %v2068_v42, %v7740_v46  ;;  %v6351_v39 = vmul.f32 %v2039_v61, %v7743_v14   ;;  %v2041_v63 = vsub.f32 %v6145_v55, %v1993_v10  ;;  %v3781_v27 = vpop.eup %3780  ;;  %v7751_v10 = vld [vmem:[#allocation39_spill] sm:$0xff] }
 0x49e   : > { %v7744_v2 = vmov %v6346_v11  ;;  %3784 = vlog2.f32 %v1951_v33  ;;  %v2090_v58 = vadd.f32 %v2089_v15, %v7742_v45  ;;  %v6356_v16 = vmul.f32 %v2008_v53, %v7746_v0  }
 0x49f   : > { %v7745_v37 = vmov %v6351_v39  ;;  %v2010_v11 = vsub.f32 %v6157_v36, %v1994_v30  ;;  %v1853_v44 = vmax.f32 %v7749_v12, %v7748_v48  ;;  %v6362_v56 = vmul.f32 %v2040_v25, %v7746_v0  }
 0x4a0   : > { %v7747_v21 = vmov %v6356_v16  ;;  %v2042_v5 = vsub.f32 %v6159_v3, %v1994_v30  ;;  %v1996_v39 = vadd.f32 %v1977_v54, %v1852_v43  ;;  %v1979_v50 = vmul.f32 0.6931472, %v3781_v27  ;;  %v7754_v3 = vld [vmem:[#allocation40_spill] sm:$0xff]  ;;  %v7760_v27 = vld [vmem:[#allocation42_spill] sm:$0xff] }
 0x4a1   : > { %v7750_v42 = vmov %v6362_v56  ;;  %v2070_v55 = vadd.f32 %v2069_v24, %v7744_v2  ;;  %v6367_v30 = vmul.f32 %v2009_v41, %v7751_v10   ;;  %v2011_v61 = vsub.f32 %v6173_v40, %v1995_v29 }
 0x4a2   : > { %v2091_v38 = vadd.f32 %v2090_v58, %v7745_v37  ;;  %v6372_v36 = vmul.f32 %v2041_v63, %v7751_v10   ;;  %v2043_v17 = vsub.f32 %v6176_v1, %v1995_v29  ;;  %v1997_v53 = vadd.f32 %v1979_v50, %v1853_v44  ;;  %v7765_v44 = vld [vmem:[#allocation57_spill] sm:$0xff] }
 0x4a3   : > { %v7752_v33 = vmov %v6367_v30  ;;  %v2071_v34 = vadd.f32 %v2070_v55, %v7747_v21  ;;  %v6377_v43 = vmul.f32 %v2010_v11, %v7754_v3   ;;  %v6381_v1 = vmul.f32 %v2042_v5, %v7754_v3   ;;  %v7775_v3 = vld [vmem:[#allocation61_spill] sm:$0xff] }
 0x4a4   : > { %v7753_v4 = vmov %v6372_v36  ;;  %v2092_v15 = vadd.f32 %v2091_v38, %v7750_v42  ;;  %v2012_v40 = vsub.f32 %v7741_v60, %v1996_v39  ;;  %v2044_v30 = vsub.f32 %v6190_v28, %v1996_v39  ;;  %v7757_v36 = vld [vmem:[#allocation41_spill] sm:$0xff] }
 0x4a5   : > { %v7755_v26 = vmov %v6377_v43  ;;  %v7756_v23 = vmov %v6381_v1  ;;  %v2072_v25 = vadd.f32 %v2071_v34, %v7752_v33  ;;  %v6387_v34 = vmul.f32 %v2011_v61, %v7757_v36  }
 0x4a6   : > { %v2093_v54 = vadd.f32 %v2092_v15, %v7753_v4  ;;  %v6391_v14 = vmul.f32 %v2043_v17, %v7757_v36   ;;  %v2013_v41 = vsub.f32 %v7749_v12, %v1997_v53  ;;  %v2045_v29 = vsub.f32 %v7748_v48, %v1997_v53 }
 0x4a7   : > { %v7758_v9 = vmov %v6387_v34  ;;  %v3783_v24 = vpop.eup %3782  ;;  %v2073_v1 = vadd.f32 %v2072_v25, %v7755_v26  ;;  %v1854_v28 = vmax.f32 %v6236_v20, %v6238_v8  ;;  %v6400_v58 = vmul.f32 %v2012_v40, %v7760_v27   ;;  %v7770_v34 = vld [vmem:[#allocation59_spill] sm:$0xff] }
 0x4a8   : > { %v7759_v49 = vmov %v6391_v14  ;;  %v3785_v60 = vpop.eup %3784  ;;  %v2094_v63 = vadd.f32 %v2093_v54, %v7756_v23  ;;  %v6403_v50 = vmul.f32 %v2044_v30, %v7760_v27   ;;  %v1981_v0 = vmul.f32 0.6931472, %v3783_v24 }
 0x4a9   : > { %7761 = vst [vmem:[#allocation84_spill] sm:$0xff] %v6400_v58  ;;  %v7762_v57 = vmov %v6400_v58  ;;  %v2074_v16 = vadd.f32 %v2073_v1, %v7758_v9  ;;  %v1855_v11 = vmax.f32 %v6247_v35, %v6249_v19  ;;  %v1983_v48 = vmul.f32 0.6931472, %v3785_v60  ;;  %v7780_v60 = vld [vmem:[#allocation69_spill] sm:$0xff] }
 0x4aa   : > { %7763 = vst [vmem:[#allocation85_spill] sm:$0xff] %v6403_v50  ;;  %v7764_v7 = vmov %v6403_v50  ;;  %v2095_v12 = vadd.f32 %v2094_v63, %v7759_v49  ;;  %v6410_v5 = vmul.f32 %v2013_v41, %v7765_v44   ;;  %v6413_v27 = vmul.f32 %v2045_v29, %v7765_v44  }
 0x4ab   : > { %v1998_v56 = vadd.f32 %v1981_v0, %v1854_v28  ;;  %v1999_v39 = vadd.f32 %v1983_v48, %v1855_v11  ;;  %v2075_v55 = vadd.f32 %v2074_v16, %v7762_v57  ;;  %v7781_v46 = vmov %v7780_v60 }
 0x4ac   : > { %7766 = vst [vmem:[#allocation86_spill] sm:$0xff] %v6410_v5  ;;  %v7767_v62 = vmov %v6410_v5  ;;  %7768 = vst [vmem:[#allocation87_spill] sm:$0xff] %v6413_v27  ;;  %v7769_v22 = vmov %v6413_v27  ;;  %v2096_v50 = vadd.f32 %v2095_v12, %v7764_v7 }
 0x4ad   : > { %v2014_v10 = vsub.f32 %v6236_v20, %v1998_v56  ;;  %v2046_v61 = vsub.f32 %v6238_v8, %v1998_v56  ;;  %v2015_v38 = vsub.f32 %v6247_v35, %v1999_v39  ;;  %v2047_v17 = vsub.f32 %v6249_v19, %v1999_v39 }
 0x4ae   : > { %v2076_v53 = vadd.f32 %v2075_v55, %v7767_v62  ;;  %v2097_v5 = vadd.f32 %v2096_v50, %v7769_v22 }
 0x4af   : > { %v6424_v0 = vmul.f32 %v2014_v10, %v7770_v34   ;;  %v6427_v10 = vmul.f32 %v2046_v61, %v7770_v34   ;;  %v6430_v38 = vmul.f32 %v2015_v38, %v7775_v3   ;;  %v6433_v58 = vmul.f32 %v2047_v17, %v7775_v3   ;;  %v7784_v17 = vld [vmem:[#allocation73_spill] sm:$0xff] (%p6164_p2) }
 0x4b1   : > { %7771 = vst [vmem:[#allocation88_spill] sm:$0xff] %v6424_v0  ;;  %v7772_v13 = vmov %v6424_v0  ;;  %7773 = vst [vmem:[#allocation89_spill] sm:$0xff] %v6427_v10  ;;  %v7774_v59 = vmov %v6427_v10  ;;  %v7777_v18 = vmov %v6430_v38  ;;  %v7779_v8 = vmov %v6433_v58  ;;  %v7783_v0 = vld [vmem:[#allocation70_spill] sm:$0xff] }
 0x4b2   : > { %7776 = vst [vmem:[#allocation90_spill] sm:$0xff] %v6430_v38  ;;  %7778 = vst [vmem:[#allocation91_spill] sm:$0xff] %v6433_v58  ;;  %v2077_v20 = vadd.f32 %v2076_v53, %v7772_v13  ;;  %v2098_v35 = vadd.f32 %v2097_v5, %v7774_v59  ;;  %v7782_v58 = vld [vmem:[#allocation71_spill] sm:$0xff] }
 0x4b3   : > { %v7785_v5 = vld [vmem:[#allocation72_spill] sm:$0xff] (%p6164_p2) }
 0x4b4   : > { %v2078_v19 = vadd.f32 %v2077_v20, %v7777_v18  ;;  %v2099_v43 = vadd.f32 %v2098_v35, %v7779_v8 }
 0x4b6   : > { %v2079_v15 = vrot.slane %v2078_v19, 4  ;;  %v2100_v40 = vrot.slane %v2099_v43, 4 }
 0x4b8   : > { %v2080_v30 = vadd.f32 %v2079_v15, %v2078_v19  ;;  %v2101_v25 = vadd.f32 %v2100_v40, %v2099_v43  ;;  %v7786_v19 = vld [vmem:[#allocation67_spill] sm:$0xff] (%p6164_p2) }
 0x4ba   : > { %v2081_v36 = vrot.slane %v2080_v30, 2  ;;  %v2102_v54 = vrot.slane %v2101_v25, 2 }
 0x4bc   : > { %v2082_v14 = vadd.f32 %v2081_v36, %v2080_v30  ;;  %v2103_v41 = vadd.f32 %v2102_v54, %v2101_v25 }
 0x4be   : > { %v2083_v29 = vrot.slane %v2082_v14, 1  ;;  %v2104_v24 = vrot.slane %v2103_v41, 1 }
 0x4c0   : > { %v2084_v1 = vadd.f32 %v2083_v29, %v2082_v14  ;;  %v2105_v28 = vadd.f32 %v2104_v24, %v2103_v41 }
 0x4c2   : > { %v2106_v63 = vmul.f32 %v7780_v60, %v2084_v1  ;;  %v2108_v27 = vmul.f32 %v7781_v46, %v2105_v28 }
 0x4c4   : > { %v2107_v43 = vadd.f32 %v2106_v63, %v7782_v58   ;;  %v2109_v28 = vadd.f32 %v2108_v27, %v7783_v0  }
 0x4c6   : > { %v2111_v16 = vsub.f32 %v2107_v43, %v2109_v28  ;;  %v2110_v55 = vmax.f32 %v2107_v43, %v2109_v28 }
 0x4c8   : > { %v2112_v11 = vand.u32 2147483647, %v2111_v16 }
 0x4ca   : > { %v2113_v48 = vsub.f32 0.0, %v2112_v11 }
 0x4cc   : > { %v2114_v12 = vmul.f32 1.442695, %v2113_v48 }
 0x4ce   : > { %3786 = vpow2.f32 %v2114_v12 }
 0x4d8   : > { %v3787_v44 = vpop.eup %3786 }
 0x4d9   : > { %v2116_v56 = vadd.f32 1.0, %v3787_v44 }
 0x4db   : > { %3788 = vlog2.f32 %v2116_v56 }
 0x4e4   : > { %2139 = sbr.rel (!%p6164_p2) target bundleno = 1474 (0x5c2), region = 84 }
 0x4e5   : > { %v3789_v39 = vpop.eup %3788 }
 0x4e6   : > { %v2118_v50 = vmul.f32 0.6931472, %v3789_v39 }
 0x4e8   : > { %v2119_v10 = vadd.f32 %v2118_v50, %v2110_v55 }
 0x4ea   : > { %v2120_v61 = vsub.f32 %v2107_v43, %v2119_v10  ;;  %v2121_v38 = vsub.f32 %v2109_v28, %v2119_v10 }
 0x4ec   : > { %v2140_v53 = vsub.f32 %v2120_v61, %v7784_v17  ;;  %v2142_v34 = vsub.f32 %v2121_v38, %v7785_v5 }
 0x4ee   : > { %v2141_v3 = vmul.f32 %v2140_v53, %v2140_v53  ;;  %v2143_v20 = vmul.f32 %v2142_v34, %v2142_v34 }
 0x4f0   : > { %v2144_v35 = vadd.f32 %v2143_v20, %v2141_v3 }
 0x4f2   : > { %v2145_v15 = vmul.f32 %v2144_v35, %v7786_v19 }
 0x4f4   : > { %v2147_v40 = vsel %vm2146_vm1, %v2145_v15, 0.0 }
 0x4f5   : > { %2148 = vadd.xlane.f32.xlu0 %v2147_v40 }
 0x582   : > { %v2149_v30 = vpop.xlane.xlu0 %2148 }
 0x583   : > { %v2150_v25 = vrot.slane %v2149_v30, 4 }
 0x585   : > { %v2151_v36 = vadd.f32 %v2150_v25, %v2149_v30 }
 0x587   : > { %v2152_v54 = vrot.slane %v2151_v36, 2 }
 0x589   : > { %v2153_v14 = vadd.f32 %v2152_v54, %v2151_v36 }
 0x58b   : > { %v2154_v41 = vrot.slane %v2153_v14, 1 }
 0x58d   : > { %v2155_v29 = vadd.f32 %v2154_v41, %v2153_v14 }
 0x58f   : > { %3305 = vpush %v2155_v29 }
 0x5c0   : > { %s3306_s8 = spop %3305 }
 0x5c1   : > { %s2157_s7 = smul.f32 0.0625, %s3306_s8  }
 0x5c2 PF: > { %s2173_s5 = sadd.s32 1, %s4576_s0   ;;  %s7903_s7 = smov (!%p6164_p2, %s4580_s7), 1.0  ;;  %v7787_v1 = vld [vmem:[#allocation73_spill] sm:$0xff]  ;;  %v7789_v60 = vld [vmem:[#allocation72_spill] sm:$0xff]  ;;  %v7795_v8 = vld [vmem:[#allocation91_spill] sm:$0xff]  ;;  %v7803_v40 = vmov %v7759_v49  ;;  %v7805_v36 = vmov %v7753_v4  ;;  %v7806_v20 = vmov %v7750_v42  ;;  %v7807_v39 = vmov %v7745_v37  ;;  %s4580_s7 = sphi %s4578_s7, %s2157_s7  }
 0x5c3   : > { %p2163_p3 = scmp.lt.f32.partialorder %s7903_s7, 1e-07  ;;  %p2164_p4 = scmp.lt.f32.partialorder %s7903_s7, 1e+38  ;;  %v7796_v58 = vmov %v7795_v8  ;;  %v7797_v59 = vld [vmem:[#allocation89_spill] sm:$0xff]  ;;  %v7799_v22 = vld [vmem:[#allocation87_spill] sm:$0xff]  ;;  %v7809_v17 = vmov %v7737_v32  ;;  %v7811_v15 = vmov %v7730_v47  ;;  %v7812_v12 = vmov %v7726_v6 }
 0x5c4   : > { %p6459_p7 = scmp.lt.s32.totalorder %s2173_s5, 10  ;;  %v7798_v10 = vmov %v7797_v59  ;;  %v7800_v27 = vmov %v7799_v22  ;;  %v7801_v7 = vld [vmem:[#allocation85_spill] sm:$0xff]  ;;  %v7813_v56 = vmov %v6264_v31  ;;  %v7814_v44 = vmov %v7723_v52  ;;  %v7815_v18 = vld [vmem:[#allocation90_spill] sm:$0xff]  ;;  %v7817_v13 = vld [vmem:[#allocation88_spill] sm:$0xff]  ;;  %s7835_s0 = smov %s2173_s5 }
 0x5c5   : > { %p2165_p5 = pneg %p2164_p4  ;;  %v7802_v50 = vmov %v7801_v7  ;;  %v7818_v0 = vmov %v7817_v13  ;;  %v7819_v62 = vld [vmem:[#allocation86_spill] sm:$0xff]  ;;  %v7821_v57 = vld [vmem:[#allocation84_spill] sm:$0xff]  ;;  %v7823_v34 = vmov %v7758_v9  ;;  %v7824_v48 = vmov %v7755_v26  ;;  %v7828_v14 = vld [vmem:[#allocation83_spill] sm:$0xff] }
 0x5c6   : > { %s2166_s28 = scalar_select %p2164_p4, 1, 0  ;;  %v7820_v5 = vmov %v7819_v62  ;;  %v7822_v29 = vmov %v7821_v57  ;;  %v7825_v30 = vmov %v7752_v33  ;;  %v7826_v25 = vmov %v7747_v21  ;;  %v7830_v41 = vld [vmem:[#allocation81_spill] sm:$0xff]  ;;  %v7831_v53 = vld [vmem:[#allocation80_spill] sm:$0xff]  ;;  %v7832_v3 = vld [vmem:[#allocation79_spill] sm:$0xff] }
 0x5c7   : > { %p2171_p6 = por %p2165_p5, %p2163_p3  ;;  %v7827_v11 = vmov %v7744_v2  ;;  %v7833_v55 = vld [vmem:[#allocation78_spill] sm:$0xff]  ;;  %v7834_v63 = vld [vmem:[#allocation77_spill] sm:$0xff] }
 0x5c8   : > { %v2167_v24 = vstv %s2166_s28 }
 0x5c9   : > { %vm2168_vm3 = vcmp.eq.s32.totalorder %v2167_v24, 1  ;;  %s2172_s22 = scalar_select %p2171_p6, 1, 0  ;;  %v7810_v24 = vmov %v7733_v51 }
 0x5ca   : > { %v6452_v16 = vsel %vm2168_vm3, %v2120_v61, %v7787_v1   ;;  %v6455_v54 = vsel %vm2168_vm3, %v2121_v38, %v7789_v60   ;;  %v7804_v1 = vmov %v7756_v23  ;;  %v7808_v61 = vmov %v7742_v45  ;;  %v7829_v60 = vld [vmem:[#allocation82_spill] sm:$0xff] }
 0x5cb   : > { %v7788_v35 = vmov %v6452_v16  ;;  %v7790_v19 = vmov %v6455_v54  ;;  %p6463_p8 = scmp.eq.s32.totalorder %s2172_s22, 0  ;;  %v7816_v38 = vmov %v7815_v18 }
 0x5cc   : > { %v7793_v54 = vmov %v7790_v19  ;;  %v7794_v16 = vmov %v7788_v35 }
 0x5cd   : > { %p1632_p9 = pnand %p6463_p8, %p6459_p7 }
 0x5ce   :  { %v7836_v8 = vld [vmem:[#allocation50_spill] sm:$0xff] (%p1632_p9)  ;;  %v7837_v13 = vld [vmem:[#allocation65_spill] sm:$0xff] (%p1632_p9)  ;;  %v7841_v7 = vld [vmem:[#allocation55_spill] sm:$0xff] (%p1632_p9)  ;;  %s4591_s23 = smov (%p1632_p9), [#allocation13]   ;;  %s4592_s25 = smov (%p1632_p9), [#allocation16]  }
 0x5cf   :  { %1635 = sbr.rel (!%p1632_p9) target bundleno = 947 (0x3b3), region = 171  ;;  %v6588_v18 = vrot.slane (%p1632_p9), %v7788_v35, %v7836_v8  ;;  %v6592_v59 = vrot.slane (%p1632_p9), %v7790_v19, %v7836_v8  ;;  %2640 = vst [vmem:[#allocation16] sm:$0x1] (%p1632_p9), %v7837_v13  ;;  %v7838_v22 = vld [vmem:[#allocation49_spill] sm:$0xff] (%p1632_p9)  ;;  %v7840_v62 = vld [vmem:[#allocation54_spill] sm:$0xff] (%p1632_p9)  ;;  %2627 = vst [vmem:[#allocation15 + $0x18] sm:$0xff] (%p1632_p9), %v7841_v7 }
 0x5d0   :  { %2624 = vst [vmem:[#allocation15] sm:$0xff] (%p1632_p9), %v7838_v22  ;;  %v7839_v63 = vld [vmem:[#allocation53_spill] sm:$0xff] (%p1632_p9)  ;;  %2626 = vst [vmem:[#allocation15 + $0x10] sm:$0xff] (%p1632_p9), %v7840_v62  ;;  %v7842_v57 = vld [vmem:[#allocation52_spill] sm:$0xff] (%p1632_p9)  ;;  %s2786_s24 = sshll.u32 (%p1632_p9), %s4591_s23, 4  ;;  %s2808_s9 = sshll.u32 (%p1632_p9), %s4592_s25, 4  ;;  %s2787_s24 = int_to_ptr.vmem [resolvable:$true] %s2786_s24  ;;  %s6774_s9 = int_to_ptr.vmem [resolvable:$true] %s2808_s9 }
 0x5d1   :  { %2625 = vst [vmem:[#allocation15 + $0x8] sm:$0xff] (%p1632_p9), %v7839_v63  ;;  %2628 = vst [vmem:[#allocation15 + $0x20] sm:$0xff] (%p1632_p9), %v7842_v57  ;;  %v7843_v46 = vld [vmem:[#allocation33_spill] sm:$0xff] (%p1632_p9)  ;;  %v7844_v43 = vld [vmem:[#allocation34_spill] sm:$0xff] (%p1632_p9)  ;;  %v6618_v48 = vsub.f32 (%p1632_p9), %v6592_v59, %v7723_v52  ;;  %v6628_v56 = vsub.f32 (%p1632_p9), %v6592_v59, %v6264_v31  ;;  %v6638_v55 = vsub.f32 (%p1632_p9), %v6592_v59, %v7726_v6  ;;  %v2176_v63 = vmul.f32 (%p1632_p9), 1.442695, %v7790_v19  ;;  %p4069_p11 = scmp.lt.s32.totalorder (%p1632_p9), %s2787_s24, %s2787_s24 }
 0x5d2   :  { %2629 = vst [vmem:[#allocation15 + $0x28] sm:$0xff] (%p1632_p9), %v7843_v46  ;;  %2630 = vst [vmem:[#allocation15 + $0x30] sm:$0xff] (%p1632_p9), %v7844_v43  ;;  %v7845_v28 = vld [vmem:[#allocation37_spill] sm:$0xff] (%p1632_p9)  ;;  %v7846_v8 = vld [vmem:[#allocation38_spill] sm:$0xff] (%p1632_p9)  ;;  %v6648_v10 = vsub.f32 (%p1632_p9), %v6592_v59, %v7730_v47  ;;  %v6658_v38 = vsub.f32 (%p1632_p9), %v6592_v59, %v7733_v51  ;;  %v6668_v53 = vsub.f32 (%p1632_p9), %v6592_v59, %v7737_v32  ;;  %v2174_v46 = vmul.f32 (%p1632_p9), 1.442695, %v7788_v35 }
 0x5d3   :  { %2631 = vst [vmem:[#allocation15 + $0x38] sm:$0xff] (%p1632_p9), %v7845_v28  ;;  %2632 = vst [vmem:[#allocation15 + $0x40] sm:$0xff] (%p1632_p9), %v7846_v8  ;;  %v7847_v27 = vld [vmem:[#allocation39_spill] sm:$0xff] (%p1632_p9)  ;;  %v7848_v13 = vld [vmem:[#allocation40_spill] sm:$0xff] (%p1632_p9)  ;;  %2254 = vxpose.xlu1.b32.start [1/16] (%p1632_p9), %v6618_v48, 128  ;;  %v6678_v34 = vsub.f32 (%p1632_p9), %v6592_v59, %v7742_v45  ;;  %v6684_v32 = vsub.f32 (%p1632_p9), %v6588_v18, %v7744_v2  ;;  %v6688_v3 = vsub.f32 (%p1632_p9), %v6592_v59, %v7745_v37  ;;  %s4064_s6 = scalar_lea.vmem (%p1632_p9), %s2787_s24, 16  ;;  %s4068_s30 = scalar_lea.vmem (%p1632_p9), %s2787_s24, 32 }
 0x5d4   :  { %2633 = vst [vmem:[#allocation15 + $0x48] sm:$0xff] (%p1632_p9), %v7847_v27  ;;  %2634 = vst [vmem:[#allocation15 + $0x50] sm:$0xff] (%p1632_p9), %v7848_v13  ;;  %v7849_v22 = vld [vmem:[#allocation41_spill] sm:$0xff] (%p1632_p9)  ;;  %v7850_v58 = vld [vmem:[#allocation42_spill] sm:$0xff] (%p1632_p9)  ;;  %v6694_v45 = vsub.f32 (%p1632_p9), %v6588_v18, %v7747_v21  ;;  %v6698_v20 = vsub.f32 (%p1632_p9), %v6592_v59, %v7750_v42  ;;  %v6704_v2 = vsub.f32 (%p1632_p9), %v6588_v18, %v7752_v33  ;;  %3790 = vpow2.f32 (%p1632_p9), %v2176_v63  ;;  %p4065_p10 = scmp.ne.s32.totalorder (%p1632_p9), %s2787_s24, %s4064_s6  ;;  %p4070_p12 = scmp.lt.s32.totalorder (%p1632_p9), %s4068_s30, %s4064_s6 }
 0x5d5   :  { %2635 = vst [vmem:[#allocation15 + $0x58] sm:$0xff] (%p1632_p9), %v7849_v22  ;;  %2636 = vst [vmem:[#allocation15 + $0x60] sm:$0xff] (%p1632_p9), %v7850_v58  ;;  %v7851_v62 = vld [vmem:[#allocation57_spill] sm:$0xff] (%p1632_p9)  ;;  %v7852_v7 = vld [vmem:[#allocation59_spill] sm:$0xff] (%p1632_p9)  ;;  %v6708_v37 = vsub.f32 (%p1632_p9), %v6592_v59, %v7753_v4  ;;  %v6714_v21 = vsub.f32 (%p1632_p9), %v6588_v18, %v7755_v26  ;;  %v6718_v42 = vsub.f32 (%p1632_p9), %v6592_v59, %v7756_v23  ;;  %3792 = vpow2.f32 (%p1632_p9), %v2174_v46 }
 0x5d6   :  { %2637 = vst [vmem:[#allocation15 + $0x68] sm:$0xff] %v7851_v62  ;;  %2638 = vst [vmem:[#allocation15 + $0x70] sm:$0xff] %v7852_v7  ;;  %v7853_v57 = vld [vmem:[#allocation61_spill] sm:$0xff]  ;;  %v7854_v0 = vld [vmem:[#allocation68_spill] sm:$0xff]  ;;  %v6724_v4 = vsub.f32 %v6588_v18, %v7758_v9  ;;  %v6728_v33 = vsub.f32 %v6592_v59, %v7759_v49  ;;  %p4071_p13 = por %p4070_p12, %p4069_p11 }
 0x5d7   :  { %2639 = vst [vmem:[#allocation15 + $0x78] sm:$0xff] %v7853_v57  ;;  %2641 = vst [vmem:[#allocation18] sm:$0x1] %v7854_v0  ;;  %v7855_v16 = vld [vmem:[#allocation77_spill] sm:$0xff]  ;;  %v7856_v12 = vld [vmem:[#allocation78_spill] sm:$0xff]  ;;  %2255 = vxpose.xlu1.b32.cont [2/16] %v6628_v56, 128 }
 0x5d8   :  { %v6614_v11 = vsub.f32 %v6588_v18, %v7855_v16  ;;  %v6624_v44 = vsub.f32 %v6588_v18, %v7856_v12  ;;  %v7857_v39 = vld [vmem:[#allocation79_spill] sm:$0xff]  ;;  %v7858_v50 = vld [vmem:[#allocation80_spill] sm:$0xff]  ;;  %v7859_v61 = vld [vmem:[#allocation81_spill] sm:$0xff]  ;;  %p4072_p0 = pnand %p4071_p13, %p4065_p10 }
 0x5d9   :  { %v6634_v52 = vsub.f32 %v6588_v18, %v7857_v39  ;;  %v6644_v31 = vsub.f32 %v6588_v18, %v7858_v50  ;;  %v6654_v6 = vsub.f32 %v6588_v18, %v7859_v61  ;;  %v7860_v17 = vld [vmem:[#allocation82_spill] sm:$0xff]  ;;  %v7861_v5 = vld [vmem:[#allocation83_spill] sm:$0xff]  ;;  %v7862_v26 = vld [vmem:[#allocation84_spill] sm:$0xff] }
 0x5da   :  { %2222 = vxpose.xlu0.b32.start [1/16] %v6614_v11, 128  ;;  %v6664_v47 = vsub.f32 %v6588_v18, %v7860_v17  ;;  %v6674_v51 = vsub.f32 %v6588_v18, %v7861_v5  ;;  %v6734_v23 = vsub.f32 %v6588_v18, %v7862_v26  ;;  %v7863_v15 = vld [vmem:[#allocation85_spill] sm:$0xff]  ;;  %v7864_v9 = vld [vmem:[#allocation86_spill] sm:$0xff]  ;;  %v7865_v30 = vld [vmem:[#allocation87_spill] sm:$0xff] }
 0x5db   :  { %2256 = vxpose.xlu1.b32.cont [3/16] %v6638_v55, 128  ;;  %v6738_v40 = vsub.f32 %v6592_v59, %v7863_v15  ;;  %v6744_v49 = vsub.f32 %v6588_v18, %v7864_v9  ;;  %v6748_v25 = vsub.f32 %v6592_v59, %v7865_v30  ;;  %v7867_v36 = vld [vmem:[#allocation88_spill] sm:$0xff]  ;;  %v7869_v14 = vld [vmem:[#allocation89_spill] sm:$0xff]  ;;  %v7871_v29 = vld [vmem:[#allocation90_spill] sm:$0xff] }
 0x5dc   :  { %v6754_v54 = vsub.f32 %v6588_v18, %v7867_v36  ;;  %v6758_v41 = vsub.f32 %v6592_v59, %v7869_v14  ;;  %v6764_v24 = vsub.f32 %v6588_v18, %v7871_v29  ;;  %v7873_v1 = vld [vmem:[#allocation91_spill] sm:$0xff] }
 0x5dd   :  { %7866 = vst [vmem:[#allocation50_spill] sm:$0xff] %v6748_v25  ;;  %v6768_v60 = vsub.f32 %v6592_v59, %v7873_v1 }
 0x5de   :  { %2223 = vxpose.xlu0.b32.cont [2/16] %v6624_v44, 128  ;;  %7868 = vst [vmem:[#allocation67_spill] sm:$0xff] %v6754_v54  ;;  %7870 = vst [vmem:[#allocation69_spill] sm:$0xff] %v6758_v41  ;;  %v3791_v43 = vpop.eup %3790 }
 0x5df   :  { %2257 = vxpose.xlu1.b32.cont [4/16] %v6648_v10, 128  ;;  %7872 = vst [vmem:[#allocation70_spill] sm:$0xff] %v6764_v24  ;;  %7874 = vst [vmem:[#allocation71_spill] sm:$0xff] %v6768_v60  ;;  %v3793_v18 = vpop.eup %3792 }
 0x5e0   :  { %2623 = vst [vmem:[#allocation13] sm:$0x1] %v3791_v43 }
 0x5e2   :  { %2224 = vxpose.xlu0.b32.cont [3/16] %v6634_v52, 128 }
 0x5e3   :  { %2258 = vxpose.xlu1.b32.cont [5/16] %v6658_v38, 128 }
 0x5e6   :  { %2225 = vxpose.xlu0.b32.cont [4/16] %v6644_v31, 128 }
 0x5e7   :  { %2259 = vxpose.xlu1.b32.cont [6/16] %v6668_v53, 128 }
 0x5ea   :  { %2226 = vxpose.xlu0.b32.cont [5/16] %v6654_v6, 128 }
 0x5eb   :  { %2260 = vxpose.xlu1.b32.cont [7/16] %v6678_v34, 128 }
 0x5ee   :  { %2227 = vxpose.xlu0.b32.cont [6/16] %v6664_v47, 128 }
 0x5ef   :  { %2261 = vxpose.xlu1.b32.cont [8/16] %v6688_v3, 128 }
 0x5f2   :  { %2228 = vxpose.xlu0.b32.cont [7/16] %v6674_v51, 128 }
 0x5f3   :  { %2262 = vxpose.xlu1.b32.cont [9/16] %v6698_v20, 128 }
 0x5f6   :  { %2229 = vxpose.xlu0.b32.cont [8/16] %v6684_v32, 128 }
 0x5f7   :  { %2263 = vxpose.xlu1.b32.cont [10/16] %v6708_v37, 128 }
 0x5fa   :  { %2230 = vxpose.xlu0.b32.cont [9/16] %v6694_v45, 128 }
 0x5fb   :  { %2264 = vxpose.xlu1.b32.cont [11/16] %v6718_v42, 128 }
 0x5fe   :  { %2231 = vxpose.xlu0.b32.cont [10/16] %v6704_v2, 128 }
 0x5ff   :  { %2265 = vxpose.xlu1.b32.cont [12/16] %v6728_v33, 128 }
 0x602   :  { %2232 = vxpose.xlu0.b32.cont [11/16] %v6714_v21, 128 }
 0x603   :  { %2266 = vxpose.xlu1.b32.cont [13/16] %v6738_v40, 128 }
 0x606   :  { %2233 = vxpose.xlu0.b32.cont [12/16] %v6724_v4, 128 }
 0x607   :  { %2267 = vxpose.xlu1.b32.cont [14/16] %v6748_v25, 128 }
 0x60a   :  { %2234 = vxpose.xlu0.b32.cont [13/16] %v6734_v23, 128 }
 0x60b   :  { %2268 = vxpose.xlu1.b32.cont [15/16] %v6758_v41, 128 }
 0x60e   :  { %2235 = vxpose.xlu0.b32.cont [14/16] %v6744_v49, 128 }
 0x60f   :  { %2269 = vxpose.xlu1.b32.end [16/16] %v6768_v60, 128 }
 0x612   :  { %2236 = vxpose.xlu0.b32.cont [15/16] %v6754_v54, 128 }
 0x616   :  { %2237 = vxpose.xlu0.b32.end [16/16] %v6764_v24, 128 }
 0x617   :  { %4075 = shalt.err (!%p4072_p0)
}
 0x618   :  { %s4076_s0 = scalar_lea.hbm %s7348_s14, 16 }
 0x619   :  { %p4077_p1 = scmp.ne.s32.totalorder %s7348_s14, %s4076_s0  ;;  %p4080_p2 = scmp.lt.u32.totalorder %s4076_s0, %s7348_s14 }
 0x61b   :  { %p4082_p3 = pnand %p4080_p2, %p4077_p1 }
 0x61d   :  { %4085 = shalt.err (!%p4082_p3)
}
 0x61e   :  { %2789 = dma.vmem_to_hbm [thread:$0]  %s2787_s24, 16, %s7348_s14, [#allocation14]   ;;  %2622 = vst [vmem:[#allocation12] sm:$0x1] %v3793_v18  ;;  %v7875_v59 = vld [vmem:[#allocation56_spill] sm:$0xff] }
 0x61f   :  { %v2286_v35 = vadd.f32 %v6614_v11, %v7875_v59  ;;  %v2478_v19 = vadd.f32 %v6618_v48, %v7875_v59  ;;  %s4086_s7 = scalar_lea.vmem %s6774_s9, 16  ;;  %s4090_s8 = scalar_lea.vmem %s6774_s9, 32 }
 0x620   :  { %p4087_p4 = scmp.ne.s32.totalorder %s6774_s9, %s4086_s7  ;;  %p4091_p5 = scmp.lt.s32.totalorder %s6774_s9, %s6774_s9 }
 0x621   :  { %p4092_p6 = scmp.lt.s32.totalorder %s4090_s8, %s4086_s7 }
 0x623   :  { %p4093_p7 = por %p4092_p6, %p4091_p5 }
 0x625   :  { %p4094_p8 = pnand %p4093_p7, %p4087_p4 }
 0x627   :  { %4097 = shalt.err (!%p4094_p8)
}
 0x628   :  { %s4098_s14 = scalar_lea.hbm %s7350_s16, 16 }
 0x629   :  { %p4099_p9 = scmp.ne.s32.totalorder %s7350_s16, %s4098_s14  ;;  %p4102_p10 = scmp.lt.u32.totalorder %s4098_s14, %s7350_s16 }
 0x62b   :  { %p4104_p11 = pnand %p4102_p10, %p4099_p9 }
 0x62d   :  { %4107 = shalt.err (!%p4104_p11)
}
 0x62e   :  { %2811 = dma.vmem_to_hbm [thread:$0]  %s6774_s9, 16, %s7350_s16, [#allocation17]   ;;  %v7876_v27 = vld [vmem:[#allocation51_spill] sm:$0xff]  ;;  %v7878_v39 = vld [vmem:[#allocation36_spill] sm:$0xff]  ;;  %v7881_v18 = vld [vmem:[#allocation45_spill] sm:$0xff] }
 0x62f   :  { %v2287_v13 = vadd.f32 %v6624_v44, %v7876_v27  ;;  %v2479_v22 = vadd.f32 %v6628_v56, %v7876_v27  ;;  %v7877_v0 = vld [vmem:[#allocation35_spill] sm:$0xff]  ;;  %v6826_v50 = vadd.f32 %v6644_v31, %v7878_v39  ;;  %v6830_v61 = vadd.f32 %v6648_v10, %v7878_v39  ;;  %s4593_s16 = smov [#allocation12]   ;;  %s4594_s6 = smov [#allocation15]   ;;  %v7880_v14 = vld [vmem:[#allocation44_spill] sm:$0xff] }
 0x630   :  { %v6818_v16 = vadd.f32 %v6634_v52, %v7877_v0  ;;  %v6822_v12 = vadd.f32 %v6638_v55, %v7877_v0  ;;  %v7879_v5 = vld [vmem:[#allocation43_spill] sm:$0xff]  ;;  %s2776_s9 = sshll.u32 %s4593_s16, 4  ;;  %s2795_s30 = sshll.u32 %s4594_s6, 4  ;;  %v6844_v29 = vadd.f32 %v6664_v47, %v7880_v14  ;;  %v6848_v1 = vadd.f32 %v6668_v53, %v7880_v14  ;;  %s2777_s9 = int_to_ptr.vmem [resolvable:$true] %s2776_s9  ;;  %s6850_s30 = int_to_ptr.vmem [resolvable:$true] %s2795_s30 }
 0x631   :  { %v6836_v26 = vadd.f32 %v6654_v6, %v7879_v5  ;;  %v6840_v36 = vadd.f32 %v6658_v38, %v7879_v5  ;;  %s4108_s2 = scalar_lea.vmem %s2777_s9, 16  ;;  %s4112_s26 = scalar_lea.vmem %s2777_s9, 32 }
 0x632   :  { %p4109_p12 = scmp.ne.s32.totalorder %s2777_s9, %s4108_s2  ;;  %p4113_p13 = scmp.lt.s32.totalorder %s2777_s9, %s2777_s9 }
 0x633   :  { %p4114_p0 = scmp.lt.s32.totalorder %s4112_s26, %s4108_s2 }
 0x635   :  { %p4115_p1 = por %p4114_p0, %p4113_p13 }
 0x637   :  { %p4116_p2 = pnand %p4115_p1, %p4109_p12 }
 0x653   :  { %v2270_v8 = vpop.trf.xlu1 }
 0x654   :  { %v2414_v7 = vadd.f32 %v2270_v8, %v6614_v11  ;;  %v2494_v57 = vadd.f32 %v2478_v19, %v2270_v8 }
 0x656   :  { %v2430_v17 = vsub.f32 %v2414_v7, %v7875_v59  ;;  %v2510_v15 = vmul.f32 1.442695, %v2494_v57 }
 0x657   :  { %v2271_v30 = vpop.trf.xlu1 }
 0x658   :  { %v2446_v46 = vmul.f32 1.442695, %v2430_v17 }
 0x65a   :  { %v2238_v28 = vpop.trf.xlu0 }
 0x65b   :  { %v2302_v58 = vadd.f32 %v2286_v35, %v2238_v28  ;;  %v2350_v62 = vadd.f32 %v2238_v28, %v6618_v48 }
 0x65d   :  { %v2318_v48 = vmul.f32 1.442695, %v2302_v58  ;;  %v2366_v11 = vsub.f32 %v2350_v62, %v7875_v59  ;;  %v6854_v59 = vadd.f32 %v6674_v51, %v7881_v18 }
 0x65e   :  { %v2239_v9 = vpop.trf.xlu0 }
 0x65f   :  { %v2382_v63 = vmul.f32 1.442695, %v2366_v11  ;;  %v2303_v43 = vadd.f32 %v2287_v13, %v2239_v9 }
 0x660   :  { %4119 = shalt.err (!%p4116_p2)
}
 0x661   :  { %s4120_s1 = scalar_lea.hbm %s7347_s13, 16 }
 0x662   :  { %p4121_p3 = scmp.ne.s32.totalorder %s7347_s13, %s4120_s1  ;;  %p4124_p4 = scmp.lt.u32.totalorder %s4120_s1, %s7347_s13 }
 0x664   :  { %p4126_p5 = pnand %p4124_p4, %p4121_p3 }
 0x666   :  { %4129 = shalt.err (!%p4126_p5)
}
 0x667   :  { %2779 = dma.vmem_to_hbm [thread:$0]  %s2777_s9, 16, %s7347_s13, [#allocation5]   ;;  %3794 = vpow2.f32 %v2318_v48  ;;  %v2351_v35 = vadd.f32 %v2239_v9, %v6628_v56  ;;  %v2415_v19 = vadd.f32 %v2271_v30, %v6624_v44  ;;  %v2495_v28 = vadd.f32 %v2479_v22, %v2271_v30 }
 0x668   :  { %s4130_s5 = scalar_lea.vmem %s6850_s30, 2048  ;;  %p4135_p7 = scmp.lt.s32.totalorder %s6850_s30, %s6850_s30 }
 0x669   :  { %p4131_p6 = scmp.ne.s32.totalorder %s6850_s30, %s4130_s5  ;;  %p4136_p8 = scmp.lt.s32.totalorder %s4130_s5, %s4130_s5 }
 0x66b   :  { %p4137_p9 = por %p4136_p8, %p4135_p7 }
 0x66d   :  { %p4138_p10 = pnand %p4137_p9, %p4131_p6 }
 0x66f   :  { %4141 = shalt.err (!%p4138_p10)
}
 0x670   :  { %s4142_s22 = scalar_lea.hbm %s7349_s15, 2048 }
 0x671   :  { %p4143_p11 = scmp.ne.s32.totalorder %s7349_s15, %s4142_s22  ;;  %p4146_p12 = scmp.lt.u32.totalorder %s4142_s22, %s7349_s15 }
 0x673   :  { %p4148_p13 = pnand %p4146_p12, %p4143_p11 }
 0x675   :  { %4151 = shalt.err (!%p4148_p13)
}
 0x676   :  { %s4595_s24 = smov 128   ;;  %s4596_s25 = smov 8   ;;  %3796 = vpow2.f32 %v2382_v63  ;;  %v2320_v44 = vmul.f32 1.442695, %v2303_v43  ;;  %v6892_v56 = vadd.f32 %v6678_v34, %v7881_v18  ;;  %v7882_v8 = vld [vmem:[#allocation46_spill] sm:$0xff]  ;;  %v2367_v22 = vsub.f32 %v2351_v35, %v7876_v27  ;;  %v2240_v7 = vpop.trf.xlu0  ;;  %v2272_v57 = vpop.trf.xlu1 }
 0x677   :  { %2801 = dma.vmem_to_hbm [thread:$0]  %s6850_s30, 2048, %s7349_s15, [#allocation14], %s4595_s24, %s4595_s24, %s4596_s25   ;;  %v6896_v13 = vadd.f32 %v6684_v32, %v7882_v8  ;;  %3798 = vpow2.f32 %v2446_v46  ;;  %v2431_v58 = vsub.f32 %v2415_v19, %v7876_v27  ;;  %v2512_v62 = vmul.f32 1.442695, %v2495_v28 }
 0x678   :  { %s4597_s6 = smov [#allocation18]   ;;  %3800 = vpow2.f32 %v2510_v15  ;;  %v2304_v48 = vadd.f32 %v6818_v16, %v2240_v7  ;;  %v2352_v11 = vadd.f32 %v2240_v7, %v6638_v55  ;;  %v2416_v17 = vadd.f32 %v2272_v57, %v6634_v52 }
 0x679   :  { %s2818_s15 = sshll.u32 %s4597_s6, 4  ;;  %3802 = vpow2.f32 %v2320_v44  ;;  %v2384_v9 = vmul.f32 1.442695, %v2367_v22  ;;  %v2448_v30 = vmul.f32 1.442695, %v2431_v58  ;;  %v2496_v63 = vadd.f32 %v6822_v12, %v2272_v57  ;;  %s2819_s15 = int_to_ptr.vmem [resolvable:$true] %s2818_s15 }
 0x67a   :  { %s4152_s30 = scalar_lea.vmem %s2819_s15, 16  ;;  %s4156_s2 = scalar_lea.vmem %s2819_s15, 32 }
 0x67b   :  { %p4153_p0 = scmp.ne.s32.totalorder %s2819_s15, %s4152_s30  ;;  %p4157_p1 = scmp.lt.s32.totalorder %s2819_s15, %s2819_s15 }
 0x67c   :  { %p4158_p2 = scmp.lt.s32.totalorder %s4156_s2, %s4152_s30 }
 0x67e   :  { %p4159_p3 = por %p4158_p2, %p4157_p1 }
 0x680   :  { %p4160_p4 = pnand %p4159_p3, %p4153_p0 }
 0x682   :  { %4163 = shalt.err (!%p4160_p4)
}
 0x683   :  { %s4164_s29 = scalar_lea.hbm %s7351_s17, 16 }
 0x684   :  { %p4165_p5 = scmp.ne.s32.totalorder %s7351_s17, %s4164_s29  ;;  %p4168_p6 = scmp.lt.u32.totalorder %s4164_s29, %s7351_s17 }
 0x686   :  { %p4170_p7 = pnand %p4168_p6, %p4165_p5 }
 0x688   :  { %4173 = shalt.err (!%p4170_p7)
}
 0x689   :  { %2821 = dma.vmem_to_hbm [thread:$0]  %s2819_s15, 16, %s7351_s17, [#allocation17]   ;;  %3804 = vpow2.f32 %v2512_v62  ;;  %v2322_v52 = vmul.f32 1.442695, %v2304_v48  ;;  %v2368_v55 = vsub.f32 %v2352_v11, %v7877_v0  ;;  %v2432_v27 = vsub.f32 %v2416_v17, %v7877_v0  ;;  %v2241_v12 = vpop.trf.xlu0  ;;  %v2273_v15 = vpop.trf.xlu1  ;;  %v7883_v43 = vld [vmem:[#allocation47_spill] sm:$0xff]  ;;  %v7884_v57 = vld [vmem:[#allocation48_spill] sm:$0xff] }
 0x68a   :  { %3806 = vpow2.f32 %v2384_v9  ;;  %v2514_v16 = vmul.f32 1.442695, %v2496_v63  ;;  %v6920_v46 = vadd.f32 %v6688_v3, %v7882_v8  ;;  %v6924_v35 = vadd.f32 %v6694_v45, %v7883_v43  ;;  %v6938_v11 = vpop.eup %3794  ;;  %s4598_s17 = smov [#allocation19]   ;;  %s4599_s5 = smov [#allocation22]  }
 0x68b   :  { %3808 = vpow2.f32 %v2448_v30  ;;  %v2386_v19 = vmul.f32 1.442695, %v2368_v55  ;;  %v2450_v28 = vmul.f32 1.442695, %v2432_v27  ;;  %v2305_v44 = vadd.f32 %v6826_v50, %v2241_v12  ;;  %v6942_v9 = vpop.eup %3796  ;;  %s2827_s8 = sshll.u32 %s4598_s17, 4  ;;  %s2851_s28 = sshll.u32 %s4599_s5, 4  ;;  %s2828_s8 = int_to_ptr.vmem [resolvable:$true] %s2827_s8  ;;  %s7253_s28 = int_to_ptr.vmem [resolvable:$true] %s2851_s28 }
 0x68c   :  { %3810 = vpow2.f32 %v2322_v52  ;;  %v2353_v0 = vadd.f32 %v2241_v12, %v6648_v10  ;;  %v2417_v22 = vadd.f32 %v2273_v15, %v6644_v31  ;;  %v2497_v58 = vadd.f32 %v6830_v61, %v2273_v15  ;;  %v6947_v55 = vpop.eup %3798  ;;  %s4600_s14 = smov [#allocation21]   ;;  %s4601_s27 = smov [#allocation24]  }
 0x68d   :  { %3812 = vpow2.f32 %v2386_v19  ;;  %v2324_v62 = vmul.f32 1.442695, %v2305_v44  ;;  %v6932_v7 = vadd.f32 %v6698_v20, %v7883_v43  ;;  %v6936_v48 = vadd.f32 %v6704_v2, %v7884_v57  ;;  %v2242_v17 = vpop.trf.xlu0  ;;  %v2274_v61 = vpop.trf.xlu1  ;;  %s2839_s22 = sshll.u32 %s4600_s14, 4  ;;  %s2863_s13 = sshll.u32 %s4601_s27, 4  ;;  %s7255_s22 = int_to_ptr.vmem [resolvable:$true] %s2839_s22  ;;  %s7257_s13 = int_to_ptr.vmem [resolvable:$true] %s2863_s13 }
 0x68e   :  { %3814 = vpow2.f32 %v2450_v28  ;;  %v2369_v50 = vsub.f32 %v2353_v0, %v7878_v39  ;;  %v2433_v10 = vsub.f32 %v2417_v22, %v7878_v39  ;;  %v2516_v31 = vmul.f32 1.442695, %v2497_v58  ;;  %v6951_v15 = vpop.eup %3800  ;;  %s4174_s4 = scalar_lea.vmem %s2828_s8, 2048  ;;  %p4179_p9 = scmp.lt.s32.totalorder %s2828_s8, %s2828_s8 }
 0x68f   :  { %3816 = vpow2.f32 %v2514_v16  ;;  %v2306_v30 = vadd.f32 %v6836_v26, %v2242_v17  ;;  %v2354_v63 = vadd.f32 %v2242_v17, %v6658_v38  ;;  %v2418_v52 = vadd.f32 %v2274_v61, %v6654_v6  ;;  %v6955_v28 = vpop.eup %3802  ;;  %p4175_p8 = scmp.ne.s32.totalorder %s2828_s8, %s4174_s4  ;;  %p4180_p10 = scmp.lt.s32.totalorder %s4174_s4, %s4174_s4 }
 0x690   :  { %v2542_v27 = vadd.f32 %v6942_v9, %v6938_v11  ;;  %3818 = vpow2.f32 %v2324_v62  ;;  %v2388_v12 = vmul.f32 1.442695, %v2369_v50  ;;  %v2452_v39 = vmul.f32 1.442695, %v2433_v10 }
 0x691   :  { %3820 = vpow2.f32 %v2516_v31  ;;  %v2326_v19 = vmul.f32 1.442695, %v2306_v30  ;;  %v2370_v16 = vsub.f32 %v2354_v63, %v7879_v5  ;;  %v2434_v26 = vsub.f32 %v2418_v52, %v7879_v5  ;;  %v2243_v44 = vpop.trf.xlu0  ;;  %v2275_v0 = vpop.trf.xlu1  ;;  %p4181_p11 = por %p4180_p10, %p4179_p9 }
 0x692   :  { %v2558_v6 = vadd.f32 %v6947_v55, %v2542_v27  ;;  %3822 = vpow2.f32 %v2388_v12  ;;  %v2498_v38 = vadd.f32 %v6840_v36, %v2274_v61  ;;  %v6961_v22 = vadd.f32 %v6708_v37, %v7884_v57 }
 0x693   :  { %v6963_v58 = vpop.eup %3804  ;;  %3824 = vpow2.f32 %v2452_v39  ;;  %v2390_v62 = vmul.f32 1.442695, %v2370_v16  ;;  %v2454_v50 = vmul.f32 1.442695, %v2434_v26  ;;  %v2307_v5 = vadd.f32 %v6844_v29, %v2243_v44  ;;  %v7885_v16 = vld [vmem:[#allocation58_spill] sm:$0xff]  ;;  %p4182_p12 = pnand %p4181_p11, %p4175_p8 }
 0x694   :  { %v6966_v10 = vpop.eup %3806  ;;  %v2574_v31 = vadd.f32 %v6951_v15, %v2558_v6  ;;  %3826 = vpow2.f32 %v2326_v19  ;;  %v2518_v17 = vmul.f32 1.442695, %v2498_v38  ;;  %v2355_v36 = vadd.f32 %v2243_v44, %v6668_v53 }
 0x695   :  { %v6970_v61 = vpop.eup %3808  ;;  %v2543_v30 = vadd.f32 %v6966_v10, %v6955_v28  ;;  %3828 = vpow2.f32 %v2390_v62  ;;  %v2328_v63 = vmul.f32 1.442695, %v2307_v5  ;;  %v2419_v52 = vadd.f32 %v2275_v0, %v6664_v47  ;;  %v2244_v39 = vpop.trf.xlu0 }
 0x696   :  { %v6975_v27 = vpop.eup %3810  ;;  %3830 = vrcp.f32 %v2574_v31  ;;  %v2371_v29 = vsub.f32 %v2355_v36, %v7880_v14  ;;  %v2499_v12 = vadd.f32 %v6848_v1, %v2275_v0  ;;  %v2276_v19 = vpop.trf.xlu1  ;;  %v6981_v53 = vadd.f32 %v6714_v21, %v7885_v16 }
 0x697   :  { %v6983_v26 = vpop.eup %3812  ;;  %v2559_v6 = vadd.f32 %v6970_v61, %v2543_v30  ;;  %3832 = vpow2.f32 %v2454_v50  ;;  %v2435_v47 = vsub.f32 %v2419_v52, %v7880_v14  ;;  %v2308_v38 = vadd.f32 %v6854_v59, %v2244_v39 }
 0x698   :  { %v6988_v44 = vpop.eup %3814  ;;  %v2544_v1 = vadd.f32 %v6983_v26, %v6975_v27  ;;  %3834 = vpow2.f32 %v2518_v17  ;;  %v2392_v0 = vmul.f32 1.442695, %v2371_v29  ;;  %v2520_v62 = vmul.f32 1.442695, %v2499_v12 }
 0x699   :  { %v6992_v5 = vpop.eup %3816  ;;  %v2575_v31 = vadd.f32 %v6963_v58, %v2559_v6  ;;  %3836 = vpow2.f32 %v2328_v63  ;;  %v2456_v36 = vmul.f32 1.442695, %v2435_v47  ;;  %v2330_v30 = vmul.f32 1.442695, %v2308_v38  ;;  %v2245_v60 = vpop.trf.xlu0 }
 0x69a   :  { %v6995_v50 = vpop.eup %3818  ;;  %v2560_v14 = vadd.f32 %v6988_v44, %v2544_v1  ;;  %3838 = vpow2.f32 %v2392_v0  ;;  %v2356_v59 = vadd.f32 %v2244_v39, %v6678_v34  ;;  %v2420_v52 = vadd.f32 %v2276_v19, %v6674_v51  ;;  %v2277_v17 = vpop.trf.xlu1 }
 0x69b   :  { %v7000_v29 = vpop.eup %3820  ;;  %3840 = vrcp.f32 %v2575_v31  ;;  %v2500_v12 = vadd.f32 %v6892_v56, %v2276_v19  ;;  %v2309_v63 = vadd.f32 %v6896_v13, %v2245_v60  ;;  %v2357_v6 = vadd.f32 %v2245_v60, %v6688_v3  ;;  %v7886_v3 = vld [vmem:[#allocation60_spill] sm:$0xff] }
 0x69c   :  { %v7005_v47 = vpop.eup %3822  ;;  %v2576_v38 = vadd.f32 %v6992_v5, %v2560_v14  ;;  %3842 = vpow2.f32 %v2456_v36  ;;  %v2372_v34 = vsub.f32 %v2356_v59, %v7881_v18  ;;  %v2436_v51 = vsub.f32 %v2420_v52, %v7881_v18 }
 0x69d   :  { %v7010_v39 = vpop.eup %3824  ;;  %v2545_v1 = vadd.f32 %v7005_v47, %v6995_v50  ;;  %3844 = vpow2.f32 %v2520_v62  ;;  %v7016_v56 = vadd.f32 %v6718_v42, %v7885_v16  ;;  %v7020_v60 = vadd.f32 %v6724_v4, %v7886_v3  ;;  %v2246_v18 = vpop.trf.xlu0 }
 0x69e   :  { %v7022_v13 = vpop.eup %3826  ;;  %3846 = vrcp.f32 %v2576_v38  ;;  %v2394_v19 = vmul.f32 1.442695, %v2372_v34  ;;  %v2458_v0 = vmul.f32 1.442695, %v2436_v51  ;;  %v7026_v31 = vadd.f32 %v6728_v33, %v7886_v3  ;;  %v2278_v52 = vpop.trf.xlu1 }
 0x69f   :  { %v7028_v36 = vpop.eup %3828  ;;  %v2561_v62 = vadd.f32 %v7010_v39, %v2545_v1  ;;  %3848 = vpow2.f32 %v2330_v30  ;;  %v2522_v14 = vmul.f32 1.442695, %v2500_v12  ;;  %v2421_v59 = vadd.f32 %v2277_v17, %v6684_v32 }
 0x6a0   :  { %7887 = vst [vmem:[#allocation65_spill] sm:$0xff] %v7026_v31  ;;  %v3831_v24 = vpop.eup %3830  ;;  %v2546_v38 = vadd.f32 %v7028_v36, %v7022_v13  ;;  %3850 = vpow2.f32 %v2394_v19  ;;  %v2332_v34 = vmul.f32 1.442695, %v2309_v63  ;;  %v2373_v51 = vsub.f32 %v2357_v6, %v7882_v8 }
 0x6a1   :  { %v7035_v41 = vpop.eup %3832  ;;  %v2642_v54 = vmul.f32 %v3831_v24, %v6938_v11  ;;  %v2674_v31 = vmul.f32 %v3831_v24, %v6942_v9  ;;  %v2706_v30 = vmul.f32 %v3831_v24, %v6947_v55  ;;  %v2738_v12 = vmul.f32 %v3831_v24, %v6951_v15  ;;  %v2247_v6 = vpop.trf.xlu0 }
 0x6a2   :  { %v7041_v32 = vpop.eup %3834  ;;  %v2577_v1 = vadd.f32 %v7000_v29, %v2561_v62  ;;  %v2562_v25 = vadd.f32 %v7035_v41, %v2546_v38  ;;  %3852 = vpow2.f32 %v2458_v0  ;;  %v2437_v63 = vsub.f32 %v2421_v59, %v7882_v8 }
 0x6a3   :  { %v7046_v19 = vpop.eup %3836  ;;  %2658 = vst [vmem:[#allocation19] sm:$0xff] %v2642_v54  ;;  %2690 = vst [vmem:[#allocation21] sm:$0xff] %v2674_v31  ;;  %3854 = vpow2.f32 %v2522_v14  ;;  %v2501_v11 = vadd.f32 %v6920_v46, %v2277_v17  ;;  %v2310_v24 = vadd.f32 %v6924_v35, %v2246_v18  ;;  %v2358_v9 = vadd.f32 %v2246_v18, %v6698_v20  ;;  %v2279_v17 = vpop.trf.xlu1 }
 0x6a4   :  { %2722 = vst [vmem:[#allocation22] sm:$0xff] %v2706_v30  ;;  %2754 = vst [vmem:[#allocation24] sm:$0xff] %v2738_v12  ;;  %v7051_v55 = vpop.eup %3838  ;;  %3856 = vrcp.f32 %v2577_v1  ;;  %v2578_v15 = vadd.f32 %v7041_v32, %v2562_v25  ;;  %v2396_v8 = vmul.f32 1.442695, %v2373_v51  ;;  %v2422_v0 = vadd.f32 %v2278_v52, %v6694_v45 }
 0x6a5   :  { %v3841_v62 = vpop.eup %3840  ;;  %v2547_v54 = vadd.f32 %v7051_v55, %v7046_v19  ;;  %3858 = vpow2.f32 %v2332_v34  ;;  %v2460_v31 = vmul.f32 1.442695, %v2437_v63  ;;  %v2374_v46 = vsub.f32 %v2358_v9, %v7883_v43 }
 0x6a6   :  { %v7058_v35 = vpop.eup %3842  ;;  %v2643_v20 = vmul.f32 %v3841_v62, %v6955_v28  ;;  %v2675_v18 = vmul.f32 %v3841_v62, %v6966_v10  ;;  %v2707_v25 = vmul.f32 %v3841_v62, %v6970_v61  ;;  %v2739_v14 = vmul.f32 %v3841_v62, %v6963_v58  ;;  %v2248_v58 = vpop.trf.xlu0 }
 0x6a7   :  { %v7064_v45 = vpop.eup %3844  ;;  %3860 = vrcp.f32 %v2578_v15  ;;  %v2563_v59 = vadd.f32 %v7058_v35, %v2547_v54  ;;  %v2524_v38 = vmul.f32 1.442695, %v2501_v11  ;;  %v2334_v34 = vmul.f32 1.442695, %v2310_v24 }
 0x6a8   :  { %v3847_v51 = vpop.eup %3846  ;;  %2659 = vst [vmem:[#allocation19 + $0x8] sm:$0xff] %v2643_v20  ;;  %2691 = vst [vmem:[#allocation21 + $0x8] sm:$0xff] %v2675_v18  ;;  %3862 = vpow2.f32 %v2396_v8  ;;  %v2438_v28 = vsub.f32 %v2422_v0, %v7883_v43  ;;  %v2502_v10 = vadd.f32 %v6932_v7, %v2278_v52  ;;  %v2359_v61 = vadd.f32 %v2247_v6, %v6708_v37 }
 0x6a9   :  { %2723 = vst [vmem:[#allocation22 + $0x8] sm:$0xff] %v2707_v25  ;;  %2755 = vst [vmem:[#allocation24 + $0x8] sm:$0xff] %v2739_v14  ;;  %v7070_v30 = vpop.eup %3848  ;;  %v2644_v12 = vmul.f32 %v3847_v51, %v6975_v27  ;;  %v2676_v1 = vmul.f32 %v3847_v51, %v6983_v26  ;;  %v2708_v63 = vmul.f32 %v3847_v51, %v6988_v44  ;;  %3864 = vpow2.f32 %v2460_v31  ;;  %v2280_v26 = vpop.trf.xlu1  ;;  %v7888_v44 = vld [vmem:[#allocation62_spill] sm:$0xff] }
 0x6aa   :  { %v2740_v11 = vmul.f32 %v3847_v51, %v6992_v5  ;;  %v7076_v24 = vpop.eup %3850  ;;  %v2579_v9 = vadd.f32 %v7064_v45, %v2563_v59  ;;  %v2398_v43 = vmul.f32 1.442695, %v2374_v46  ;;  %v2311_v7 = vadd.f32 %v6936_v48, %v2247_v6  ;;  %v2249_v20 = vpop.trf.xlu0 }
 0x6ab   :  { %2660 = vst [vmem:[#allocation19 + $0x10] sm:$0xff] %v2644_v12  ;;  %2692 = vst [vmem:[#allocation21 + $0x10] sm:$0xff] %v2676_v1  ;;  %v2548_v37 = vadd.f32 %v7076_v24, %v7070_v30  ;;  %3866 = vpow2.f32 %v2524_v38  ;;  %v2423_v27 = vadd.f32 %v2279_v17, %v6704_v2  ;;  %v7085_v5 = vadd.f32 %v6734_v23, %v7888_v44  ;;  %v7889_v1 = vld [vmem:[#allocation63_spill] sm:$0xff] }
 0x6ac   :  { %2724 = vst [vmem:[#allocation22 + $0x10] sm:$0xff] %v2708_v63  ;;  %2756 = vst [vmem:[#allocation24 + $0x10] sm:$0xff] %v2740_v11  ;;  %v7087_v52 = vpop.eup %3852  ;;  %3868 = vrcp.f32 %v2579_v9  ;;  %v2462_v15 = vmul.f32 1.442695, %v2438_v28  ;;  %v2526_v48 = vmul.f32 1.442695, %v2502_v10  ;;  %v2375_v6 = vsub.f32 %v2359_v61, %v7884_v57 }
 0x6ad   :  { %v7090_v8 = vpop.eup %3854  ;;  %v2564_v0 = vadd.f32 %v7087_v52, %v2548_v37  ;;  %3870 = vpow2.f32 %v2334_v34  ;;  %v2439_v62 = vsub.f32 %v2423_v27, %v7884_v57  ;;  %v2360_v2 = vadd.f32 %v2248_v58, %v6718_v42 }
 0x6ae   :  { %v3857_v54 = vpop.eup %3856  ;;  %3872 = vpow2.f32 %v2398_v43  ;;  %v2336_v31 = vmul.f32 1.442695, %v2311_v7  ;;  %v2503_v46 = vadd.f32 %v6961_v22, %v2279_v17  ;;  %v7098_v18 = vadd.f32 %v6738_v40, %v7888_v44 }
 0x6af   :  { %v7100_v25 = vpop.eup %3858  ;;  %v2645_v14 = vmul.f32 %v3857_v54, %v6995_v50  ;;  %v2677_v59 = vmul.f32 %v3857_v54, %v7005_v47  ;;  %v2709_v57 = vmul.f32 %v3857_v54, %v7010_v39  ;;  %v2741_v42 = vmul.f32 %v3857_v54, %v7000_v29  ;;  %v2281_v39 = vpop.trf.xlu1 }
 0x6b0   :  { %v2580_v38 = vadd.f32 %v7090_v8, %v2564_v0  ;;  %3874 = vpow2.f32 %v2462_v15  ;;  %v2400_v34 = vmul.f32 1.442695, %v2375_v6  ;;  %v2312_v22 = vadd.f32 %v6981_v53, %v2248_v58 }
 0x6b1   :  { %v3861_v17 = vpop.eup %3860  ;;  %2661 = vst [vmem:[#allocation19 + $0x18] sm:$0xff] %v2645_v14  ;;  %2693 = vst [vmem:[#allocation21 + $0x18] sm:$0xff] %v2677_v59  ;;  %3876 = vpow2.f32 %v2526_v48  ;;  %v2464_v51 = vmul.f32 1.442695, %v2439_v62  ;;  %v2376_v50 = vsub.f32 %v2360_v2, %v7885_v16  ;;  %v2424_v47 = vadd.f32 %v2280_v26, %v6714_v21  ;;  %v7893_v59 = vld [vmem:[#allocation67_spill] sm:$0xff] }
 0x6b2   :  { %2725 = vst [vmem:[#allocation22 + $0x18] sm:$0xff] %v2709_v57  ;;  %2757 = vst [vmem:[#allocation24 + $0x18] sm:$0xff] %v2741_v42  ;;  %v7110_v28 = vpop.eup %3862  ;;  %v2646_v29 = vmul.f32 %v3861_v17, %v7022_v13  ;;  %v2678_v10 = vmul.f32 %v3861_v17, %v7028_v36  ;;  %v2710_v53 = vmul.f32 %v3861_v17, %v7035_v41  ;;  %3878 = vrcp.f32 %v2580_v38 }
 0x6b3   :  { %v2742_v61 = vmul.f32 %v3861_v17, %v7041_v32  ;;  %v2549_v58 = vadd.f32 %v7110_v28, %v7100_v25  ;;  %v2440_v12 = vsub.f32 %v2424_v47, %v7885_v16  ;;  %v7121_v21 = vadd.f32 %v6744_v49, %v7889_v1  ;;  %v7123_v63 = vpop.eup %3864  ;;  %v2250_v32 = vpop.trf.xlu0 }
 0x6b4   :  { %2662 = vst [vmem:[#allocation19 + $0x20] sm:$0xff] %v2646_v29  ;;  %2694 = vst [vmem:[#allocation21 + $0x20] sm:$0xff] %v2678_v10  ;;  %3880 = vpow2.f32 %v2336_v31  ;;  %v2528_v41 = vmul.f32 1.442695, %v2503_v46  ;;  %v2361_v13 = vadd.f32 %v2249_v20, %v6728_v33  ;;  %v2425_v36 = vadd.f32 %v2281_v39, %v6724_v4  ;;  %v2282_v62 = vpop.trf.xlu1  ;;  %v7891_v46 = vld [vmem:[#allocation65_spill] sm:$0xff] }
 0x6b5   :  { %2726 = vst [vmem:[#allocation22 + $0x20] sm:$0xff] %v2710_v53  ;;  %2758 = vst [vmem:[#allocation24 + $0x20] sm:$0xff] %v2742_v61  ;;  %v7127_v11 = vpop.eup %3866  ;;  %v2565_v16 = vadd.f32 %v7123_v63, %v2549_v58  ;;  %3882 = vpow2.f32 %v2400_v34  ;;  %v2338_v9 = vmul.f32 1.442695, %v2312_v22  ;;  %v2504_v43 = vadd.f32 %v7016_v56, %v2280_v26 }
 0x6b6   :  { %v3869_v7 = vpop.eup %3868  ;;  %3884 = vpow2.f32 %v2464_v51  ;;  %v2402_v37 = vmul.f32 1.442695, %v2376_v50  ;;  %v2466_v27 = vmul.f32 1.442695, %v2440_v12  ;;  %v2313_v15 = vadd.f32 %v7020_v60, %v2249_v20 }
 0x6b7   :  { %v7132_v48 = vpop.eup %3870  ;;  %v2647_v33 = vmul.f32 %v3869_v7, %v7046_v19  ;;  %v2679_v4 = vmul.f32 %v3869_v7, %v7051_v55  ;;  %v2711_v6 = vmul.f32 %v3869_v7, %v7058_v35  ;;  %v2743_v0 = vmul.f32 %v3869_v7, %v7064_v45  ;;  %v7890_v35 = vld [vmem:[#allocation50_spill] sm:$0xff]  ;;  %v2251_v14 = vpop.trf.xlu0 }
 0x6b8   :  { %v7138_v2 = vpop.eup %3872  ;;  %v2581_v56 = vadd.f32 %v7127_v11, %v2565_v16  ;;  %3886 = vpow2.f32 %v2528_v41  ;;  %v2377_v26 = vsub.f32 %v2361_v13, %v7886_v3  ;;  %v2441_v60 = vsub.f32 %v2425_v36, %v7886_v3  ;;  %v7892_v3 = vld [vmem:[#allocation64_spill] sm:$0xff]  ;;  %v2283_v53 = vpop.trf.xlu1 }
 0x6b9   :  { %2663 = vst [vmem:[#allocation19 + $0x28] sm:$0xff] %v2647_v33  ;;  %2695 = vst [vmem:[#allocation21 + $0x28] sm:$0xff] %v2679_v4  ;;  %v2550_v19 = vadd.f32 %v7138_v2, %v7132_v48  ;;  %3888 = vpow2.f32 %v2338_v9  ;;  %v2530_v55 = vmul.f32 1.442695, %v2504_v43  ;;  %v2491_v45 = vadd.f32 %v7890_v35, %v7889_v1 }
 0x6ba   :  { %2727 = vst [vmem:[#allocation22 + $0x28] sm:$0xff] %v2711_v6  ;;  %2759 = vst [vmem:[#allocation24 + $0x28] sm:$0xff] %v2743_v0  ;;  %v7147_v54 = vpop.eup %3874  ;;  %3890 = vrcp.f32 %v2581_v56  ;;  %v2340_v31 = vmul.f32 1.442695, %v2313_v15  ;;  %v2505_v20 = vadd.f32 %v7891_v46, %v2281_v39  ;;  %v2300_v57 = vadd.f32 %v7893_v59, %v7892_v3 }
 0x6bb   :  { %v7152_v42 = vpop.eup %3876  ;;  %v2566_v38 = vadd.f32 %v7147_v54, %v2550_v19  ;;  %3892 = vpow2.f32 %v2402_v37  ;;  %v2362_v34 = vadd.f32 %v2250_v32, %v6738_v40  ;;  %v2426_v22 = vadd.f32 %v2282_v62, %v6734_v23 }
 0x6bc   :  { %3894 = vpow2.f32 %v2466_v27  ;;  %v2404_v17 = vmul.f32 1.442695, %v2377_v26  ;;  %v2468_v51 = vmul.f32 1.442695, %v2441_v60  ;;  %v2314_v50 = vadd.f32 %v7085_v5, %v2250_v32  ;;  %v3879_v47 = vpop.eup %3878  ;;  %v2252_v32 = vpop.trf.xlu0 }
 0x6bd   :  { %v2582_v39 = vadd.f32 %v7152_v42, %v2566_v38  ;;  %3896 = vpow2.f32 %v2530_v55  ;;  %v2506_v29 = vadd.f32 %v7098_v18, %v2282_v62  ;;  %v2363_v10 = vadd.f32 %v2251_v14, %v7890_v35  ;;  %v2284_v60 = vpop.trf.xlu1 }
 0x6be   :  { %v7161_v61 = vpop.eup %3880  ;;  %v2648_v40 = vmul.f32 %v3879_v47, %v7070_v30  ;;  %v2680_v23 = vmul.f32 %v3879_v47, %v7076_v24  ;;  %v2712_v58 = vmul.f32 %v3879_v47, %v7087_v52  ;;  %v2744_v12 = vmul.f32 %v3879_v47, %v7090_v8 }
 0x6bf   :  { %v7167_v5 = vpop.eup %3882  ;;  %3898 = vrcp.f32 %v2582_v39  ;;  %v2532_v41 = vmul.f32 1.442695, %v2505_v20  ;;  %v2378_v13 = vsub.f32 %v2362_v34, %v7888_v44  ;;  %v2442_v18 = vsub.f32 %v2426_v22, %v7888_v44 }
 0x6c0   :  { %v7171_v36 = vpop.eup %3884  ;;  %2664 = vst [vmem:[#allocation19 + $0x30] sm:$0xff] %v2648_v40  ;;  %2696 = vst [vmem:[#allocation21 + $0x30] sm:$0xff] %v2680_v23  ;;  %v2551_v30 = vadd.f32 %v7167_v5, %v7161_v61  ;;  %3900 = vpow2.f32 %v2340_v31  ;;  %v2342_v24 = vmul.f32 1.442695, %v2314_v50  ;;  %v2427_v52 = vadd.f32 %v2283_v53, %v6744_v49  ;;  %v7897_v40 = vld [vmem:[#allocation71_spill] sm:$0xff] }
 0x6c1   :  { %2728 = vst [vmem:[#allocation22 + $0x30] sm:$0xff] %v2712_v58  ;;  %2760 = vst [vmem:[#allocation24 + $0x30] sm:$0xff] %v2744_v12  ;;  %3902 = vpow2.f32 %v2404_v17  ;;  %v2315_v8 = vadd.f32 %v7121_v21, %v2251_v14  ;;  %v2534_v9 = vmul.f32 1.442695, %v2506_v29  ;;  %v2379_v43 = vsub.f32 %v2363_v10, %v7889_v1  ;;  %v2285_v58 = vpop.trf.xlu1 }
 0x6c2   :  { %v7177_v16 = vpop.eup %3886  ;;  %v2567_v44 = vadd.f32 %v7171_v36, %v2551_v30  ;;  %3904 = vpow2.f32 %v2468_v51  ;;  %v2406_v37 = vmul.f32 1.442695, %v2378_v13  ;;  %v2470_v27 = vmul.f32 1.442695, %v2442_v18 }
 0x6c3   :  { %v7181_v7 = vpop.eup %3888  ;;  %3906 = vpow2.f32 %v2532_v41  ;;  %v2507_v15 = vadd.f32 %v2491_v45, %v2283_v53  ;;  %v2443_v21 = vsub.f32 %v2427_v52, %v7889_v1  ;;  %v2316_v4 = vadd.f32 %v2300_v57, %v2252_v32  ;;  %v7894_v1 = vld [vmem:[#allocation69_spill] sm:$0xff]  ;;  %v2253_v57 = vpop.trf.xlu0 }
 0x6c4   :  { %v3891_v33 = vpop.eup %3890  ;;  %v2583_v49 = vadd.f32 %v7177_v16, %v2567_v44  ;;  %3908 = vpow2.f32 %v2342_v24  ;;  %v2492_v35 = vadd.f32 %v7894_v1, %v7892_v3  ;;  %v2408_v20 = vmul.f32 1.442695, %v2379_v43 }
 0x6c5   :  { %v7185_v6 = vpop.eup %3892  ;;  %v2649_v0 = vmul.f32 %v3891_v33, %v7100_v25  ;;  %v2681_v62 = vmul.f32 %v3891_v33, %v7110_v28  ;;  %v2713_v56 = vmul.f32 %v3891_v33, %v7123_v63  ;;  %v2745_v26 = vmul.f32 %v3891_v33, %v7127_v11  ;;  %v7895_v63 = vld [vmem:[#allocation66_spill] sm:$0xff] }
 0x6c6   :  { %v7191_v19 = vpop.eup %3894  ;;  %3910 = vrcp.f32 %v2583_v49  ;;  %v2552_v55 = vadd.f32 %v7185_v6, %v7181_v7  ;;  %v2344_v25 = vmul.f32 1.442695, %v2315_v8  ;;  %v2364_v28 = vadd.f32 %v2252_v32, %v7894_v1  ;;  %v7896_v11 = vld [vmem:[#allocation70_spill] sm:$0xff] }
 0x6c7   :  { %v7197_v45 = vpop.eup %3896  ;;  %2665 = vst [vmem:[#allocation19 + $0x38] sm:$0xff] %v2649_v0  ;;  %2697 = vst [vmem:[#allocation21 + $0x38] sm:$0xff] %v2681_v62  ;;  %3912 = vpow2.f32 %v2406_v37  ;;  %v2301_v31 = vadd.f32 %v7896_v11, %v7895_v63  ;;  %v2428_v14 = vadd.f32 %v2284_v60, %v7893_v59  ;;  %v2472_v34 = vmul.f32 1.442695, %v2443_v21 }
 0x6c8   :  { %2729 = vst [vmem:[#allocation22 + $0x38] sm:$0xff] %v2713_v56  ;;  %2761 = vst [vmem:[#allocation24 + $0x38] sm:$0xff] %v2745_v26  ;;  %v2568_v46 = vadd.f32 %v7191_v19, %v2552_v55  ;;  %3914 = vpow2.f32 %v2470_v27  ;;  %v2536_v22 = vmul.f32 1.442695, %v2507_v15  ;;  %v2346_v17 = vmul.f32 1.442695, %v2316_v4 }
 0x6c9   :  { %v3899_v38 = vpop.eup %3898  ;;  %3916 = vpow2.f32 %v2534_v9  ;;  %v2380_v53 = vsub.f32 %v2364_v28, %v7892_v3  ;;  %v2365_v23 = vadd.f32 %v2253_v57, %v7897_v40  ;;  %v2317_v18 = vadd.f32 %v2301_v31, %v2253_v57 }
 0x6ca   :  { %v7204_v51 = vpop.eup %3900  ;;  %v2650_v50 = vmul.f32 %v3899_v38, %v7132_v48  ;;  %v2682_v47 = vmul.f32 %v3899_v38, %v7138_v2  ;;  %v2714_v39 = vmul.f32 %v3899_v38, %v7147_v54  ;;  %v2746_v29 = vmul.f32 %v3899_v38, %v7152_v42 }
 0x6cb   :  { %v7210_v10 = vpop.eup %3902  ;;  %v2584_v59 = vadd.f32 %v7197_v45, %v2568_v46  ;;  %3918 = vpow2.f32 %v2344_v25  ;;  %v2444_v2 = vsub.f32 %v2428_v14, %v7892_v3  ;;  %v2508_v54 = vadd.f32 %v2492_v35, %v2284_v60 }
 0x6cc   :  { %v7215_v12 = vpop.eup %3904  ;;  %2666 = vst [vmem:[#allocation19 + $0x40] sm:$0xff] %v2650_v50  ;;  %2698 = vst [vmem:[#allocation21 + $0x40] sm:$0xff] %v2682_v47  ;;  %v2553_v48 = vadd.f32 %v7210_v10, %v7204_v51  ;;  %3920 = vpow2.f32 %v2408_v20  ;;  %v2429_v30 = vadd.f32 %v2285_v58, %v7896_v11  ;;  %v2410_v24 = vmul.f32 1.442695, %v2380_v53 }
 0x6cd   :  { %2730 = vst [vmem:[#allocation22 + $0x40] sm:$0xff] %v2714_v39  ;;  %2762 = vst [vmem:[#allocation24 + $0x40] sm:$0xff] %v2746_v29  ;;  %v7220_v42 = vpop.eup %3906  ;;  %3922 = vrcp.f32 %v2584_v59  ;;  %v2381_v52 = vsub.f32 %v2365_v23, %v7895_v63  ;;  %v2493_v8 = vadd.f32 %v7897_v40, %v7895_v63  ;;  %v2474_v44 = vmul.f32 1.442695, %v2444_v2 }
 0x6ce   :  { %v7222_v41 = vpop.eup %3908  ;;  %v2569_v13 = vadd.f32 %v7215_v12, %v2553_v48  ;;  %3924 = vpow2.f32 %v2472_v34  ;;  %v2538_v9 = vmul.f32 1.442695, %v2508_v54  ;;  %v2348_v4 = vmul.f32 1.442695, %v2317_v18 }
 0x6cf   :  { %3926 = vpow2.f32 %v2536_v22  ;;  %v2445_v0 = vsub.f32 %v2429_v30, %v7895_v63 }
 0x6d0   :  { %v3911_v3 = vpop.eup %3910  ;;  %v2585_v32 = vadd.f32 %v7220_v42, %v2569_v13  ;;  %3928 = vpow2.f32 %v2346_v17 }
 0x6d1   :  { %v7230_v43 = vpop.eup %3912  ;;  %v2651_v37 = vmul.f32 %v3911_v3, %v7161_v61  ;;  %v2683_v27 = vmul.f32 %v3911_v3, %v7167_v5  ;;  %v2715_v15 = vmul.f32 %v3911_v3, %v7171_v36  ;;  %v2747_v33 = vmul.f32 %v3911_v3, %v7177_v16 }
 0x6d2   :  { %v7236_v49 = vpop.eup %3914  ;;  %3930 = vrcp.f32 %v2585_v32  ;;  %v2554_v21 = vadd.f32 %v7230_v43, %v7222_v41  ;;  %v2412_v61 = vmul.f32 1.442695, %v2381_v52  ;;  %v2509_v5 = vadd.f32 %v2493_v8, %v2285_v58 }
 0x6d3   :  { %v3917_v62 = vpop.eup %3916  ;;  %2667 = vst [vmem:[#allocation19 + $0x48] sm:$0xff] %v2651_v37  ;;  %2699 = vst [vmem:[#allocation21 + $0x48] sm:$0xff] %v2683_v27  ;;  %3932 = vpow2.f32 %v2410_v24  ;;  %v2476_v60 = vmul.f32 1.442695, %v2445_v0 }
 0x6d4   :  { %2731 = vst [vmem:[#allocation22 + $0x48] sm:$0xff] %v2715_v15  ;;  %2763 = vst [vmem:[#allocation24 + $0x48] sm:$0xff] %v2747_v33  ;;  %v2570_v36 = vadd.f32 %v7236_v49, %v2554_v21  ;;  %3934 = vpow2.f32 %v2474_v44  ;;  %v2540_v35 = vmul.f32 1.442695, %v2509_v5 }
 0x6d5   :  { %v3919_v16 = vpop.eup %3918  ;;  %3936 = vpow2.f32 %v2538_v9 }
 0x6d6   :  { %v3921_v56 = vpop.eup %3920  ;;  %v2586_v26 = vadd.f32 %v3917_v62, %v2570_v36  ;;  %3938 = vpow2.f32 %v2348_v4 }
 0x6d7   :  { %v3923_v55 = vpop.eup %3922  ;;  %v2555_v1 = vadd.f32 %v3921_v56, %v3919_v16  ;;  %3940 = vpow2.f32 %v2412_v61 }
 0x6d8   :  { %v3925_v25 = vpop.eup %3924  ;;  %v2652_v28 = vmul.f32 %v3923_v55, %v7181_v7  ;;  %v2684_v63 = vmul.f32 %v3923_v55, %v7185_v6  ;;  %v2716_v11 = vmul.f32 %v3923_v55, %v7191_v19  ;;  %v2748_v31 = vmul.f32 %v3923_v55, %v7197_v45 }
 0x6d9   :  { %v3927_v46 = vpop.eup %3926  ;;  %3942 = vrcp.f32 %v2586_v26  ;;  %v2571_v20 = vadd.f32 %v3925_v25, %v2555_v1 }
 0x6da   :  { %v3929_v14 = vpop.eup %3928  ;;  %2668 = vst [vmem:[#allocation19 + $0x50] sm:$0xff] %v2652_v28  ;;  %2700 = vst [vmem:[#allocation21 + $0x50] sm:$0xff] %v2684_v63  ;;  %3944 = vpow2.f32 %v2476_v60 }
 0x6db   :  { %2732 = vst [vmem:[#allocation22 + $0x50] sm:$0xff] %v2716_v11  ;;  %2764 = vst [vmem:[#allocation24 + $0x50] sm:$0xff] %v2748_v31  ;;  %v2587_v57 = vadd.f32 %v3927_v46, %v2571_v20  ;;  %3946 = vpow2.f32 %v2540_v35 }
 0x6dc   :  { %v3931_v38 = vpop.eup %3930 }
 0x6dd   :  { %v3933_v34 = vpop.eup %3932  ;;  %v2653_v7 = vmul.f32 %v3931_v38, %v7204_v51  ;;  %v2685_v6 = vmul.f32 %v3931_v38, %v7210_v10  ;;  %v2717_v19 = vmul.f32 %v3931_v38, %v7215_v12  ;;  %v2749_v45 = vmul.f32 %v3931_v38, %v7220_v42 }
 0x6de   :  { %v3935_v22 = vpop.eup %3934  ;;  %3948 = vrcp.f32 %v2587_v57  ;;  %v2556_v17 = vadd.f32 %v3933_v34, %v3929_v14 }
 0x6df   :  { %v3937_v50 = vpop.eup %3936  ;;  %2669 = vst [vmem:[#allocation19 + $0x58] sm:$0xff] %v2653_v7  ;;  %2701 = vst [vmem:[#allocation21 + $0x58] sm:$0xff] %v2685_v6 }
 0x6e0   :  { %2733 = vst [vmem:[#allocation22 + $0x58] sm:$0xff] %v2717_v19  ;;  %2765 = vst [vmem:[#allocation24 + $0x58] sm:$0xff] %v2749_v45  ;;  %v3939_v47 = vpop.eup %3938  ;;  %v2572_v39 = vadd.f32 %v3935_v22, %v2556_v17 }
 0x6e1   :  { %v3941_v29 = vpop.eup %3940 }
 0x6e2   :  { %v2588_v59 = vadd.f32 %v3937_v50, %v2572_v39  ;;  %v2557_v53 = vadd.f32 %v3941_v29, %v3939_v47 }
 0x6e3   :  { %v3943_v51 = vpop.eup %3942 }
 0x6e4   :  { %v3945_v40 = vpop.eup %3944  ;;  %v2654_v10 = vmul.f32 %v3943_v51, %v7222_v41  ;;  %v2686_v23 = vmul.f32 %v3943_v51, %v7230_v43  ;;  %v2718_v58 = vmul.f32 %v3943_v51, %v7236_v49  ;;  %v2750_v12 = vmul.f32 %v3943_v51, %v3917_v62 }
 0x6e5   :  { %3950 = vrcp.f32 %v2588_v59  ;;  %v2573_v48 = vadd.f32 %v3945_v40, %v2557_v53  ;;  %v3947_v2 = vpop.eup %3946 }
 0x6e6   :  { %2670 = vst [vmem:[#allocation19 + $0x60] sm:$0xff] %v2654_v10  ;;  %2702 = vst [vmem:[#allocation21 + $0x60] sm:$0xff] %v2686_v23 }
 0x6e7   :  { %2734 = vst [vmem:[#allocation22 + $0x60] sm:$0xff] %v2718_v58  ;;  %2766 = vst [vmem:[#allocation24 + $0x60] sm:$0xff] %v2750_v12  ;;  %v2589_v54 = vadd.f32 %v3947_v2, %v2573_v48 }
 0x6e8   :  { %v3949_v42 = vpop.eup %3948 }
 0x6e9   :  { %v2655_v13 = vmul.f32 %v3949_v42, %v3919_v16  ;;  %v2687_v18 = vmul.f32 %v3949_v42, %v3921_v56  ;;  %v2719_v30 = vmul.f32 %v3949_v42, %v3925_v25  ;;  %v2751_v24 = vmul.f32 %v3949_v42, %v3927_v46 }
 0x6ea   :  { %3952 = vrcp.f32 %v2589_v54 }
 0x6eb   :  { %2671 = vst [vmem:[#allocation19 + $0x68] sm:$0xff] %v2655_v13  ;;  %2703 = vst [vmem:[#allocation21 + $0x68] sm:$0xff] %v2687_v18 }
 0x6ec   :  { %2735 = vst [vmem:[#allocation22 + $0x68] sm:$0xff] %v2719_v30  ;;  %2767 = vst [vmem:[#allocation24 + $0x68] sm:$0xff] %v2751_v24 }
 0x6ef   :  { %v3951_v41 = vpop.eup %3950 }
 0x6f0   :  { %v2656_v52 = vmul.f32 %v3951_v41, %v3929_v14  ;;  %v2688_v8 = vmul.f32 %v3951_v41, %v3933_v34  ;;  %v2720_v3 = vmul.f32 %v3951_v41, %v3935_v22  ;;  %v2752_v32 = vmul.f32 %v3951_v41, %v3937_v50 }
 0x6f2   :  { %2672 = vst [vmem:[#allocation19 + $0x70] sm:$0xff] %v2656_v52  ;;  %2704 = vst [vmem:[#allocation21 + $0x70] sm:$0xff] %v2688_v8 }
 0x6f3   :  { %2736 = vst [vmem:[#allocation22 + $0x70] sm:$0xff] %v2720_v3  ;;  %2768 = vst [vmem:[#allocation24 + $0x70] sm:$0xff] %v2752_v32 }
 0x6f4   :  { %v3953_v44 = vpop.eup %3952 }
 0x6f5   :  { %v2657_v9 = vmul.f32 %v3953_v44, %v3939_v47  ;;  %v2689_v43 = vmul.f32 %v3953_v44, %v3941_v29  ;;  %v2721_v37 = vmul.f32 %v3953_v44, %v3945_v40  ;;  %v2753_v27 = vmul.f32 %v3953_v44, %v3947_v2 }
 0x6f7   :  { %2673 = vst [vmem:[#allocation19 + $0x78] sm:$0xff] %v2657_v9  ;;  %2705 = vst [vmem:[#allocation21 + $0x78] sm:$0xff] %v2689_v43 }
 0x6f8   :  { %2737 = vst [vmem:[#allocation22 + $0x78] sm:$0xff] %v2721_v37  ;;  %2769 = vst [vmem:[#allocation24 + $0x78] sm:$0xff] %v2753_v27 }
 0x6f9   :  { %4185 = shalt.err (!%p4182_p12)
}
 0x6fa   :  { %s4186_s9 = scalar_lea.hbm %s7352_s18, 2048 }
 0x6fb   :  { %p4187_p13 = scmp.ne.s32.totalorder %s7352_s18, %s4186_s9  ;;  %p4190_p0 = scmp.lt.u32.totalorder %s4186_s9, %s7352_s18 }
 0x6fd   :  { %p4192_p1 = pnand %p4190_p0, %p4187_p13 }
 0x6ff   :  { %4195 = shalt.err (!%p4192_p1)
}
 0x700   :  { %2833 = dma.vmem_to_hbm [thread:$0]  %s2828_s8, 2048, %s7352_s18, [#allocation20], %s4595_s24, %s4595_s24, %s4596_s25  }
 0x701   :  { %s4196_s29 = scalar_lea.vmem %s7253_s28, 2048  ;;  %p4201_p3 = scmp.lt.s32.totalorder %s7253_s28, %s7253_s28 }
 0x702   :  { %p4197_p2 = scmp.ne.s32.totalorder %s7253_s28, %s4196_s29  ;;  %p4202_p4 = scmp.lt.s32.totalorder %s4196_s29, %s4196_s29 }
 0x704   :  { %p4203_p5 = por %p4202_p4, %p4201_p3 }
 0x706   :  { %p4204_p6 = pnand %p4203_p5, %p4197_p2 }
 0x708   :  { %4207 = shalt.err (!%p4204_p6)
}
 0x709   :  { %s4208_s3 = scalar_lea.hbm %s7354_s20, 2048 }
 0x70a   :  { %p4209_p7 = scmp.ne.s32.totalorder %s7354_s20, %s4208_s3  ;;  %p4212_p8 = scmp.lt.u32.totalorder %s4208_s3, %s7354_s20 }
 0x70c   :  { %p4214_p9 = pnand %p4212_p8, %p4209_p7 }
 0x70e   :  { %4217 = shalt.err (!%p4214_p9)
}
 0x70f   :  { %2857 = dma.vmem_to_hbm [thread:$0]  %s7253_s28, 2048, %s7354_s20, [#allocation23], %s4595_s24, %s4595_s24, %s4596_s25  }
 0x710   :  { %s4218_s5 = scalar_lea.vmem %s7255_s22, 2048  ;;  %p4223_p11 = scmp.lt.s32.totalorder %s7255_s22, %s7255_s22 }
 0x711   :  { %p4219_p10 = scmp.ne.s32.totalorder %s7255_s22, %s4218_s5  ;;  %p4224_p12 = scmp.lt.s32.totalorder %s4218_s5, %s4218_s5 }
 0x713   :  { %p4225_p13 = por %p4224_p12, %p4223_p11 }
 0x715   :  { %p4226_p0 = pnand %p4225_p13, %p4219_p10 }
 0x717   :  { %4229 = shalt.err (!%p4226_p0)
}
 0x718   :  { %s4230_s4 = scalar_lea.hbm %s7353_s19, 2048 }
 0x719   :  { %p4231_p1 = scmp.ne.s32.totalorder %s7353_s19, %s4230_s4  ;;  %p4234_p2 = scmp.lt.u32.totalorder %s4230_s4, %s7353_s19 }
 0x71b   :  { %p4236_p3 = pnand %p4234_p2, %p4231_p1 }
 0x71d   :  { %4239 = shalt.err (!%p4236_p3)
}
 0x71e   :  { %2845 = dma.vmem_to_hbm [thread:$0]  %s7255_s22, 2048, %s7353_s19, [#allocation20], %s4595_s24, %s4595_s24, %s4596_s25  }
 0x71f   :  { %s4240_s15 = scalar_lea.vmem %s7257_s13, 2048  ;;  %p4245_p5 = scmp.lt.s32.totalorder %s7257_s13, %s7257_s13 }
 0x720   :  { %p4241_p4 = scmp.ne.s32.totalorder %s7257_s13, %s4240_s15  ;;  %p4246_p6 = scmp.lt.s32.totalorder %s4240_s15, %s4240_s15 }
 0x722   :  { %p4247_p7 = por %p4246_p6, %p4245_p5 }
 0x724   :  { %p4248_p8 = pnand %p4247_p7, %p4241_p4 }
 0x726   :  { %4251 = shalt.err (!%p4248_p8)
}
 0x727   :  { %s4252_s26 = scalar_lea.hbm %s7355_s21, 2048 }
 0x728   :  { %p4253_p9 = scmp.ne.s32.totalorder %s7355_s21, %s4252_s26  ;;  %p4256_p10 = scmp.lt.u32.totalorder %s4252_s26, %s7355_s21 }
 0x72a   :  { %p4258_p11 = pnand %p4256_p10, %p4253_p9 }
 0x72c   :  { %4261 = shalt.err (!%p4258_p11)
}
 0x72d   :  { %2869 = dma.vmem_to_hbm [thread:$0]  %s7257_s13, 2048, %s7355_s21, [#allocation23], %s4595_s24, %s4595_s24, %s4596_s25  }
 0x72e   :  { %4420 = dma.done.wait [#allocation5], 16  }
 0x72f   :  { %4421 = vsyncadd [#allocation5], 4294967280 }
 0x730   :  { %4422 = dma.done.wait [#allocation14], 2064  }
 0x731   :  { %4423 = vsyncadd [#allocation14], 4294965232 }
 0x732   :  { %4424 = dma.done.wait [#allocation17], 32  }
 0x733   :  { %4425 = vsyncadd [#allocation17], 4294967264 }
 0x734   :  { %4426 = dma.done.wait [#allocation20], 4096  }
 0x735   :  { %4427 = vsyncadd [#allocation20], 4294963200 }
 0x736   :  { %4428 = dma.done.wait [#allocation23], 4096  }
 0x737   :  { %4429 = vsyncadd [#allocation23], 4294963200 }
 0x738   :  { %2897 = vsyncpa [#allocation4], 1 }
 0x739   :  { %2898 = vsyncpa [#allocation7], 1 }
 0x73a   :  { %2899 = vsyncpa [#allocation10], 1 }
 0x73b   :  { %2900 = vsyncpa [#allocation5], 1 }
 0x73c   :  { %2901 = vsyncpa [#allocation14], 1 }
 0x73d   :  { %2902 = vsyncpa [#allocation17], 1 }
 0x73e   :  { %2903 = vsyncpa [#allocation20], 1 }
 0x73f   :  { %2904 = vsyncpa [#allocation23], 1 }

</bundles_post_ra>
